<compile_context>
chip_gen: v6e
topology: v6e:2x2x1
jax: 0.10.0
libtpu: 0.0.40
codegen_flags: <defaults>
</compile_context>

<pallas_src>
import numpy as np
import jax
import jax.numpy as jnp
from jax.experimental import pallas as pl
from jax.experimental.pallas import tpu as pltpu

LEAKY_SLOPE = 0.01   # nn.LeakyReLU default negative_slope
BN_EPS = 1e-5        # nn.BatchNorm1d default eps
SLAB_WIDTH = 256     # widest channel dim of any gamma/beta/bias row (multiple of 128)
MIN_BF16_CIN = 16    # keep tiny-K matmuls (first layer, C_in=5) in f32


# ------------------------------------------------------------------------- helpers
def _matmul_dtype(cin):
    return jnp.bfloat16 if cin >= MIN_BF16_CIN else jnp.float32


def _leaky_relu(x):
    return jnp.where(x > 0, x, LEAKY_SLOPE * x)


def _bn_train_onepass(x, gamma, beta):
    # PyTorch BatchNorm1d (training): batch mean / biased batch variance.
    # Single-pass variance in f32 (safe here; clamp guards tiny negative rounding).
    m1 = jnp.mean(x, axis=0, keepdims=True)
    m2 = jnp.mean(x * x, axis=0, keepdims=True)
    var = jnp.maximum(m2 - m1 * m1, 0.0)
    return (x - m1) * jax.lax.rsqrt(var + BN_EPS) * gamma + beta


# ------------------------------------------------------------------------ net specs
def make_fc_spec(fc_cfg, c_in, c_out, append_bn=False):
    """Mirror of LatentEncoderBig.make_fc_layers as a layer-type spec."""
    spec = []
    for c in fc_cfg:
        spec.append(("lbr", c_in, c))      # Linear -> BatchNorm1d -> LeakyReLU
        c_in = c
    spec.append(("lin", c_in, c_out))      # final Linear
    if append_bn:
        spec.append(("bnl", c_out))        # BatchNorm1d -> LeakyReLU
    return spec


# --------------------------------------------------------------------------- kernel
def build_encoder_kernel(fc1_spec, block_specs, n_weights, pad_var):
    def kernel(*refs):
        pose_ref = refs[0]
        w_refs = refs[1:1 + n_weights]
        slab_ref = refs[1 + n_weights]
        out_ref = refs[2 + n_weights]

        w_it = iter(w_refs)
        row = [0]

        def next_vec(width):               # (1, width) f32 row from the packed slab
            r = row[0]
            row[0] = r + 1
            return slab_ref[r:r + 1, 0:width]

        def run_seq(spec, x):
            for entry in spec:
                kind = entry[0]
                if kind == "lbr":          # Linear (bias cancelled by BN) -> BN -> LeakyReLU
                    _, cin, cout = entry
                    w = next(w_it)[...]    # lazy load right before use
                    y = jnp.dot(x.astype(w.dtype), w,
                                preferred_element_type=jnp.float32)
                    g = next_vec(cout)
                    be = next_vec(cout)
                    x = _leaky_relu(_bn_train_onepass(y, g, be))
                elif kind == "lin":        # final Linear (bias kept)
                    w = next(w_it)[...]
                    b = next_vec(w.shape[1])
                    x = jnp.dot(x.astype(w.dtype), w,
                                preferred_element_type=jnp.float32) + b
                else:                      # "bnl": BatchNorm1d -> LeakyReLU (append_bn)
                    _, c = entry
                    g = next_vec(c)
                    be = next_vec(c)
                    x = _leaky_relu(_bn_train_onepass(x, g, be))
            return x

        latent = run_seq(fc1_spec, pose_ref[...])
        # TODO(synk): on v7x the per-block (l1 var-pred head, l2 latent update) pair is
        # independent given `latent` and could be split across the two TensorCores via
        # pl.core_map + pltpu.create_tensorcore_mesh; kept single-core here.
        for i, (l1_spec, l2_spec) in enumerate(block_specs):
            var_pred = run_seq(l1_spec, latent)            # (B, pad_var), lane-dense
            out_ref[:, i * pad_var:(i + 1) * pad_var] = var_pred.astype(out_ref.dtype)
            if l2_spec is not None:
                latent = run_seq(l2_spec, latent)

    return kernel


def latent_encoder_big_pallas(pose_param, kernel_weights, slab,
                              fc1_spec, block_specs, num_var, pad_var):
    B = pose_param.shape[0]
    n_out = len(block_specs)
    n_w = len(kernel_weights)
    kernel = build_encoder_kernel(fc1_spec, block_specs, n_w, pad_var)
    vmem = pl.BlockSpec(memory_space=pltpu.MemorySpace.VMEM)
    packed = pl.pallas_call(
        kernel,
        out_shape=jax.ShapeDtypeStruct((B, n_out * pad_var), jnp.float32),
        in_specs=[vmem] * (1 + n_w + 1),
        out_specs=vmem,
    )(pose_param.astype(jnp.float32), *kernel_weights, slab)
    # Slice the lane-dense packed output back into per-block var_pred heads.
    return [packed[:, i * pad_var:i * pad_var + num_var] for i in range(n_out)]


# ----------------------------------------------------------------------- param init
def _init_linear(key, cin, cout):
    key, wk, bk = jax.random.split(key, 3)
    bound = 1.0 / float(np.sqrt(cin))
    w = jax.random.uniform(wk, (cin, cout), jnp.float32, -bound, bound)
    b = jax.random.uniform(bk, (1, cout), jnp.float32, -bound, bound)
    return key, w, b


def _init_bn(key, c):
    key, gk, bk = jax.random.split(key, 3)
    g = jax.random.uniform(gk, (1, c), jnp.float32, 0.5, 1.5)
    b = jax.random.uniform(bk, (1, c), jnp.float32, -0.5, 0.5)
    return key, g, b


def _pad_row(v, width=SLAB_WIDTH):
    return jnp.pad(v, ((0, 0), (0, width - v.shape[1])))


def build_seq_params(key, spec, pad_final_to=None):
    """Returns (key, ref_params, kernel_weights, slab_rows).

    ref_params     : flat f32 params in PyTorch order (incl. the pre-BN biases).
    kernel_weights : per-Linear weights for the kernel (bf16 where C_in>=16; the
                     final Linear optionally zero-padded to pad_final_to columns).
    slab_rows      : (1, SLAB_WIDTH) rows in kernel consumption order
                     (gamma, beta per 'lbr'/'bnl'; bias per 'lin')."""
    ref_params, kernel_weights, slab_rows = [], [], []
    for entry in spec:
        kind = entry[0]
        if kind == "lbr":
            _, cin, cout = entry
            key, w, b = _init_linear(key, cin, cout)
            key, g, be = _init_bn(key, cout)
            ref_params += [w, b, g, be]
            kernel_weights.append(w.astype(_matmul_dtype(cin)))   # pre-BN bias dropped
            slab_rows += [_pad_row(g), _pad_row(be)]
        elif kind == "lin":
            _, cin, cout = entry
            key, w, b = _init_linear(key, cin, cout)
            ref_params += [w, b]
            if pad_final_to is not None and cout < pad_final_to:
                w = jnp.pad(w, ((0, 0), (0, pad_final_to - cout)))
                b = jnp.pad(b, ((0, 0), (0, pad_final_to - cout)))
            kernel_weights.append(w.astype(_matmul_dtype(cin)))
            slab_rows += [_pad_row(b)]
        else:  # "bnl"
            _, c = entry
            key, g, be = _init_bn(key, c)
            ref_params += [g, be]
            slab_rows += [_pad_row(g), _pad_row(be)]
    return key, ref_params, kernel_weights, slab_rows


# ------------------------------------------------------------------------ reference
def reference_forward(pose_param, flat_params, fc1_spec, block_specs):
    """Pure-JAX reference with PyTorch semantics (pre-BN Linear biases kept,
    two-pass BN variance) and the same matmul precision policy as the kernel."""
    it = iter(flat_params)

    def dot(x, w, cin):
        dt = _matmul_dtype(cin)
        return jnp.dot(x.astype(dt), w.astype(dt), preferred_element_type=jnp.float32)

    def bn(x, g, b):
        mean = jnp.mean(x, axis=0, keepdims=True)
        var = jnp.mean((x - mean) ** 2, axis=0, keepdims=True)
        return (x - mean) * jax.lax.rsqrt(var + BN_EPS) * g + b

    def run(spec, x):
        for entry in spec:
            kind = entry[0]
            if kind == "lbr":
                _, cin, cout = entry
                w = next(it); b = next(it); g = next(it); be = next(it)
                x = _leaky_relu(bn(dot(x, w, cin) + b, g, be))
            elif kind == "lin":
                _, cin, cout = entry
                w = next(it); b = next(it)
                x = dot(x, w, cin) + b
            else:
                _, c = entry
                g = next(it); be = next(it)
                x = _leaky_relu(bn(x, g, be))
        return x

    latent = run(fc1_spec, pose_param.astype(jnp.float32))
    outs = []
    for (l1_spec, l2_spec) in block_specs:
        outs.append(run(l1_spec, latent))
        if l2_spec is not None:
            latent = run(l2_spec, latent)
    return outs


# ----------------------------------------------------------------------------- main
if __name__ == "__main__":
    # Config mirroring LatentEncoderBig defaults (SKIP_CONNECTION / REPEAT_MLP off).
    model_cfg = dict(INPUT_CHANNEL=5, FC1_DIM=32, IF_3D=False, NUM_INNER_LAYER=3,
                     APPEND_BN=False)
    runtime_cfg = dict(num_edges=12, num_bound_verts=8, rotate_angle=True,
                       fix_bound=False, num_layers=2)

    input_channels = model_cfg["INPUT_CHANNEL"]
    fc1_dim = model_cfg["FC1_DIM"]
    num_var = runtime_cfg["num_edges"]
    if not runtime_cfg["fix_bound"]:
        num_var += runtime_cfg["num_bound_verts"]
    if runtime_cfg["rotate_angle"]:
        num_var += 1
    if model_cfg["IF_3D"]:
        num_var *= model_cfg["NUM_INNER_LAYER"]
    num_layers = runtime_cfg["num_layers"]
    latent_dim = fc1_dim * 4                      # 128
    pad_var = ((num_var + 127) // 128) * 128      # lane-dense per-head width (128)

    fc1_spec = make_fc_spec([fc1_dim, fc1_dim, fc1_dim * 2, fc1_dim * 2, fc1_dim * 4],
                            input_channels, fc1_dim * 4)
    block_specs = []
    for i in range(num_layers):
        l1 = make_fc_spec([latent_dim * 2, fc1_dim * 4, fc1_dim * 8], latent_dim, num_var)
        l2 = (make_fc_spec([latent_dim, fc1_dim, fc1_dim], latent_dim, latent_dim,
                           append_bn=model_cfg["APPEND_BN"])
              if i < num_layers - 1 else None)
        block_specs.append((l1, l2))

    # Deterministic parameter build (reference params + packed kernel params).
    key = jax.random.PRNGKey(0)
    ref_params, kernel_weights, slab_rows = [], [], []
    key, rp, kw, sr = build_seq_params(key, fc1_spec)
    ref_params += rp; kernel_weights += kw; slab_rows += sr
    for (l1, l2) in block_specs:
        key, rp, kw, sr = build_seq_params(key, l1, pad_final_to=pad_var)
        ref_params += rp; kernel_weights += kw; slab_rows += sr
        if l2 is not None:
            key, rp, kw, sr = build_seq_params(key, l2)
            ref_params += rp; kernel_weights += kw; slab_rows += sr
    slab = jnp.concatenate(slab_rows, axis=0)     # (32, 256) f32 — one DMA

    # Small deterministic input.  NOTE: at B=8 the kernel is latency-bound (<6% MXU
    # row utilization); if the application can fuse larger batches / several encoder
    # instances into one call (B >= 128/256) do so — BN stats are per-batch, so keep
    # the whole batch in one tile.
    B = 8
    key, xk = jax.random.split(key)
    pose_param = jax.random.normal(xk, (B, input_channels), jnp.float32)

    outs = latent_encoder_big_pallas(pose_param, kernel_weights, slab,
                                     fc1_spec, block_specs, num_var, pad_var)
    outs = jax.block_until_ready(outs)

    refs = reference_forward(pose_param, ref_params, fc1_spec, block_specs)
    for i, (o, r) in enumerate(zip(outs, refs)):
        assert o.shape == (B, num_var), (i, o.shape)
        np.testing.assert_allclose(np.asarray(o), np.asarray(r), rtol=2e-2, atol=2e-2)

    print("KERNEL_OK")
</pallas_src>

<mosaic_0001>
module attributes {stable_mosaic.version = 11 : i64} {
  func.func @kernel(%arg0: memref<8x5xf32, #tpu.memory_space<vmem>>, %arg1: memref<5x32xf32, #tpu.memory_space<vmem>>, %arg2: memref<32x32xbf16, #tpu.memory_space<vmem>>, %arg3: memref<32x64xbf16, #tpu.memory_space<vmem>>, %arg4: memref<64x64xbf16, #tpu.memory_space<vmem>>, %arg5: memref<64x128xbf16, #tpu.memory_space<vmem>>, %arg6: memref<128x128xbf16, #tpu.memory_space<vmem>>, %arg7: memref<128x256xbf16, #tpu.memory_space<vmem>>, %arg8: memref<256x128xbf16, #tpu.memory_space<vmem>>, %arg9: memref<128x256xbf16, #tpu.memory_space<vmem>>, %arg10: memref<256x128xbf16, #tpu.memory_space<vmem>>, %arg11: memref<128x128xbf16, #tpu.memory_space<vmem>>, %arg12: memref<128x32xbf16, #tpu.memory_space<vmem>>, %arg13: memref<32x32xbf16, #tpu.memory_space<vmem>>, %arg14: memref<32x128xbf16, #tpu.memory_space<vmem>>, %arg15: memref<128x256xbf16, #tpu.memory_space<vmem>>, %arg16: memref<256x128xbf16, #tpu.memory_space<vmem>>, %arg17: memref<128x256xbf16, #tpu.memory_space<vmem>>, %arg18: memref<256x128xbf16, #tpu.memory_space<vmem>>, %arg19: memref<32x256xf32, #tpu.memory_space<vmem>>, %arg20: memref<8x256xf32, #tpu.memory_space<vmem>>) attributes {dimension_semantics = [], scalar_prefetch = 0 : i64, scratch_operands = 0 : i64, tpu.core_type = #tpu.core_type<tc>} {
    %c0 = arith.constant 0 : index
    %c0_0 = arith.constant 0 : index
    %0 = vector.load %arg0[%c0, %c0_0] : memref<8x5xf32, #tpu.memory_space<vmem>>, vector<8x5xf32>
    %c0_1 = arith.constant 0 : index
    %c0_2 = arith.constant 0 : index
    %1 = vector.load %arg1[%c0_1, %c0_2] : memref<5x32xf32, #tpu.memory_space<vmem>>, vector<5x32xf32>
    %cst = arith.constant dense<0.000000e+00> : vector<8x32xf32>
    %2 = tpu.matmul %0, %1, %cst {dimension_numbers = #tpu.dot_dimension_numbers<[1], [0], [0], [1], [0, 0, 1, 1], [], []>} : vector<8x5xf32>, vector<5x32xf32>, vector<8x32xf32> -> vector<8x32xf32>
    %c0_3 = arith.constant 0 : index
    %c0_4 = arith.constant 0 : index
    %3 = vector.load %arg19[%c0_3, %c0_4] : memref<32x256xf32, #tpu.memory_space<vmem>>, vector<1x32xf32>
    %c1 = arith.constant 1 : index
    %c0_5 = arith.constant 0 : index
    %4 = vector.load %arg19[%c1, %c0_5] : memref<32x256xf32, #tpu.memory_space<vmem>>, vector<1x32xf32>
    %cst_6 = arith.constant dense<0.000000e+00> : vector<32xf32>
    %5 = vector.multi_reduction <add>, %2, %cst_6 [0] : vector<8x32xf32> to vector<32xf32>
    %6 = vector.shape_cast %5 : vector<32xf32> to vector<1x32xf32>
    %cst_7 = arith.constant 8.000000e+00 : f32
    %7 = vector.broadcast %cst_7 : f32 to vector<1x32xf32>
    %8 = arith.divf %6, %7 : vector<1x32xf32>
    %9 = arith.mulf %2, %2 : vector<8x32xf32>
    %cst_8 = arith.constant dense<0.000000e+00> : vector<32xf32>
    %10 = vector.multi_reduction <add>, %9, %cst_8 [0] : vector<8x32xf32> to vector<32xf32>
    %11 = vector.shape_cast %10 : vector<32xf32> to vector<1x32xf32>
    %cst_9 = arith.constant 8.000000e+00 : f32
    %12 = vector.broadcast %cst_9 : f32 to vector<1x32xf32>
    %13 = arith.divf %11, %12 : vector<1x32xf32>
    %14 = arith.mulf %8, %8 : vector<1x32xf32>
    %15 = arith.subf %13, %14 : vector<1x32xf32>
    %cst_10 = arith.constant 0.000000e+00 : f32
    %16 = vector.broadcast %cst_10 : f32 to vector<1x32xf32>
    %17 = arith.maximumf %15, %16 : vector<1x32xf32>
    %18 = vector.broadcast %8 : vector<1x32xf32> to vector<8x32xf32>
    %19 = arith.subf %2, %18 : vector<8x32xf32>
    %cst_11 = arith.constant 9.99999974E-6 : f32
    %20 = vector.broadcast %cst_11 : f32 to vector<1x32xf32>
    %21 = arith.addf %17, %20 : vector<1x32xf32>
    %22 = math.rsqrt %21 : vector<1x32xf32>
    %23 = vector.broadcast %22 : vector<1x32xf32> to vector<8x32xf32>
    %24 = arith.mulf %19, %23 : vector<8x32xf32>
    %25 = vector.broadcast %3 : vector<1x32xf32> to vector<8x32xf32>
    %26 = arith.mulf %24, %25 : vector<8x32xf32>
    %27 = vector.broadcast %4 : vector<1x32xf32> to vector<8x32xf32>
    %28 = arith.addf %26, %27 : vector<8x32xf32>
    %cst_12 = arith.constant 0.000000e+00 : f32
    %29 = vector.broadcast %cst_12 : f32 to vector<8x32xf32>
    %30 = arith.cmpf ogt, %28, %29 : vector<8x32xf32>
    %cst_13 = arith.constant 0.00999999977 : f32
    %31 = vector.broadcast %cst_13 : f32 to vector<8x32xf32>
    %32 = arith.mulf %31, %28 : vector<8x32xf32>
    %33 = arith.select %30, %28, %32 : vector<8x32xi1>, vector<8x32xf32>
    %c0_14 = arith.constant 0 : index
    %c0_15 = arith.constant 0 : index
    %34 = vector.load %arg2[%c0_14, %c0_15] : memref<32x32xbf16, #tpu.memory_space<vmem>>, vector<32x32xbf16>
    %35 = arith.truncf %33 : vector<8x32xf32> to vector<8x32xbf16>
    %cst_16 = arith.constant dense<0.000000e+00> : vector<8x32xf32>
    %36 = tpu.matmul %35, %34, %cst_16 {dimension_numbers = #tpu.dot_dimension_numbers<[1], [0], [0], [1], [0, 0, 1, 1], [], []>} : vector<8x32xbf16>, vector<32x32xbf16>, vector<8x32xf32> -> vector<8x32xf32>
    %c2 = arith.constant 2 : index
    %c0_17 = arith.constant 0 : index
    %37 = vector.load %arg19[%c2, %c0_17] : memref<32x256xf32, #tpu.memory_space<vmem>>, vector<1x32xf32>
    %c3 = arith.constant 3 : index
    %c0_18 = arith.constant 0 : index
    %38 = vector.load %arg19[%c3, %c0_18] : memref<32x256xf32, #tpu.memory_space<vmem>>, vector<1x32xf32>
    %cst_19 = arith.constant dense<0.000000e+00> : vector<32xf32>
    %39 = vector.multi_reduction <add>, %36, %cst_19 [0] : vector<8x32xf32> to vector<32xf32>
    %40 = vector.shape_cast %39 : vector<32xf32> to vector<1x32xf32>
    %cst_20 = arith.constant 8.000000e+00 : f32
    %41 = vector.broadcast %cst_20 : f32 to vector<1x32xf32>
    %42 = arith.divf %40, %41 : vector<1x32xf32>
    %43 = arith.mulf %36, %36 : vector<8x32xf32>
    %cst_21 = arith.constant dense<0.000000e+00> : vector<32xf32>
    %44 = vector.multi_reduction <add>, %43, %cst_21 [0] : vector<8x32xf32> to vector<32xf32>
    %45 = vector.shape_cast %44 : vector<32xf32> to vector<1x32xf32>
    %cst_22 = arith.constant 8.000000e+00 : f32
    %46 = vector.broadcast %cst_22 : f32 to vector<1x32xf32>
    %47 = arith.divf %45, %46 : vector<1x32xf32>
    %48 = arith.mulf %42, %42 : vector<1x32xf32>
    %49 = arith.subf %47, %48 : vector<1x32xf32>
    %cst_23 = arith.constant 0.000000e+00 : f32
    %50 = vector.broadcast %cst_23 : f32 to vector<1x32xf32>
    %51 = arith.maximumf %49, %50 : vector<1x32xf32>
    %52 = vector.broadcast %42 : vector<1x32xf32> to vector<8x32xf32>
    %53 = arith.subf %36, %52 : vector<8x32xf32>
    %cst_24 = arith.constant 9.99999974E-6 : f32
    %54 = vector.broadcast %cst_24 : f32 to vector<1x32xf32>
    %55 = arith.addf %51, %54 : vector<1x32xf32>
    %56 = math.rsqrt %55 : vector<1x32xf32>
    %57 = vector.broadcast %56 : vector<1x32xf32> to vector<8x32xf32>
    %58 = arith.mulf %53, %57 : vector<8x32xf32>
    %59 = vector.broadcast %37 : vector<1x32xf32> to vector<8x32xf32>
    %60 = arith.mulf %58, %59 : vector<8x32xf32>
    %61 = vector.broadcast %38 : vector<1x32xf32> to vector<8x32xf32>
    %62 = arith.addf %60, %61 : vector<8x32xf32>
    %cst_25 = arith.constant 0.000000e+00 : f32
    %63 = vector.broadcast %cst_25 : f32 to vector<8x32xf32>
    %64 = arith.cmpf ogt, %62, %63 : vector<8x32xf32>
    %cst_26 = arith.constant 0.00999999977 : f32
    %65 = vector.broadcast %cst_26 : f32 to vector<8x32xf32>
    %66 = arith.mulf %65, %62 : vector<8x32xf32>
    %67 = arith.select %64, %62, %66 : vector<8x32xi1>, vector<8x32xf32>
    %c0_27 = arith.constant 0 : index
    %c0_28 = arith.constant 0 : index
    %68 = vector.load %arg3[%c0_27, %c0_28] : memref<32x64xbf16, #tpu.memory_space<vmem>>, vector<32x64xbf16>
    %69 = arith.truncf %67 : vector<8x32xf32> to vector<8x32xbf16>
    %cst_29 = arith.constant dense<0.000000e+00> : vector<8x64xf32>
    %70 = tpu.matmul %69, %68, %cst_29 {dimension_numbers = #tpu.dot_dimension_numbers<[1], [0], [0], [1], [0, 0, 1, 1], [], []>} : vector<8x32xbf16>, vector<32x64xbf16>, vector<8x64xf32> -> vector<8x64xf32>
    %c4 = arith.constant 4 : index
    %c0_30 = arith.constant 0 : index
    %71 = vector.load %arg19[%c4, %c0_30] : memref<32x256xf32, #tpu.memory_space<vmem>>, vector<1x64xf32>
    %c5 = arith.constant 5 : index
    %c0_31 = arith.constant 0 : index
    %72 = vector.load %arg19[%c5, %c0_31] : memref<32x256xf32, #tpu.memory_space<vmem>>, vector<1x64xf32>
    %cst_32 = arith.constant dense<0.000000e+00> : vector<64xf32>
    %73 = vector.multi_reduction <add>, %70, %cst_32 [0] : vector<8x64xf32> to vector<64xf32>
    %74 = vector.shape_cast %73 : vector<64xf32> to vector<1x64xf32>
    %cst_33 = arith.constant 8.000000e+00 : f32
    %75 = vector.broadcast %cst_33 : f32 to vector<1x64xf32>
    %76 = arith.divf %74, %75 : vector<1x64xf32>
    %77 = arith.mulf %70, %70 : vector<8x64xf32>
    %cst_34 = arith.constant dense<0.000000e+00> : vector<64xf32>
    %78 = vector.multi_reduction <add>, %77, %cst_34 [0] : vector<8x64xf32> to vector<64xf32>
    %79 = vector.shape_cast %78 : vector<64xf32> to vector<1x64xf32>
    %cst_35 = arith.constant 8.000000e+00 : f32
    %80 = vector.broadcast %cst_35 : f32 to vector<1x64xf32>
    %81 = arith.divf %79, %80 : vector<1x64xf32>
    %82 = arith.mulf %76, %76 : vector<1x64xf32>
    %83 = arith.subf %81, %82 : vector<1x64xf32>
    %cst_36 = arith.constant 0.000000e+00 : f32
    %84 = vector.broadcast %cst_36 : f32 to vector<1x64xf32>
    %85 = arith.maximumf %83, %84 : vector<1x64xf32>
    %86 = vector.broadcast %76 : vector<1x64xf32> to vector<8x64xf32>
    %87 = arith.subf %70, %86 : vector<8x64xf32>
    %cst_37 = arith.constant 9.99999974E-6 : f32
    %88 = vector.broadcast %cst_37 : f32 to vector<1x64xf32>
    %89 = arith.addf %85, %88 : vector<1x64xf32>
    %90 = math.rsqrt %89 : vector<1x64xf32>
    %91 = vector.broadcast %90 : vector<1x64xf32> to vector<8x64xf32>
    %92 = arith.mulf %87, %91 : vector<8x64xf32>
    %93 = vector.broadcast %71 : vector<1x64xf32> to vector<8x64xf32>
    %94 = arith.mulf %92, %93 : vector<8x64xf32>
    %95 = vector.broadcast %72 : vector<1x64xf32> to vector<8x64xf32>
    %96 = arith.addf %94, %95 : vector<8x64xf32>
    %cst_38 = arith.constant 0.000000e+00 : f32
    %97 = vector.broadcast %cst_38 : f32 to vector<8x64xf32>
    %98 = arith.cmpf ogt, %96, %97 : vector<8x64xf32>
    %cst_39 = arith.constant 0.00999999977 : f32
    %99 = vector.broadcast %cst_39 : f32 to vector<8x64xf32>
    %100 = arith.mulf %99, %96 : vector<8x64xf32>
    %101 = arith.select %98, %96, %100 : vector<8x64xi1>, vector<8x64xf32>
    %c0_40 = arith.constant 0 : index
    %c0_41 = arith.constant 0 : index
    %102 = vector.load %arg4[%c0_40, %c0_41] : memref<64x64xbf16, #tpu.memory_space<vmem>>, vector<64x64xbf16>
    %103 = arith.truncf %101 : vector<8x64xf32> to vector<8x64xbf16>
    %cst_42 = arith.constant dense<0.000000e+00> : vector<8x64xf32>
    %104 = tpu.matmul %103, %102, %cst_42 {dimension_numbers = #tpu.dot_dimension_numbers<[1], [0], [0], [1], [0, 0, 1, 1], [], []>} : vector<8x64xbf16>, vector<64x64xbf16>, vector<8x64xf32> -> vector<8x64xf32>
    %c6 = arith.constant 6 : index
    %c0_43 = arith.constant 0 : index
    %105 = vector.load %arg19[%c6, %c0_43] : memref<32x256xf32, #tpu.memory_space<vmem>>, vector<1x64xf32>
    %c7 = arith.constant 7 : index
    %c0_44 = arith.constant 0 : index
    %106 = vector.load %arg19[%c7, %c0_44] : memref<32x256xf32, #tpu.memory_space<vmem>>, vector<1x64xf32>
    %cst_45 = arith.constant dense<0.000000e+00> : vector<64xf32>
    %107 = vector.multi_reduction <add>, %104, %cst_45 [0] : vector<8x64xf32> to vector<64xf32>
    %108 = vector.shape_cast %107 : vector<64xf32> to vector<1x64xf32>
    %cst_46 = arith.constant 8.000000e+00 : f32
    %109 = vector.broadcast %cst_46 : f32 to vector<1x64xf32>
    %110 = arith.divf %108, %109 : vector<1x64xf32>
    %111 = arith.mulf %104, %104 : vector<8x64xf32>
    %cst_47 = arith.constant dense<0.000000e+00> : vector<64xf32>
    %112 = vector.multi_reduction <add>, %111, %cst_47 [0] : vector<8x64xf32> to vector<64xf32>
    %113 = vector.shape_cast %112 : vector<64xf32> to vector<1x64xf32>
    %cst_48 = arith.constant 8.000000e+00 : f32
    %114 = vector.broadcast %cst_48 : f32 to vector<1x64xf32>
    %115 = arith.divf %113, %114 : vector<1x64xf32>
    %116 = arith.mulf %110, %110 : vector<1x64xf32>
    %117 = arith.subf %115, %116 : vector<1x64xf32>
    %cst_49 = arith.constant 0.000000e+00 : f32
    %118 = vector.broadcast %cst_49 : f32 to vector<1x64xf32>
    %119 = arith.maximumf %117, %118 : vector<1x64xf32>
    %120 = vector.broadcast %110 : vector<1x64xf32> to vector<8x64xf32>
    %121 = arith.subf %104, %120 : vector<8x64xf32>
    %cst_50 = arith.constant 9.99999974E-6 : f32
    %122 = vector.broadcast %cst_50 : f32 to vector<1x64xf32>
    %123 = arith.addf %119, %122 : vector<1x64xf32>
    %124 = math.rsqrt %123 : vector<1x64xf32>
    %125 = vector.broadcast %124 : vector<1x64xf32> to vector<8x64xf32>
    %126 = arith.mulf %121, %125 : vector<8x64xf32>
    %127 = vector.broadcast %105 : vector<1x64xf32> to vector<8x64xf32>
    %128 = arith.mulf %126, %127 : vector<8x64xf32>
    %129 = vector.broadcast %106 : vector<1x64xf32> to vector<8x64xf32>
    %130 = arith.addf %128, %129 : vector<8x64xf32>
    %cst_51 = arith.constant 0.000000e+00 : f32
    %131 = vector.broadcast %cst_51 : f32 to vector<8x64xf32>
    %132 = arith.cmpf ogt, %130, %131 : vector<8x64xf32>
    %cst_52 = arith.constant 0.00999999977 : f32
    %133 = vector.broadcast %cst_52 : f32 to vector<8x64xf32>
    %134 = arith.mulf %133, %130 : vector<8x64xf32>
    %135 = arith.select %132, %130, %134 : vector<8x64xi1>, vector<8x64xf32>
    %c0_53 = arith.constant 0 : index
    %c0_54 = arith.constant 0 : index
    %136 = vector.load %arg5[%c0_53, %c0_54] : memref<64x128xbf16, #tpu.memory_space<vmem>>, vector<64x128xbf16>
    %137 = arith.truncf %135 : vector<8x64xf32> to vector<8x64xbf16>
    %cst_55 = arith.constant dense<0.000000e+00> : vector<8x128xf32>
    %138 = tpu.matmul %137, %136, %cst_55 {dimension_numbers = #tpu.dot_dimension_numbers<[1], [0], [0], [1], [0, 0, 1, 1], [], []>} : vector<8x64xbf16>, vector<64x128xbf16>, vector<8x128xf32> -> vector<8x128xf32>
    %c8 = arith.constant 8 : index
    %c0_56 = arith.constant 0 : index
    %139 = vector.load %arg19[%c8, %c0_56] : memref<32x256xf32, #tpu.memory_space<vmem>>, vector<1x128xf32>
    %c9 = arith.constant 9 : index
    %c0_57 = arith.constant 0 : index
    %140 = vector.load %arg19[%c9, %c0_57] : memref<32x256xf32, #tpu.memory_space<vmem>>, vector<1x128xf32>
    %cst_58 = arith.constant dense<0.000000e+00> : vector<128xf32>
    %141 = vector.multi_reduction <add>, %138, %cst_58 [0] : vector<8x128xf32> to vector<128xf32>
    %142 = vector.shape_cast %141 : vector<128xf32> to vector<1x128xf32>
    %cst_59 = arith.constant 8.000000e+00 : f32
    %143 = vector.broadcast %cst_59 : f32 to vector<1x128xf32>
    %144 = arith.divf %142, %143 : vector<1x128xf32>
    %145 = arith.mulf %138, %138 : vector<8x128xf32>
    %cst_60 = arith.constant dense<0.000000e+00> : vector<128xf32>
    %146 = vector.multi_reduction <add>, %145, %cst_60 [0] : vector<8x128xf32> to vector<128xf32>
    %147 = vector.shape_cast %146 : vector<128xf32> to vector<1x128xf32>
    %cst_61 = arith.constant 8.000000e+00 : f32
    %148 = vector.broadcast %cst_61 : f32 to vector<1x128xf32>
    %149 = arith.divf %147, %148 : vector<1x128xf32>
    %150 = arith.mulf %144, %144 : vector<1x128xf32>
    %151 = arith.subf %149, %150 : vector<1x128xf32>
    %cst_62 = arith.constant 0.000000e+00 : f32
    %152 = vector.broadcast %cst_62 : f32 to vector<1x128xf32>
    %153 = arith.maximumf %151, %152 : vector<1x128xf32>
    %154 = vector.broadcast %144 : vector<1x128xf32> to vector<8x128xf32>
    %155 = arith.subf %138, %154 : vector<8x128xf32>
    %cst_63 = arith.constant 9.99999974E-6 : f32
    %156 = vector.broadcast %cst_63 : f32 to vector<1x128xf32>
    %157 = arith.addf %153, %156 : vector<1x128xf32>
    %158 = math.rsqrt %157 : vector<1x128xf32>
    %159 = vector.broadcast %158 : vector<1x128xf32> to vector<8x128xf32>
    %160 = arith.mulf %155, %159 : vector<8x128xf32>
    %161 = vector.broadcast %139 : vector<1x128xf32> to vector<8x128xf32>
    %162 = arith.mulf %160, %161 : vector<8x128xf32>
    %163 = vector.broadcast %140 : vector<1x128xf32> to vector<8x128xf32>
    %164 = arith.addf %162, %163 : vector<8x128xf32>
    %cst_64 = arith.constant 0.000000e+00 : f32
    %165 = vector.broadcast %cst_64 : f32 to vector<8x128xf32>
    %166 = arith.cmpf ogt, %164, %165 : vector<8x128xf32>
    %cst_65 = arith.constant 0.00999999977 : f32
    %167 = vector.broadcast %cst_65 : f32 to vector<8x128xf32>
    %168 = arith.mulf %167, %164 : vector<8x128xf32>
    %169 = arith.select %166, %164, %168 : vector<8x128xi1>, vector<8x128xf32>
    %c0_66 = arith.constant 0 : index
    %c0_67 = arith.constant 0 : index
    %170 = vector.load %arg6[%c0_66, %c0_67] : memref<128x128xbf16, #tpu.memory_space<vmem>>, vector<128x128xbf16>
    %c10 = arith.constant 10 : index
    %c0_68 = arith.constant 0 : index
    %171 = vector.load %arg19[%c10, %c0_68] : memref<32x256xf32, #tpu.memory_space<vmem>>, vector<1x128xf32>
    %172 = arith.truncf %169 : vector<8x128xf32> to vector<8x128xbf16>
    %cst_69 = arith.constant dense<0.000000e+00> : vector<8x128xf32>
    %173 = tpu.matmul %172, %170, %cst_69 {dimension_numbers = #tpu.dot_dimension_numbers<[1], [0], [0], [1], [0, 0, 1, 1], [], []>} : vector<8x128xbf16>, vector<128x128xbf16>, vector<8x128xf32> -> vector<8x128xf32>
    %174 = vector.broadcast %171 : vector<1x128xf32> to vector<8x128xf32>
    %175 = arith.addf %173, %174 : vector<8x128xf32>
    %c0_70 = arith.constant 0 : index
    %c0_71 = arith.constant 0 : index
    %176 = vector.load %arg7[%c0_70, %c0_71] : memref<128x256xbf16, #tpu.memory_space<vmem>>, vector<128x256xbf16>
    %177 = arith.truncf %175 : vector<8x128xf32> to vector<8x128xbf16>
    %cst_72 = arith.constant dense<0.000000e+00> : vector<8x256xf32>
    %178 = tpu.matmul %177, %176, %cst_72 {dimension_numbers = #tpu.dot_dimension_numbers<[1], [0], [0], [1], [0, 0, 1, 1], [], []>} : vector<8x128xbf16>, vector<128x256xbf16>, vector<8x256xf32> -> vector<8x256xf32>
    %c11 = arith.constant 11 : index
    %c0_73 = arith.constant 0 : index
    %179 = vector.load %arg19[%c11, %c0_73] : memref<32x256xf32, #tpu.memory_space<vmem>>, vector<1x256xf32>
    %c12 = arith.constant 12 : index
    %c0_74 = arith.constant 0 : index
    %180 = vector.load %arg19[%c12, %c0_74] : memref<32x256xf32, #tpu.memory_space<vmem>>, vector<1x256xf32>
    %cst_75 = arith.constant dense<0.000000e+00> : vector<256xf32>
    %181 = vector.multi_reduction <add>, %178, %cst_75 [0] : vector<8x256xf32> to vector<256xf32>
    %182 = vector.shape_cast %181 : vector<256xf32> to vector<1x256xf32>
    %cst_76 = arith.constant 8.000000e+00 : f32
    %183 = vector.broadcast %cst_76 : f32 to vector<1x256xf32>
    %184 = arith.divf %182, %183 : vector<1x256xf32>
    %185 = arith.mulf %178, %178 : vector<8x256xf32>
    %cst_77 = arith.constant dense<0.000000e+00> : vector<256xf32>
    %186 = vector.multi_reduction <add>, %185, %cst_77 [0] : vector<8x256xf32> to vector<256xf32>
    %187 = vector.shape_cast %186 : vector<256xf32> to vector<1x256xf32>
    %cst_78 = arith.constant 8.000000e+00 : f32
    %188 = vector.broadcast %cst_78 : f32 to vector<1x256xf32>
    %189 = arith.divf %187, %188 : vector<1x256xf32>
    %190 = arith.mulf %184, %184 : vector<1x256xf32>
    %191 = arith.subf %189, %190 : vector<1x256xf32>
    %cst_79 = arith.constant 0.000000e+00 : f32
    %192 = vector.broadcast %cst_79 : f32 to vector<1x256xf32>
    %193 = arith.maximumf %191, %192 : vector<1x256xf32>
    %194 = vector.broadcast %184 : vector<1x256xf32> to vector<8x256xf32>
    %195 = arith.subf %178, %194 : vector<8x256xf32>
    %cst_80 = arith.constant 9.99999974E-6 : f32
    %196 = vector.broadcast %cst_80 : f32 to vector<1x256xf32>
    %197 = arith.addf %193, %196 : vector<1x256xf32>
    %198 = math.rsqrt %197 : vector<1x256xf32>
    %199 = vector.broadcast %198 : vector<1x256xf32> to vector<8x256xf32>
    %200 = arith.mulf %195, %199 : vector<8x256xf32>
    %201 = vector.broadcast %179 : vector<1x256xf32> to vector<8x256xf32>
    %202 = arith.mulf %200, %201 : vector<8x256xf32>
    %203 = vector.broadcast %180 : vector<1x256xf32> to vector<8x256xf32>
    %204 = arith.addf %202, %203 : vector<8x256xf32>
    %cst_81 = arith.constant 0.000000e+00 : f32
    %205 = vector.broadcast %cst_81 : f32 to vector<8x256xf32>
    %206 = arith.cmpf ogt, %204, %205 : vector<8x256xf32>
    %cst_82 = arith.constant 0.00999999977 : f32
    %207 = vector.broadcast %cst_82 : f32 to vector<8x256xf32>
    %208 = arith.mulf %207, %204 : vector<8x256xf32>
    %209 = arith.select %206, %204, %208 : vector<8x256xi1>, vector<8x256xf32>
    %c0_83 = arith.constant 0 : index
    %c0_84 = arith.constant 0 : index
    %210 = vector.load %arg8[%c0_83, %c0_84] : memref<256x128xbf16, #tpu.memory_space<vmem>>, vector<256x128xbf16>
    %211 = arith.truncf %209 : vector<8x256xf32> to vector<8x256xbf16>
    %cst_85 = arith.constant dense<0.000000e+00> : vector<8x128xf32>
    %212 = tpu.matmul %211, %210, %cst_85 {dimension_numbers = #tpu.dot_dimension_numbers<[1], [0], [0], [1], [0, 0, 1, 1], [], []>} : vector<8x256xbf16>, vector<256x128xbf16>, vector<8x128xf32> -> vector<8x128xf32>
    %c13 = arith.constant 13 : index
    %c0_86 = arith.constant 0 : index
    %213 = vector.load %arg19[%c13, %c0_86] : memref<32x256xf32, #tpu.memory_space<vmem>>, vector<1x128xf32>
    %c14 = arith.constant 14 : index
    %c0_87 = arith.constant 0 : index
    %214 = vector.load %arg19[%c14, %c0_87] : memref<32x256xf32, #tpu.memory_space<vmem>>, vector<1x128xf32>
    %cst_88 = arith.constant dense<0.000000e+00> : vector<128xf32>
    %215 = vector.multi_reduction <add>, %212, %cst_88 [0] : vector<8x128xf32> to vector<128xf32>
    %216 = vector.shape_cast %215 : vector<128xf32> to vector<1x128xf32>
    %cst_89 = arith.constant 8.000000e+00 : f32
    %217 = vector.broadcast %cst_89 : f32 to vector<1x128xf32>
    %218 = arith.divf %216, %217 : vector<1x128xf32>
    %219 = arith.mulf %212, %212 : vector<8x128xf32>
    %cst_90 = arith.constant dense<0.000000e+00> : vector<128xf32>
    %220 = vector.multi_reduction <add>, %219, %cst_90 [0] : vector<8x128xf32> to vector<128xf32>
    %221 = vector.shape_cast %220 : vector<128xf32> to vector<1x128xf32>
    %cst_91 = arith.constant 8.000000e+00 : f32
    %222 = vector.broadcast %cst_91 : f32 to vector<1x128xf32>
    %223 = arith.divf %221, %222 : vector<1x128xf32>
    %224 = arith.mulf %218, %218 : vector<1x128xf32>
    %225 = arith.subf %223, %224 : vector<1x128xf32>
    %cst_92 = arith.constant 0.000000e+00 : f32
    %226 = vector.broadcast %cst_92 : f32 to vector<1x128xf32>
    %227 = arith.maximumf %225, %226 : vector<1x128xf32>
    %228 = vector.broadcast %218 : vector<1x128xf32> to vector<8x128xf32>
    %229 = arith.subf %212, %228 : vector<8x128xf32>
    %cst_93 = arith.constant 9.99999974E-6 : f32
    %230 = vector.broadcast %cst_93 : f32 to vector<1x128xf32>
    %231 = arith.addf %227, %230 : vector<1x128xf32>
    %232 = math.rsqrt %231 : vector<1x128xf32>
    %233 = vector.broadcast %232 : vector<1x128xf32> to vector<8x128xf32>
    %234 = arith.mulf %229, %233 : vector<8x128xf32>
    %235 = vector.broadcast %213 : vector<1x128xf32> to vector<8x128xf32>
    %236 = arith.mulf %234, %235 : vector<8x128xf32>
    %237 = vector.broadcast %214 : vector<1x128xf32> to vector<8x128xf32>
    %238 = arith.addf %236, %237 : vector<8x128xf32>
    %cst_94 = arith.constant 0.000000e+00 : f32
    %239 = vector.broadcast %cst_94 : f32 to vector<8x128xf32>
    %240 = arith.cmpf ogt, %238, %239 : vector<8x128xf32>
    %cst_95 = arith.constant 0.00999999977 : f32
    %241 = vector.broadcast %cst_95 : f32 to vector<8x128xf32>
    %242 = arith.mulf %241, %238 : vector<8x128xf32>
    %243 = arith.select %240, %238, %242 : vector<8x128xi1>, vector<8x128xf32>
    %c0_96 = arith.constant 0 : index
    %c0_97 = arith.constant 0 : index
    %244 = vector.load %arg9[%c0_96, %c0_97] : memref<128x256xbf16, #tpu.memory_space<vmem>>, vector<128x256xbf16>
    %245 = arith.truncf %243 : vector<8x128xf32> to vector<8x128xbf16>
    %cst_98 = arith.constant dense<0.000000e+00> : vector<8x256xf32>
    %246 = tpu.matmul %245, %244, %cst_98 {dimension_numbers = #tpu.dot_dimension_numbers<[1], [0], [0], [1], [0, 0, 1, 1], [], []>} : vector<8x128xbf16>, vector<128x256xbf16>, vector<8x256xf32> -> vector<8x256xf32>
    %c15 = arith.constant 15 : index
    %c0_99 = arith.constant 0 : index
    %247 = vector.load %arg19[%c15, %c0_99] : memref<32x256xf32, #tpu.memory_space<vmem>>, vector<1x256xf32>
    %c16 = arith.constant 16 : index
    %c0_100 = arith.constant 0 : index
    %248 = vector.load %arg19[%c16, %c0_100] : memref<32x256xf32, #tpu.memory_space<vmem>>, vector<1x256xf32>
    %cst_101 = arith.constant dense<0.000000e+00> : vector<256xf32>
    %249 = vector.multi_reduction <add>, %246, %cst_101 [0] : vector<8x256xf32> to vector<256xf32>
    %250 = vector.shape_cast %249 : vector<256xf32> to vector<1x256xf32>
    %cst_102 = arith.constant 8.000000e+00 : f32
    %251 = vector.broadcast %cst_102 : f32 to vector<1x256xf32>
    %252 = arith.divf %250, %251 : vector<1x256xf32>
    %253 = arith.mulf %246, %246 : vector<8x256xf32>
    %cst_103 = arith.constant dense<0.000000e+00> : vector<256xf32>
    %254 = vector.multi_reduction <add>, %253, %cst_103 [0] : vector<8x256xf32> to vector<256xf32>
    %255 = vector.shape_cast %254 : vector<256xf32> to vector<1x256xf32>
    %cst_104 = arith.constant 8.000000e+00 : f32
    %256 = vector.broadcast %cst_104 : f32 to vector<1x256xf32>
    %257 = arith.divf %255, %256 : vector<1x256xf32>
    %258 = arith.mulf %252, %252 : vector<1x256xf32>
    %259 = arith.subf %257, %258 : vector<1x256xf32>
    %cst_105 = arith.constant 0.000000e+00 : f32
    %260 = vector.broadcast %cst_105 : f32 to vector<1x256xf32>
    %261 = arith.maximumf %259, %260 : vector<1x256xf32>
    %262 = vector.broadcast %252 : vector<1x256xf32> to vector<8x256xf32>
    %263 = arith.subf %246, %262 : vector<8x256xf32>
    %cst_106 = arith.constant 9.99999974E-6 : f32
    %264 = vector.broadcast %cst_106 : f32 to vector<1x256xf32>
    %265 = arith.addf %261, %264 : vector<1x256xf32>
    %266 = math.rsqrt %265 : vector<1x256xf32>
    %267 = vector.broadcast %266 : vector<1x256xf32> to vector<8x256xf32>
    %268 = arith.mulf %263, %267 : vector<8x256xf32>
    %269 = vector.broadcast %247 : vector<1x256xf32> to vector<8x256xf32>
    %270 = arith.mulf %268, %269 : vector<8x256xf32>
    %271 = vector.broadcast %248 : vector<1x256xf32> to vector<8x256xf32>
    %272 = arith.addf %270, %271 : vector<8x256xf32>
    %cst_107 = arith.constant 0.000000e+00 : f32
    %273 = vector.broadcast %cst_107 : f32 to vector<8x256xf32>
    %274 = arith.cmpf ogt, %272, %273 : vector<8x256xf32>
    %cst_108 = arith.constant 0.00999999977 : f32
    %275 = vector.broadcast %cst_108 : f32 to vector<8x256xf32>
    %276 = arith.mulf %275, %272 : vector<8x256xf32>
    %277 = arith.select %274, %272, %276 : vector<8x256xi1>, vector<8x256xf32>
    %c0_109 = arith.constant 0 : index
    %c0_110 = arith.constant 0 : index
    %278 = vector.load %arg10[%c0_109, %c0_110] : memref<256x128xbf16, #tpu.memory_space<vmem>>, vector<256x128xbf16>
    %c17 = arith.constant 17 : index
    %c0_111 = arith.constant 0 : index
    %279 = vector.load %arg19[%c17, %c0_111] : memref<32x256xf32, #tpu.memory_space<vmem>>, vector<1x128xf32>
    %280 = arith.truncf %277 : vector<8x256xf32> to vector<8x256xbf16>
    %cst_112 = arith.constant dense<0.000000e+00> : vector<8x128xf32>
    %281 = tpu.matmul %280, %278, %cst_112 {dimension_numbers = #tpu.dot_dimension_numbers<[1], [0], [0], [1], [0, 0, 1, 1], [], []>} : vector<8x256xbf16>, vector<256x128xbf16>, vector<8x128xf32> -> vector<8x128xf32>
    %282 = vector.broadcast %279 : vector<1x128xf32> to vector<8x128xf32>
    %283 = arith.addf %281, %282 : vector<8x128xf32>
    %c0_113 = arith.constant 0 : index
    %c0_114 = arith.constant 0 : index
    %284 = vector.load %arg20[%c0_113, %c0_114] : memref<8x256xf32, #tpu.memory_space<vmem>>, vector<8x128xf32>
    tpu.vector_store %arg20[%c0_113, %c0_114], %283 {strides = array<i32>} : memref<8x256xf32, #tpu.memory_space<vmem>>, vector<8x128xf32>,
    %c0_115 = arith.constant 0 : index
    %c0_116 = arith.constant 0 : index
    %285 = vector.load %arg11[%c0_115, %c0_116] : memref<128x128xbf16, #tpu.memory_space<vmem>>, vector<128x128xbf16>
    %286 = arith.truncf %175 : vector<8x128xf32> to vector<8x128xbf16>
    %cst_117 = arith.constant dense<0.000000e+00> : vector<8x128xf32>
    %287 = tpu.matmul %286, %285, %cst_117 {dimension_numbers = #tpu.dot_dimension_numbers<[1], [0], [0], [1], [0, 0, 1, 1], [], []>} : vector<8x128xbf16>, vector<128x128xbf16>, vector<8x128xf32> -> vector<8x128xf32>
    %c18 = arith.constant 18 : index
    %c0_118 = arith.constant 0 : index
    %288 = vector.load %arg19[%c18, %c0_118] : memref<32x256xf32, #tpu.memory_space<vmem>>, vector<1x128xf32>
    %c19 = arith.constant 19 : index
    %c0_119 = arith.constant 0 : index
    %289 = vector.load %arg19[%c19, %c0_119] : memref<32x256xf32, #tpu.memory_space<vmem>>, vector<1x128xf32>
    %cst_120 = arith.constant dense<0.000000e+00> : vector<128xf32>
    %290 = vector.multi_reduction <add>, %287, %cst_120 [0] : vector<8x128xf32> to vector<128xf32>
    %291 = vector.shape_cast %290 : vector<128xf32> to vector<1x128xf32>
    %cst_121 = arith.constant 8.000000e+00 : f32
    %292 = vector.broadcast %cst_121 : f32 to vector<1x128xf32>
    %293 = arith.divf %291, %292 : vector<1x128xf32>
    %294 = arith.mulf %287, %287 : vector<8x128xf32>
    %cst_122 = arith.constant dense<0.000000e+00> : vector<128xf32>
    %295 = vector.multi_reduction <add>, %294, %cst_122 [0] : vector<8x128xf32> to vector<128xf32>
    %296 = vector.shape_cast %295 : vector<128xf32> to vector<1x128xf32>
    %cst_123 = arith.constant 8.000000e+00 : f32
    %297 = vector.broadcast %cst_123 : f32 to vector<1x128xf32>
    %298 = arith.divf %296, %297 : vector<1x128xf32>
    %299 = arith.mulf %293, %293 : vector<1x128xf32>
    %300 = arith.subf %298, %299 : vector<1x128xf32>
    %cst_124 = arith.constant 0.000000e+00 : f32
    %301 = vector.broadcast %cst_124 : f32 to vector<1x128xf32>
    %302 = arith.maximumf %300, %301 : vector<1x128xf32>
    %303 = vector.broadcast %293 : vector<1x128xf32> to vector<8x128xf32>
    %304 = arith.subf %287, %303 : vector<8x128xf32>
    %cst_125 = arith.constant 9.99999974E-6 : f32
    %305 = vector.broadcast %cst_125 : f32 to vector<1x128xf32>
    %306 = arith.addf %302, %305 : vector<1x128xf32>
    %307 = math.rsqrt %306 : vector<1x128xf32>
    %308 = vector.broadcast %307 : vector<1x128xf32> to vector<8x128xf32>
    %309 = arith.mulf %304, %308 : vector<8x128xf32>
    %310 = vector.broadcast %288 : vector<1x128xf32> to vector<8x128xf32>
    %311 = arith.mulf %309, %310 : vector<8x128xf32>
    %312 = vector.broadcast %289 : vector<1x128xf32> to vector<8x128xf32>
    %313 = arith.addf %311, %312 : vector<8x128xf32>
    %cst_126 = arith.constant 0.000000e+00 : f32
    %314 = vector.broadcast %cst_126 : f32 to vector<8x128xf32>
    %315 = arith.cmpf ogt, %313, %314 : vector<8x128xf32>
    %cst_127 = arith.constant 0.00999999977 : f32
    %316 = vector.broadcast %cst_127 : f32 to vector<8x128xf32>
    %317 = arith.mulf %316, %313 : vector<8x128xf32>
    %318 = arith.select %315, %313, %317 : vector<8x128xi1>, vector<8x128xf32>
    %c0_128 = arith.constant 0 : index
    %c0_129 = arith.constant 0 : index
    %319 = vector.load %arg12[%c0_128, %c0_129] : memref<128x32xbf16, #tpu.memory_space<vmem>>, vector<128x32xbf16>
    %320 = arith.truncf %318 : vector<8x128xf32> to vector<8x128xbf16>
    %cst_130 = arith.constant dense<0.000000e+00> : vector<8x32xf32>
    %321 = tpu.matmul %320, %319, %cst_130 {dimension_numbers = #tpu.dot_dimension_numbers<[1], [0], [0], [1], [0, 0, 1, 1], [], []>} : vector<8x128xbf16>, vector<128x32xbf16>, vector<8x32xf32> -> vector<8x32xf32>
    %c20 = arith.constant 20 : index
    %c0_131 = arith.constant 0 : index
    %322 = vector.load %arg19[%c20, %c0_131] : memref<32x256xf32, #tpu.memory_space<vmem>>, vector<1x32xf32>
    %c21 = arith.constant 21 : index
    %c0_132 = arith.constant 0 : index
    %323 = vector.load %arg19[%c21, %c0_132] : memref<32x256xf32, #tpu.memory_space<vmem>>, vector<1x32xf32>
    %cst_133 = arith.constant dense<0.000000e+00> : vector<32xf32>
    %324 = vector.multi_reduction <add>, %321, %cst_133 [0] : vector<8x32xf32> to vector<32xf32>
    %325 = vector.shape_cast %324 : vector<32xf32> to vector<1x32xf32>
    %cst_134 = arith.constant 8.000000e+00 : f32
    %326 = vector.broadcast %cst_134 : f32 to vector<1x32xf32>
    %327 = arith.divf %325, %326 : vector<1x32xf32>
    %328 = arith.mulf %321, %321 : vector<8x32xf32>
    %cst_135 = arith.constant dense<0.000000e+00> : vector<32xf32>
    %329 = vector.multi_reduction <add>, %328, %cst_135 [0] : vector<8x32xf32> to vector<32xf32>
    %330 = vector.shape_cast %329 : vector<32xf32> to vector<1x32xf32>
    %cst_136 = arith.constant 8.000000e+00 : f32
    %331 = vector.broadcast %cst_136 : f32 to vector<1x32xf32>
    %332 = arith.divf %330, %331 : vector<1x32xf32>
    %333 = arith.mulf %327, %327 : vector<1x32xf32>
    %334 = arith.subf %332, %333 : vector<1x32xf32>
    %cst_137 = arith.constant 0.000000e+00 : f32
    %335 = vector.broadcast %cst_137 : f32 to vector<1x32xf32>
    %336 = arith.maximumf %334, %335 : vector<1x32xf32>
    %337 = vector.broadcast %327 : vector<1x32xf32> to vector<8x32xf32>
    %338 = arith.subf %321, %337 : vector<8x32xf32>
    %cst_138 = arith.constant 9.99999974E-6 : f32
    %339 = vector.broadcast %cst_138 : f32 to vector<1x32xf32>
    %340 = arith.addf %336, %339 : vector<1x32xf32>
    %341 = math.rsqrt %340 : vector<1x32xf32>
    %342 = vector.broadcast %341 : vector<1x32xf32> to vector<8x32xf32>
    %343 = arith.mulf %338, %342 : vector<8x32xf32>
    %344 = vector.broadcast %322 : vector<1x32xf32> to vector<8x32xf32>
    %345 = arith.mulf %343, %344 : vector<8x32xf32>
    %346 = vector.broadcast %323 : vector<1x32xf32> to vector<8x32xf32>
    %347 = arith.addf %345, %346 : vector<8x32xf32>
    %cst_139 = arith.constant 0.000000e+00 : f32
    %348 = vector.broadcast %cst_139 : f32 to vector<8x32xf32>
    %349 = arith.cmpf ogt, %347, %348 : vector<8x32xf32>
    %cst_140 = arith.constant 0.00999999977 : f32
    %350 = vector.broadcast %cst_140 : f32 to vector<8x32xf32>
    %351 = arith.mulf %350, %347 : vector<8x32xf32>
    %352 = arith.select %349, %347, %351 : vector<8x32xi1>, vector<8x32xf32>
    %c0_141 = arith.constant 0 : index
    %c0_142 = arith.constant 0 : index
    %353 = vector.load %arg13[%c0_141, %c0_142] : memref<32x32xbf16, #tpu.memory_space<vmem>>, vector<32x32xbf16>
    %354 = arith.truncf %352 : vector<8x32xf32> to vector<8x32xbf16>
    %cst_143 = arith.constant dense<0.000000e+00> : vector<8x32xf32>
    %355 = tpu.matmul %354, %353, %cst_143 {dimension_numbers = #tpu.dot_dimension_numbers<[1], [0], [0], [1], [0, 0, 1, 1], [], []>} : vector<8x32xbf16>, vector<32x32xbf16>, vector<8x32xf32> -> vector<8x32xf32>
    %c22 = arith.constant 22 : index
    %c0_144 = arith.constant 0 : index
    %356 = vector.load %arg19[%c22, %c0_144] : memref<32x256xf32, #tpu.memory_space<vmem>>, vector<1x32xf32>
    %c23 = arith.constant 23 : index
    %c0_145 = arith.constant 0 : index
    %357 = vector.load %arg19[%c23, %c0_145] : memref<32x256xf32, #tpu.memory_space<vmem>>, vector<1x32xf32>
    %cst_146 = arith.constant dense<0.000000e+00> : vector<32xf32>
    %358 = vector.multi_reduction <add>, %355, %cst_146 [0] : vector<8x32xf32> to vector<32xf32>
    %359 = vector.shape_cast %358 : vector<32xf32> to vector<1x32xf32>
    %cst_147 = arith.constant 8.000000e+00 : f32
    %360 = vector.broadcast %cst_147 : f32 to vector<1x32xf32>
    %361 = arith.divf %359, %360 : vector<1x32xf32>
    %362 = arith.mulf %355, %355 : vector<8x32xf32>
    %cst_148 = arith.constant dense<0.000000e+00> : vector<32xf32>
    %363 = vector.multi_reduction <add>, %362, %cst_148 [0] : vector<8x32xf32> to vector<32xf32>
    %364 = vector.shape_cast %363 : vector<32xf32> to vector<1x32xf32>
    %cst_149 = arith.constant 8.000000e+00 : f32
    %365 = vector.broadcast %cst_149 : f32 to vector<1x32xf32>
    %366 = arith.divf %364, %365 : vector<1x32xf32>
    %367 = arith.mulf %361, %361 : vector<1x32xf32>
    %368 = arith.subf %366, %367 : vector<1x32xf32>
    %cst_150 = arith.constant 0.000000e+00 : f32
    %369 = vector.broadcast %cst_150 : f32 to vector<1x32xf32>
    %370 = arith.maximumf %368, %369 : vector<1x32xf32>
    %371 = vector.broadcast %361 : vector<1x32xf32> to vector<8x32xf32>
    %372 = arith.subf %355, %371 : vector<8x32xf32>
    %cst_151 = arith.constant 9.99999974E-6 : f32
    %373 = vector.broadcast %cst_151 : f32 to vector<1x32xf32>
    %374 = arith.addf %370, %373 : vector<1x32xf32>
    %375 = math.rsqrt %374 : vector<1x32xf32>
    %376 = vector.broadcast %375 : vector<1x32xf32> to vector<8x32xf32>
    %377 = arith.mulf %372, %376 : vector<8x32xf32>
    %378 = vector.broadcast %356 : vector<1x32xf32> to vector<8x32xf32>
    %379 = arith.mulf %377, %378 : vector<8x32xf32>
    %380 = vector.broadcast %357 : vector<1x32xf32> to vector<8x32xf32>
    %381 = arith.addf %379, %380 : vector<8x32xf32>
    %cst_152 = arith.constant 0.000000e+00 : f32
    %382 = vector.broadcast %cst_152 : f32 to vector<8x32xf32>
    %383 = arith.cmpf ogt, %381, %382 : vector<8x32xf32>
    %cst_153 = arith.constant 0.00999999977 : f32
    %384 = vector.broadcast %cst_153 : f32 to vector<8x32xf32>
    %385 = arith.mulf %384, %381 : vector<8x32xf32>
    %386 = arith.select %383, %381, %385 : vector<8x32xi1>, vector<8x32xf32>
    %c0_154 = arith.constant 0 : index
    %c0_155 = arith.constant 0 : index
    %387 = vector.load %arg14[%c0_154, %c0_155] : memref<32x128xbf16, #tpu.memory_space<vmem>>, vector<32x128xbf16>
    %c24 = arith.constant 24 : index
    %c0_156 = arith.constant 0 : index
    %388 = vector.load %arg19[%c24, %c0_156] : memref<32x256xf32, #tpu.memory_space<vmem>>, vector<1x128xf32>
    %389 = arith.truncf %386 : vector<8x32xf32> to vector<8x32xbf16>
    %cst_157 = arith.constant dense<0.000000e+00> : vector<8x128xf32>
    %390 = tpu.matmul %389, %387, %cst_157 {dimension_numbers = #tpu.dot_dimension_numbers<[1], [0], [0], [1], [0, 0, 1, 1], [], []>} : vector<8x32xbf16>, vector<32x128xbf16>, vector<8x128xf32> -> vector<8x128xf32>
    %391 = vector.broadcast %388 : vector<1x128xf32> to vector<8x128xf32>
    %392 = arith.addf %390, %391 : vector<8x128xf32>
    %c0_158 = arith.constant 0 : index
    %c0_159 = arith.constant 0 : index
    %393 = vector.load %arg15[%c0_158, %c0_159] : memref<128x256xbf16, #tpu.memory_space<vmem>>, vector<128x256xbf16>
    %394 = arith.truncf %392 : vector<8x128xf32> to vector<8x128xbf16>
    %cst_160 = arith.constant dense<0.000000e+00> : vector<8x256xf32>
    %395 = tpu.matmul %394, %393, %cst_160 {dimension_numbers = #tpu.dot_dimension_numbers<[1], [0], [0], [1], [0, 0, 1, 1], [], []>} : vector<8x128xbf16>, vector<128x256xbf16>, vector<8x256xf32> -> vector<8x256xf32>
    %c25 = arith.constant 25 : index
    %c0_161 = arith.constant 0 : index
    %396 = vector.load %arg19[%c25, %c0_161] : memref<32x256xf32, #tpu.memory_space<vmem>>, vector<1x256xf32>
    %c26 = arith.constant 26 : index
    %c0_162 = arith.constant 0 : index
    %397 = vector.load %arg19[%c26, %c0_162] : memref<32x256xf32, #tpu.memory_space<vmem>>, vector<1x256xf32>
    %cst_163 = arith.constant dense<0.000000e+00> : vector<256xf32>
    %398 = vector.multi_reduction <add>, %395, %cst_163 [0] : vector<8x256xf32> to vector<256xf32>
    %399 = vector.shape_cast %398 : vector<256xf32> to vector<1x256xf32>
    %cst_164 = arith.constant 8.000000e+00 : f32
    %400 = vector.broadcast %cst_164 : f32 to vector<1x256xf32>
    %401 = arith.divf %399, %400 : vector<1x256xf32>
    %402 = arith.mulf %395, %395 : vector<8x256xf32>
    %cst_165 = arith.constant dense<0.000000e+00> : vector<256xf32>
    %403 = vector.multi_reduction <add>, %402, %cst_165 [0] : vector<8x256xf32> to vector<256xf32>
    %404 = vector.shape_cast %403 : vector<256xf32> to vector<1x256xf32>
    %cst_166 = arith.constant 8.000000e+00 : f32
    %405 = vector.broadcast %cst_166 : f32 to vector<1x256xf32>
    %406 = arith.divf %404, %405 : vector<1x256xf32>
    %407 = arith.mulf %401, %401 : vector<1x256xf32>
    %408 = arith.subf %406, %407 : vector<1x256xf32>
    %cst_167 = arith.constant 0.000000e+00 : f32
    %409 = vector.broadcast %cst_167 : f32 to vector<1x256xf32>
    %410 = arith.maximumf %408, %409 : vector<1x256xf32>
    %411 = vector.broadcast %401 : vector<1x256xf32> to vector<8x256xf32>
    %412 = arith.subf %395, %411 : vector<8x256xf32>
    %cst_168 = arith.constant 9.99999974E-6 : f32
    %413 = vector.broadcast %cst_168 : f32 to vector<1x256xf32>
    %414 = arith.addf %410, %413 : vector<1x256xf32>
    %415 = math.rsqrt %414 : vector<1x256xf32>
    %416 = vector.broadcast %415 : vector<1x256xf32> to vector<8x256xf32>
    %417 = arith.mulf %412, %416 : vector<8x256xf32>
    %418 = vector.broadcast %396 : vector<1x256xf32> to vector<8x256xf32>
    %419 = arith.mulf %417, %418 : vector<8x256xf32>
    %420 = vector.broadcast %397 : vector<1x256xf32> to vector<8x256xf32>
    %421 = arith.addf %419, %420 : vector<8x256xf32>
    %cst_169 = arith.constant 0.000000e+00 : f32
    %422 = vector.broadcast %cst_169 : f32 to vector<8x256xf32>
    %423 = arith.cmpf ogt, %421, %422 : vector<8x256xf32>
    %cst_170 = arith.constant 0.00999999977 : f32
    %424 = vector.broadcast %cst_170 : f32 to vector<8x256xf32>
    %425 = arith.mulf %424, %421 : vector<8x256xf32>
    %426 = arith.select %423, %421, %425 : vector<8x256xi1>, vector<8x256xf32>
    %c0_171 = arith.constant 0 : index
    %c0_172 = arith.constant 0 : index
    %427 = vector.load %arg16[%c0_171, %c0_172] : memref<256x128xbf16, #tpu.memory_space<vmem>>, vector<256x128xbf16>
    %428 = arith.truncf %426 : vector<8x256xf32> to vector<8x256xbf16>
    %cst_173 = arith.constant dense<0.000000e+00> : vector<8x128xf32>
    %429 = tpu.matmul %428, %427, %cst_173 {dimension_numbers = #tpu.dot_dimension_numbers<[1], [0], [0], [1], [0, 0, 1, 1], [], []>} : vector<8x256xbf16>, vector<256x128xbf16>, vector<8x128xf32> -> vector<8x128xf32>
    %c27 = arith.constant 27 : index
    %c0_174 = arith.constant 0 : index
    %430 = vector.load %arg19[%c27, %c0_174] : memref<32x256xf32, #tpu.memory_space<vmem>>, vector<1x128xf32>
    %c28 = arith.constant 28 : index
    %c0_175 = arith.constant 0 : index
    %431 = vector.load %arg19[%c28, %c0_175] : memref<32x256xf32, #tpu.memory_space<vmem>>, vector<1x128xf32>
    %cst_176 = arith.constant dense<0.000000e+00> : vector<128xf32>
    %432 = vector.multi_reduction <add>, %429, %cst_176 [0] : vector<8x128xf32> to vector<128xf32>
    %433 = vector.shape_cast %432 : vector<128xf32> to vector<1x128xf32>
    %cst_177 = arith.constant 8.000000e+00 : f32
    %434 = vector.broadcast %cst_177 : f32 to vector<1x128xf32>
    %435 = arith.divf %433, %434 : vector<1x128xf32>
    %436 = arith.mulf %429, %429 : vector<8x128xf32>
    %cst_178 = arith.constant dense<0.000000e+00> : vector<128xf32>
    %437 = vector.multi_reduction <add>, %436, %cst_178 [0] : vector<8x128xf32> to vector<128xf32>
    %438 = vector.shape_cast %437 : vector<128xf32> to vector<1x128xf32>
    %cst_179 = arith.constant 8.000000e+00 : f32
    %439 = vector.broadcast %cst_179 : f32 to vector<1x128xf32>
    %440 = arith.divf %438, %439 : vector<1x128xf32>
    %441 = arith.mulf %435, %435 : vector<1x128xf32>
    %442 = arith.subf %440, %441 : vector<1x128xf32>
    %cst_180 = arith.constant 0.000000e+00 : f32
    %443 = vector.broadcast %cst_180 : f32 to vector<1x128xf32>
    %444 = arith.maximumf %442, %443 : vector<1x128xf32>
    %445 = vector.broadcast %435 : vector<1x128xf32> to vector<8x128xf32>
    %446 = arith.subf %429, %445 : vector<8x128xf32>
    %cst_181 = arith.constant 9.99999974E-6 : f32
    %447 = vector.broadcast %cst_181 : f32 to vector<1x128xf32>
    %448 = arith.addf %444, %447 : vector<1x128xf32>
    %449 = math.rsqrt %448 : vector<1x128xf32>
    %450 = vector.broadcast %449 : vector<1x128xf32> to vector<8x128xf32>
    %451 = arith.mulf %446, %450 : vector<8x128xf32>
    %452 = vector.broadcast %430 : vector<1x128xf32> to vector<8x128xf32>
    %453 = arith.mulf %451, %452 : vector<8x128xf32>
    %454 = vector.broadcast %431 : vector<1x128xf32> to vector<8x128xf32>
    %455 = arith.addf %453, %454 : vector<8x128xf32>
    %cst_182 = arith.constant 0.000000e+00 : f32
    %456 = vector.broadcast %cst_182 : f32 to vector<8x128xf32>
    %457 = arith.cmpf ogt, %455, %456 : vector<8x128xf32>
    %cst_183 = arith.constant 0.00999999977 : f32
    %458 = vector.broadcast %cst_183 : f32 to vector<8x128xf32>
    %459 = arith.mulf %458, %455 : vector<8x128xf32>
    %460 = arith.select %457, %455, %459 : vector<8x128xi1>, vector<8x128xf32>
    %c0_184 = arith.constant 0 : index
    %c0_185 = arith.constant 0 : index
    %461 = vector.load %arg17[%c0_184, %c0_185] : memref<128x256xbf16, #tpu.memory_space<vmem>>, vector<128x256xbf16>
    %462 = arith.truncf %460 : vector<8x128xf32> to vector<8x128xbf16>
    %cst_186 = arith.constant dense<0.000000e+00> : vector<8x256xf32>
    %463 = tpu.matmul %462, %461, %cst_186 {dimension_numbers = #tpu.dot_dimension_numbers<[1], [0], [0], [1], [0, 0, 1, 1], [], []>} : vector<8x128xbf16>, vector<128x256xbf16>, vector<8x256xf32> -> vector<8x256xf32>
    %c29 = arith.constant 29 : index
    %c0_187 = arith.constant 0 : index
    %464 = vector.load %arg19[%c29, %c0_187] : memref<32x256xf32, #tpu.memory_space<vmem>>, vector<1x256xf32>
    %c30 = arith.constant 30 : index
    %c0_188 = arith.constant 0 : index
    %465 = vector.load %arg19[%c30, %c0_188] : memref<32x256xf32, #tpu.memory_space<vmem>>, vector<1x256xf32>
    %cst_189 = arith.constant dense<0.000000e+00> : vector<256xf32>
    %466 = vector.multi_reduction <add>, %463, %cst_189 [0] : vector<8x256xf32> to vector<256xf32>
    %467 = vector.shape_cast %466 : vector<256xf32> to vector<1x256xf32>
    %cst_190 = arith.constant 8.000000e+00 : f32
    %468 = vector.broadcast %cst_190 : f32 to vector<1x256xf32>
    %469 = arith.divf %467, %468 : vector<1x256xf32>
    %470 = arith.mulf %463, %463 : vector<8x256xf32>
    %cst_191 = arith.constant dense<0.000000e+00> : vector<256xf32>
    %471 = vector.multi_reduction <add>, %470, %cst_191 [0] : vector<8x256xf32> to vector<256xf32>
    %472 = vector.shape_cast %471 : vector<256xf32> to vector<1x256xf32>
    %cst_192 = arith.constant 8.000000e+00 : f32
    %473 = vector.broadcast %cst_192 : f32 to vector<1x256xf32>
    %474 = arith.divf %472, %473 : vector<1x256xf32>
    %475 = arith.mulf %469, %469 : vector<1x256xf32>
    %476 = arith.subf %474, %475 : vector<1x256xf32>
    %cst_193 = arith.constant 0.000000e+00 : f32
    %477 = vector.broadcast %cst_193 : f32 to vector<1x256xf32>
    %478 = arith.maximumf %476, %477 : vector<1x256xf32>
    %479 = vector.broadcast %469 : vector<1x256xf32> to vector<8x256xf32>
    %480 = arith.subf %463, %479 : vector<8x256xf32>
    %cst_194 = arith.constant 9.99999974E-6 : f32
    %481 = vector.broadcast %cst_194 : f32 to vector<1x256xf32>
    %482 = arith.addf %478, %481 : vector<1x256xf32>
    %483 = math.rsqrt %482 : vector<1x256xf32>
    %484 = vector.broadcast %483 : vector<1x256xf32> to vector<8x256xf32>
    %485 = arith.mulf %480, %484 : vector<8x256xf32>
    %486 = vector.broadcast %464 : vector<1x256xf32> to vector<8x256xf32>
    %487 = arith.mulf %485, %486 : vector<8x256xf32>
    %488 = vector.broadcast %465 : vector<1x256xf32> to vector<8x256xf32>
    %489 = arith.addf %487, %488 : vector<8x256xf32>
    %cst_195 = arith.constant 0.000000e+00 : f32
    %490 = vector.broadcast %cst_195 : f32 to vector<8x256xf32>
    %491 = arith.cmpf ogt, %489, %490 : vector<8x256xf32>
    %cst_196 = arith.constant 0.00999999977 : f32
    %492 = vector.broadcast %cst_196 : f32 to vector<8x256xf32>
    %493 = arith.mulf %492, %489 : vector<8x256xf32>
    %494 = arith.select %491, %489, %493 : vector<8x256xi1>, vector<8x256xf32>
    %c0_197 = arith.constant 0 : index
    %c0_198 = arith.constant 0 : index
    %495 = vector.load %arg18[%c0_197, %c0_198] : memref<256x128xbf16, #tpu.memory_space<vmem>>, vector<256x128xbf16>
    %c31 = arith.constant 31 : index
    %c0_199 = arith.constant 0 : index
    %496 = vector.load %arg19[%c31, %c0_199] : memref<32x256xf32, #tpu.memory_space<vmem>>, vector<1x128xf32>
    %497 = arith.truncf %494 : vector<8x256xf32> to vector<8x256xbf16>
    %cst_200 = arith.constant dense<0.000000e+00> : vector<8x128xf32>
    %498 = tpu.matmul %497, %495, %cst_200 {dimension_numbers = #tpu.dot_dimension_numbers<[1], [0], [0], [1], [0, 0, 1, 1], [], []>} : vector<8x256xbf16>, vector<256x128xbf16>, vector<8x128xf32> -> vector<8x128xf32>
    %499 = vector.broadcast %496 : vector<1x128xf32> to vector<8x128xf32>
    %500 = arith.addf %498, %499 : vector<8x128xf32>
    %c0_201 = arith.constant 0 : index
    %c128 = arith.constant 128 : index
    %501 = vector.load %arg20[%c0_201, %c128] : memref<8x256xf32, #tpu.memory_space<vmem>>, vector<8x128xf32>
    tpu.vector_store %arg20[%c0_201, %c128], %500 {strides = array<i32>} : memref<8x256xf32, #tpu.memory_space<vmem>>, vector<8x128xf32>,
    return
  }
}

</mosaic_0001>

<bundles_post_ra>
// kernel: tpu_custom_call.1
= control target key start
LH: loop header
LB: loop body
LE: loop exit
PB: predicated region body
PF: predicated region fallthrough
CT: control target
= control target key end

     0   :  { %s4447_s0 = inlined_call_operand.hbm [shape: f32[8,5], index: 0, kind: input, shape index: {}]   ;;  %s4448_s1 = inlined_call_operand.hbm [shape: f32[5,32], index: 1, kind: input, shape index: {}]   ;;  %s4449_s2 = inlined_call_operand.vmem [shape: bf16[32,32], index: 2, kind: input, shape index: {}]   ;;  %s4450_s3 = inlined_call_operand.hbm [shape: bf16[32,64], index: 3, kind: input, shape index: {}]   ;;  %s4451_s4 = inlined_call_operand.hbm [shape: bf16[64,64], index: 4, kind: input, shape index: {}]   ;;  %s4452_s5 = inlined_call_operand.hbm [shape: bf16[64,128], index: 5, kind: input, shape index: {}]   ;;  %s4453_s6 = inlined_call_operand.vmem [shape: bf16[128,128], index: 6, kind: input, shape index: {}]   ;;  %s4454_s7 = inlined_call_operand.hbm [shape: bf16[128,256], index: 7, kind: input, shape index: {}]   ;;  %s4455_s8 = inlined_call_operand.hbm [shape: bf16[256,128], index: 8, kind: input, shape index: {}]   ;;  %s4456_s9 = inlined_call_operand.hbm [shape: bf16[128,256], index: 9, kind: input, shape index: {}]   ;;  %s4457_s10 = inlined_call_operand.hbm [shape: bf16[256,128], index: 10, kind: input, shape index: {}]   ;;  %s4458_s11 = inlined_call_operand.hbm [shape: bf16[128,128], index: 11, kind: input, shape index: {}]   ;;  %s4459_s12 = inlined_call_operand.vmem [shape: bf16[128,32], index: 12, kind: input, shape index: {}]   ;;  %s4460_s13 = inlined_call_operand.hbm [shape: bf16[32,32], index: 13, kind: input, shape index: {}]   ;;  %s4461_s14 = inlined_call_operand.hbm [shape: bf16[32,128], index: 14, kind: input, shape index: {}]   ;;  %s4462_s15 = inlined_call_operand.hbm [shape: bf16[128,256], index: 15, kind: input, shape index: {}]   ;;  %s4463_s16 = inlined_call_operand.hbm [shape: bf16[256,128], index: 16, kind: input, shape index: {}]   ;;  %s4464_s17 = inlined_call_operand.hbm [shape: bf16[128,256], index: 17, kind: input, shape index: {}]   ;;  %s4465_s18 = inlined_call_operand.hbm [shape: bf16[256,128], index: 18, kind: input, shape index: {}]   ;;  %s4466_s19 = inlined_call_operand.hbm [shape: f32[32,256], index: 19, kind: input, shape index: {}]   ;;  %s4467_s20 = inlined_call_operand.hbm [shape: f32[8,256], index: 20, kind: output, shape index: {}]  }
   0x1   :  { %4469 = sst [smem:[#allocation40_spill]] %s4447_s0 }
   0x2   :  { %4470 = sst [smem:[#allocation41_spill]] %s4448_s1 }
   0x3   :  { %4471 = sst [smem:[#allocation42_spill]] %s4449_s2 }
   0x4   :  { %4472 = sst [smem:[#allocation43_spill]] %s4450_s3 }
   0x5   :  { %4473 = sst [smem:[#allocation44_spill]] %s4451_s4 }
   0x6   :  { %25 = vsyncpa [#allocation3], 0 }
   0x7   :  { %26 = vsyncpa [#allocation6], 0 }
   0x8   :  { %27 = vsyncpa [#allocation9], 0 }
   0x9   :  { %28 = vsyncpa [#allocation12], 0 }
   0xa   :  { %29 = vsyncpa [#allocation15], 0 }
   0xb   :  { %30 = vsyncpa [#allocation18], 0 }
   0xc   :  { %31 = vsyncpa [#allocation21], 0 }
   0xd   :  { %32 = vsyncpa [#allocation24], 0 }
   0xe   :  { %33 = vsyncpa [#allocation27], 0 }
   0xf   :  { %34 = vsyncpa [#allocation4], 0  ;;  %s4044_s1 = smov [#allocation5]  }
  0x10   :  { %s51_s22 = sshll.u32 %s4044_s1, 4  ;;  %s52_s22 = int_to_ptr.vmem [resolvable:$true] %s51_s22 }
  0x11   :  { %s3672_s23 = scalar_lea.vmem %s52_s22, 128  ;;  %p3677_p1 = scmp.lt.s32.totalorder %s52_s22, %s52_s22 }
  0x12   :  { %p3673_p0 = scmp.ne.s32.totalorder %s52_s22, %s3672_s23  ;;  %p3678_p2 = scmp.lt.s32.totalorder %s3672_s23, %s3672_s23 }
  0x14   :  { %p3679_p3 = por %p3678_p2, %p3677_p1 }
  0x16   :  { %p3680_p4 = pnand %p3679_p3, %p3673_p0 }
  0x18   :  { %3683 = shalt.err (!%p3680_p4)
}
  0x19   :  { %s4474_s25 = sld [smem:[#allocation41_spill]]  ;;  %s4045_s3 = smov [#allocation8]  }
  0x1a   :  { %s74_s26 = sshll.u32 %s4045_s3, 4  ;;  %s4046_s27 = smov [#allocation11]   ;;  %s75_s26 = int_to_ptr.vmem [resolvable:$true] %s74_s26 }
  0x1b   :  { %s100_s28 = sshll.u32 %s4046_s27, 4  ;;  %s3692_s4 = scalar_lea.vmem %s75_s26, 512  ;;  %s101_s28 = int_to_ptr.vmem [resolvable:$true] %s100_s28 }
  0x1c   :  { %p3693_p5 = scmp.ne.s32.totalorder %s75_s26, %s3692_s4  ;;  %p3697_p6 = scmp.lt.s32.totalorder %s75_s26, %s75_s26 }
  0x1d   :  { %p3698_p7 = scmp.lt.s32.totalorder %s3692_s4, %s3692_s4 }
  0x1f   :  { %54 = dma.hbm_to_vmem [thread:$0]  %s4474_s25, 128, %s52_s22, [#allocation6]  }
  0x20   :  { %p3699_p8 = por %p3698_p7, %p3697_p6 }
  0x22   :  { %p3700_p9 = pnand %p3699_p8, %p3693_p5 }
  0x24   :  { %3703 = shalt.err (!%p3700_p9)
}
  0x25   :  { %s4047_s29 = smov 64   ;;  %s4048_s30 = smov 4  }
  0x26   :  { %s4475_s1 = sld [smem:[#allocation44_spill]]  ;;  %s3712_s22 = scalar_lea.vmem %s101_s28, 2048 }
  0x27   :  { %p3713_p10 = scmp.ne.s32.totalorder %s101_s28, %s3712_s22  ;;  %p3717_p11 = scmp.lt.s32.totalorder %s101_s28, %s101_s28 }
  0x28   :  { %p3718_p12 = scmp.lt.s32.totalorder %s3712_s22, %s3712_s22 }
  0x2a   :  { %p3719_p13 = por %p3718_p12, %p3717_p11 }
  0x2c   :  { %80 = dma.hbm_to_vmem [thread:$0]  %s4475_s1, 512, %s75_s26, [#allocation9], %s4047_s29, %s4047_s29, %s4048_s30  }
  0x2d   :  { %p3720_p0 = pnand %p3719_p13, %p3713_p10 }
  0x2f   :  { %3723 = shalt.err (!%p3720_p0)
}
  0x30   :  { %s4049_s23 = smov 128   ;;  %s4050_s24 = smov 8  }
  0x31   :  { %106 = dma.hbm_to_vmem [thread:$0]  %s4454_s7, 2048, %s101_s28, [#allocation12], %s4049_s23, %s4049_s23, %s4050_s24  }
  0x32   :  { %s4051_s3 = smov [#allocation14]   ;;  %s4052_s26 = smov [#allocation17]  }
  0x33   :  { %s124_s27 = sshll.u32 %s4051_s3, 4  ;;  %s148_s4 = sshll.u32 %s4052_s26, 4  ;;  %s125_s27 = int_to_ptr.vmem [resolvable:$true] %s124_s27  ;;  %s149_s4 = int_to_ptr.vmem [resolvable:$true] %s148_s4 }
  0x34   :  { %s3732_s0 = scalar_lea.vmem %s125_s27, 2048  ;;  %p3737_p2 = scmp.lt.s32.totalorder %s125_s27, %s125_s27 }
  0x35   :  { %p3733_p1 = scmp.ne.s32.totalorder %s125_s27, %s3732_s0  ;;  %p3738_p3 = scmp.lt.s32.totalorder %s3732_s0, %s3732_s0 }
  0x37   :  { %p3739_p4 = por %p3738_p3, %p3737_p2 }
  0x39   :  { %p3740_p5 = pnand %p3739_p4, %p3733_p1 }
  0x3b   :  { %3743 = shalt.err (!%p3740_p5)
}
  0x3c   :  { %130 = dma.hbm_to_vmem [thread:$0]  %s4456_s9, 2048, %s125_s27, [#allocation15], %s4049_s23, %s4049_s23, %s4050_s24  }
  0x3d   :  { %s3752_s7 = scalar_lea.vmem %s149_s4, 1024  ;;  %p3757_p7 = scmp.lt.s32.totalorder %s149_s4, %s149_s4 }
  0x3e   :  { %p3753_p6 = scmp.ne.s32.totalorder %s149_s4, %s3752_s7  ;;  %p3758_p8 = scmp.lt.s32.totalorder %s3752_s7, %s3752_s7 }
  0x40   :  { %p3759_p9 = por %p3758_p8, %p3757_p7 }
  0x42   :  { %p3760_p10 = pnand %p3759_p9, %p3753_p6 }
  0x44   :  { %3763 = shalt.err (!%p3760_p10)
}
  0x45   :  { %154 = dma.hbm_to_vmem [thread:$0]  %s4458_s11, 1024, %s149_s4, [#allocation18], %s4047_s29, %s4047_s29, %s4048_s30  }
  0x46   :  { %s4053_s2 = smov [#allocation20]   ;;  %s4054_s3 = smov [#allocation23]  }
  0x47   :  { %s174_s25 = sshll.u32 %s4053_s2, 4  ;;  %s198_s9 = sshll.u32 %s4054_s3, 4  ;;  %s175_s25 = int_to_ptr.vmem [resolvable:$true] %s174_s25  ;;  %s199_s9 = int_to_ptr.vmem [resolvable:$true] %s198_s9 }
  0x48   :  { %s3772_s27 = scalar_lea.vmem %s175_s25, 256  ;;  %p3777_p12 = scmp.lt.s32.totalorder %s175_s25, %s175_s25 }
  0x49   :  { %p3773_p11 = scmp.ne.s32.totalorder %s175_s25, %s3772_s27  ;;  %p3778_p13 = scmp.lt.s32.totalorder %s3772_s27, %s3772_s27 }
  0x4b   :  { %p3779_p0 = por %p3778_p13, %p3777_p12 }
  0x4d   :  { %p3780_p1 = pnand %p3779_p0, %p3773_p11 }
  0x4f   :  { %3783 = shalt.err (!%p3780_p1)
}
  0x50   :  { %180 = dma.hbm_to_vmem [thread:$0]  %s4461_s14, 256, %s175_s25, [#allocation21], %s4047_s29, %s4047_s29, %s4048_s30  }
  0x51   :  { %s3792_s11 = scalar_lea.vmem %s199_s9, 2048  ;;  %p3797_p3 = scmp.lt.s32.totalorder %s199_s9, %s199_s9 }
  0x52   :  { %p3793_p2 = scmp.ne.s32.totalorder %s199_s9, %s3792_s11  ;;  %p3798_p4 = scmp.lt.s32.totalorder %s3792_s11, %s3792_s11 }
  0x54   :  { %p3799_p5 = por %p3798_p4, %p3797_p3 }
  0x56   :  { %p3800_p6 = pnand %p3799_p5, %p3793_p2 }
  0x58   :  { %3803 = shalt.err (!%p3800_p6)
}
  0x59   :  { %204 = dma.hbm_to_vmem [thread:$0]  %s4463_s16, 2048, %s199_s9, [#allocation24], %s4047_s29, %s4047_s29, %s4048_s30  }
  0x5a   :  { %s4055_s1 = smov [#allocation26]   ;;  %s4056_s28 = smov [#allocation2]  }
  0x5b   :  { %s222_s7 = sshll.u32 %s4055_s1, 4  ;;  %s41_s14 = sshll.u32 %s4056_s28, 4  ;;  %s223_s7 = int_to_ptr.vmem [resolvable:$true] %s222_s7  ;;  %s42_s14 = int_to_ptr.vmem [resolvable:$true] %s41_s14 }
  0x5c   :  { %s3812_s22 = scalar_lea.vmem %s223_s7, 2048  ;;  %p3817_p8 = scmp.lt.s32.totalorder %s223_s7, %s223_s7 }
  0x5d   :  { %p3813_p7 = scmp.ne.s32.totalorder %s223_s7, %s3812_s22  ;;  %p3818_p9 = scmp.lt.s32.totalorder %s3812_s22, %s3812_s22 }
  0x5f   :  { %p3819_p10 = por %p3818_p9, %p3817_p8 }
  0x61   :  { %p3820_p11 = pnand %p3819_p10, %p3813_p7 }
  0x63   :  { %3823 = shalt.err (!%p3820_p11)
}
  0x64   :  { %228 = dma.hbm_to_vmem [thread:$0]  %s4465_s18, 2048, %s223_s7, [#allocation27], %s4047_s29, %s4047_s29, %s4048_s30  }
  0x65   :  { %s3832_s16 = scalar_lea.vmem %s42_s14, 128  ;;  %p3837_p13 = scmp.lt.s32.totalorder %s42_s14, %s42_s14 }
  0x66   :  { %p3833_p12 = scmp.ne.s32.totalorder %s42_s14, %s3832_s16  ;;  %p3838_p0 = scmp.lt.s32.totalorder %s3832_s16, %s3832_s16 }
  0x68   :  { %p3839_p1 = por %p3838_p0, %p3837_p13 }
  0x6a   :  { %p3840_p2 = pnand %p3839_p1, %p3833_p12 }
  0x6c   :  { %3843 = shalt.err (!%p3840_p2)
}
  0x6d   :  { %s4476_s27 = sld [smem:[#allocation40_spill]]  ;;  %s4057_s26 = smov [#allocation7]  }
  0x6e   :  { %s62_s0 = sshll.u32 %s4057_s26, 4  ;;  %s4058_s11 = smov [#allocation10]   ;;  %s63_s0 = int_to_ptr.vmem [resolvable:$true] %s62_s0 }
  0x6f   :  { %s86_s4 = sshll.u32 %s4058_s11, 4  ;;  %s3852_s21 = scalar_lea.vmem %s63_s0, 256  ;;  %s87_s4 = int_to_ptr.vmem [resolvable:$true] %s86_s4 }
  0x70   :  { %p3853_p3 = scmp.ne.s32.totalorder %s63_s0, %s3852_s21  ;;  %p3857_p4 = scmp.lt.s32.totalorder %s63_s0, %s63_s0 }
  0x71   :  { %p3858_p5 = scmp.lt.s32.totalorder %s3852_s21, %s3852_s21 }
  0x73   :  { %44 = dma.hbm_to_vmem [thread:$0]  %s4476_s27, 128, %s42_s14, [#allocation3]  }
  0x74   :  { %p3859_p6 = por %p3858_p5, %p3857_p4 }
  0x76   :  { %p3860_p7 = pnand %p3859_p6, %p3853_p3 }
  0x78   :  { %3863 = shalt.err (!%p3860_p7)
}
  0x79   :  { %s4477_s7 = sld [smem:[#allocation43_spill]]  ;;  %s3872_s28 = scalar_lea.vmem %s87_s4, 512 }
  0x7a   :  { %p3873_p8 = scmp.ne.s32.totalorder %s87_s4, %s3872_s28  ;;  %p3877_p9 = scmp.lt.s32.totalorder %s87_s4, %s87_s4 }
  0x7b   :  { %p3878_p10 = scmp.lt.s32.totalorder %s3872_s28, %s3872_s28 }
  0x7d   :  { %p3879_p11 = por %p3878_p10, %p3877_p9 }
  0x7f   :  { %68 = dma.hbm_to_vmem [thread:$0]  %s4477_s7, 256, %s63_s0, [#allocation6], %s4047_s29, %s4047_s29, %s4048_s30  }
  0x80   :  { %p3880_p12 = pnand %p3879_p11, %p3873_p8 }
  0x82   :  { %3883 = shalt.err (!%p3880_p12)
}
  0x83   :  { %92 = dma.hbm_to_vmem [thread:$0]  %s4452_s5, 512, %s87_s4, [#allocation9], %s4047_s29, %s4047_s29, %s4048_s30  }
  0x84   :  { %s4059_s2 = smov [#allocation13]   ;;  %s4060_s16 = smov [#allocation16]  }
  0x85   :  { %s112_s25 = sshll.u32 %s4059_s2, 4  ;;  %s136_s3 = sshll.u32 %s4060_s16, 4  ;;  %s113_s25 = int_to_ptr.vmem [resolvable:$true] %s112_s25  ;;  %s137_s3 = int_to_ptr.vmem [resolvable:$true] %s136_s3 }
  0x86   :  { %s3892_s9 = scalar_lea.vmem %s113_s25, 2048  ;;  %p3897_p0 = scmp.lt.s32.totalorder %s113_s25, %s113_s25 }
  0x87   :  { %p3893_p13 = scmp.ne.s32.totalorder %s113_s25, %s3892_s9  ;;  %p3898_p1 = scmp.lt.s32.totalorder %s3892_s9, %s3892_s9 }
  0x89   :  { %p3899_p2 = por %p3898_p1, %p3897_p0 }
  0x8b   :  { %p3900_p3 = pnand %p3899_p2, %p3893_p13 }
  0x8d   :  { %3903 = shalt.err (!%p3900_p3)
}
  0x8e   :  { %118 = dma.hbm_to_vmem [thread:$0]  %s4455_s8, 2048, %s113_s25, [#allocation12], %s4047_s29, %s4047_s29, %s4048_s30  }
  0x8f   :  { %s3912_s5 = scalar_lea.vmem %s137_s3, 2048  ;;  %p3917_p5 = scmp.lt.s32.totalorder %s137_s3, %s137_s3 }
  0x90   :  { %p3913_p4 = scmp.ne.s32.totalorder %s137_s3, %s3912_s5  ;;  %p3918_p6 = scmp.lt.s32.totalorder %s3912_s5, %s3912_s5 }
  0x92   :  { %p3919_p7 = por %p3918_p6, %p3917_p5 }
  0x94   :  { %p3920_p8 = pnand %p3919_p7, %p3913_p4 }
  0x96   :  { %3923 = shalt.err (!%p3920_p8)
}
  0x97   :  { %142 = dma.hbm_to_vmem [thread:$0]  %s4457_s10, 2048, %s137_s3, [#allocation15], %s4047_s29, %s4047_s29, %s4048_s30  }
  0x98   :  { %s4061_s4 = smov [#allocation19]   ;;  %s4062_s18 = smov [#allocation22]  }
  0x99   :  { %s162_s21 = sshll.u32 %s4061_s4, 4  ;;  %s186_s8 = sshll.u32 %s4062_s18, 4  ;;  %s163_s21 = int_to_ptr.vmem [resolvable:$true] %s162_s21  ;;  %s187_s8 = int_to_ptr.vmem [resolvable:$true] %s186_s8 }
  0x9a   :  { %s3932_s1 = scalar_lea.vmem %s163_s21, 256  ;;  %p3937_p10 = scmp.lt.s32.totalorder %s163_s21, %s163_s21 }
  0x9b   :  { %p3933_p9 = scmp.ne.s32.totalorder %s163_s21, %s3932_s1  ;;  %p3938_p11 = scmp.lt.s32.totalorder %s3932_s1, %s3932_s1 }
  0x9d   :  { %p3939_p12 = por %p3938_p11, %p3937_p10 }
  0x9f   :  { %p3940_p13 = pnand %p3939_p12, %p3933_p9 }
  0xa1   :  { %3943 = shalt.err (!%p3940_p13)
}
  0xa2   :  { %168 = dma.hbm_to_vmem [thread:$0]  %s4460_s13, 256, %s163_s21, [#allocation18], %s4047_s29, %s4047_s29, %s4048_s30  }
  0xa3   :  { %s3952_s10 = scalar_lea.vmem %s187_s8, 2048  ;;  %p3957_p1 = scmp.lt.s32.totalorder %s187_s8, %s187_s8 }
  0xa4   :  { %p3953_p0 = scmp.ne.s32.totalorder %s187_s8, %s3952_s10  ;;  %p3958_p2 = scmp.lt.s32.totalorder %s3952_s10, %s3952_s10 }
  0xa6   :  { %p3959_p3 = por %p3958_p2, %p3957_p1 }
  0xa8   :  { %p3960_p4 = pnand %p3959_p3, %p3953_p0 }
  0xaa   :  { %3963 = shalt.err (!%p3960_p4)
}
  0xab   :  { %192 = dma.hbm_to_vmem [thread:$0]  %s4462_s15, 2048, %s187_s8, [#allocation21], %s4049_s23, %s4049_s23, %s4050_s24  }
  0xac   :  { %s4063_s2 = smov [#allocation25]   ;;  %s4064_s16 = smov [#allocation28]  }
  0xad   :  { %s210_s25 = sshll.u32 %s4063_s2, 4  ;;  %s234_s13 = sshll.u32 %s4064_s16, 4  ;;  %s211_s25 = int_to_ptr.vmem [resolvable:$true] %s210_s25  ;;  %s235_s13 = int_to_ptr.vmem [resolvable:$true] %s234_s13 }
  0xae   :  { %s3972_s29 = scalar_lea.vmem %s211_s25, 2048  ;;  %p3977_p6 = scmp.lt.s32.totalorder %s211_s25, %s211_s25 }
  0xaf   :  { %p3973_p5 = scmp.ne.s32.totalorder %s211_s25, %s3972_s29  ;;  %p3978_p7 = scmp.lt.s32.totalorder %s3972_s29, %s3972_s29 }
  0xb1   :  { %p3979_p8 = por %p3978_p7, %p3977_p6 }
  0xb3   :  { %p3980_p9 = pnand %p3979_p8, %p3973_p5 }
  0xb5   :  { %3983 = shalt.err (!%p3980_p9)
}
  0xb6   :  { %216 = dma.hbm_to_vmem [thread:$0]  %s4464_s17, 2048, %s211_s25, [#allocation24], %s4049_s23, %s4049_s23, %s4050_s24  }
  0xb7   :  { %s3992_s15 = scalar_lea.vmem %s235_s13, 1024  ;;  %p3997_p11 = scmp.lt.s32.totalorder %s235_s13, %s235_s13 }
  0xb8   :  { %p3993_p10 = scmp.ne.s32.totalorder %s235_s13, %s3992_s15  ;;  %p3998_p12 = scmp.lt.s32.totalorder %s3992_s15, %s3992_s15 }
  0xba   :  { %p3999_p13 = por %p3998_p12, %p3997_p11 }
  0xbc   :  { %p4000_p0 = pnand %p3999_p13, %p3993_p10 }
  0xbe   :  { %4003 = shalt.err (!%p4000_p0)
}
  0xbf   :  { %s4065_s9 = smov 256   ;;  %s4066_s27 = smov 16  }
  0xc0   :  { %240 = dma.hbm_to_vmem [thread:$0]  %s4466_s19, 1024, %s235_s13, [#allocation27], %s4065_s9, %s4065_s9, %s4066_s27  }
  0xc1   :  { %4024 = dma.done.wait [#allocation3], 128  }
  0xc2   :  { %4025 = vsyncadd [#allocation3], 4294967168 }
  0xc3   :  { %4026 = dma.done.wait [#allocation6], 384  }
  0xc4   :  { %4027 = vsyncadd [#allocation6], 4294966912 }
  0xc5   :  { %4028 = dma.done.wait [#allocation9], 1024  }
  0xc6   :  { %4029 = vsyncadd [#allocation9], 4294966272 }
  0xc7   :  { %4030 = dma.done.wait [#allocation12], 4096  }
  0xc8   :  { %4031 = vsyncadd [#allocation12], 4294963200 }
  0xc9   :  { %4032 = dma.done.wait [#allocation15], 4096  }
  0xca   :  { %4033 = vsyncadd [#allocation15], 4294963200 }
  0xcb   :  { %4034 = dma.done.wait [#allocation18], 1280  }
  0xcc   :  { %4035 = vsyncadd [#allocation18], 4294966016 }
  0xcd   :  { %4036 = dma.done.wait [#allocation21], 2304  }
  0xce   :  { %4037 = vsyncadd [#allocation21], 4294964992 }
  0xcf   :  { %4038 = dma.done.wait [#allocation24], 4096  }
  0xd0   :  { %4039 = vsyncadd [#allocation24], 4294963200 }
  0xd1   :  { %4040 = dma.done.wait [#allocation27], 3072  }
  0xd2   :  { %4041 = vsyncadd [#allocation27], 4294964224  ;;  %v4067_v0 = vmov 0.0   ;;  %vm4068_vm0 = vmmov 0   ;;  %vm299_vm1 = vcmask 1044480   ;;  %vm295_vm2 = vcmask 39936  }
  0xd3   :  { %3280 = vmatprep.subr.mxu0 %v4067_v0  ;;  %3282 = vmatprep.mubr.msk.f32.mxu0 %vm4068_vm0, %v4067_v0  ;;  %v294_v1 = vld [vmem:[#allocation5] sm:$0x1f]  ;;  %v293_v2 = vld [vmem:[#allocation2] sm:$0xff]  ;;  %s4478_s23 = sld [smem:[#allocation42_spill]]  ;;  %vm375_vm3 = vcmask 261120   ;;  %v3430_v38 = vld [vmem:[#allocation7 + $0x8] sm:$0xff]  }
  0xd4   :  { %3301 = vmatprep.subr.bf16.mxu1 %v4067_v0  ;;  %3309 = vmatprep.mubr.msk.bf16.mxu1 %vm4068_vm0, %v4067_v0  ;;  %v373_v30 = vld [vmem:[#allocation28] ss:$0 sm:$0xff]  ;;  %v374_v32 = vld [vmem:[#allocation28 + $0x1] ss:$0 sm:$0xff]  ;;  %v3431_v39 = vld [vmem:[#allocation7] sm:$0xff]   ;;  %vm559_vm6 = vcmask 523264  }
  0xd5   :  { %3281 = vmatpush3.msk.msra.mxu0 %vm299_vm1, %v294_v1 }
  0xd6   :  { %3283 = vmatmul.mubr.msk.f32.vlgmr.msra.gmra.mxu0 %vm295_vm2, %v293_v2  ;;  %3285 = vmatprep.subr.bf16.mxu0 %v4067_v0 }
  0xd7   :  { %3289 = vmatprep.mubr.msk.bf16.mxu0 %vm4068_vm0, %v4067_v0 }
  0xd9   :  { %v3428_v3 = vld [vmem:[%s4478_s23 + $0x8] sm:$0xff]   ;;  %v3429_v4 = vld [vmem:[%s4478_s23] sm:$0xff]  }
  0xda   :  { %3286 = vmatpush3.bf16.msra.mxu0 %v3428_v3 }
  0xdb   :  { %3287 = vmatprep.subr.bf16.mxu0 %v4067_v0 }
  0xde   :  { %3288 = vmatpush3.bf16.msra.mxu0 %v3429_v4  ;;  %v466_v4 = vld [vmem:[#allocation28 + $0x2] ss:$0 sm:$0xff] }
  0xdf   :  { %3293 = vmatprep.subr.bf16.mxu0 %v4067_v0 }
 0x196   :  { %v369_v5 = vpop.f32.mrf.mxu0 }
 0x197   :  { %v376_v6 = vsel %vm375_vm3, %v369_v5, 0.0  ;;  %v385_v7 = vmul.f32 %v369_v5, %v369_v5 }
 0x198   :  { %v377_v8 = vrot.slane %v376_v6, 4  ;;  %v3284_v9 = vpop.f32.mrf.mxu0 }
 0x199   :  { %v386_v10 = vsel %vm375_vm3, %v385_v7, 0.0 }
 0x19a   :  { %v378_v11 = vadd.f32 %v377_v8, %v376_v6  ;;  %v387_v12 = vrot.slane %v386_v10, 4  ;;  %v467_v6 = vld [vmem:[#allocation28 + $0x3] ss:$0 sm:$0xff] }
 0x19c   :  { %v379_v13 = vrot.slane %v378_v11, 2  ;;  %v388_v14 = vadd.f32 %v387_v12, %v386_v10  ;;  %v3432_v12 = vld [vmem:[#allocation8 + $0x18] sm:$0xff]  }
 0x19d   :  { %3302 = vmatpush3.bf16.msra.mxu1 %v3432_v12 }
 0x19e   :  { %v380_v15 = vadd.f32 %v379_v13, %v378_v11  ;;  %v389_v16 = vrot.slane %v388_v14, 2  ;;  %3303 = vmatprep.subr.bf16.mxu1 %v4067_v0  ;;  %v3433_v13 = vld [vmem:[#allocation8 + $0x10] sm:$0xff]  }
 0x1a0   :  { %v381_v17 = vrot.slane %v380_v15, 1  ;;  %v390_v18 = vadd.f32 %v389_v16, %v388_v14  ;;  %v3434_v14 = vld [vmem:[#allocation8 + $0x8] sm:$0xff]  }
 0x1a1   :  { %3304 = vmatpush3.bf16.msra.mxu1 %v3433_v13 }
 0x1a2   :  { %v382_v19 = vadd.f32 %v381_v17, %v380_v15  ;;  %v391_v20 = vrot.slane %v390_v18, 1  ;;  %3305 = vmatprep.subr.bf16.mxu1 %v4067_v0  ;;  %v3435_v15 = vld [vmem:[#allocation8] sm:$0xff]  }
 0x1a4   :  { %v384_v21 = vmul.f32 0.125, %v382_v19  ;;  %v392_v22 = vadd.f32 %v391_v20, %v390_v18 }
 0x1a5   :  { %3306 = vmatpush3.bf16.msra.mxu1 %v3434_v14 }
 0x1a6   :  { %v393_v23 = vmul.f32 0.125, %v392_v22  ;;  %v394_v24 = vmul.f32 %v384_v21, %v384_v21  ;;  %v397_v28 = vsub.f32 %v369_v5, %v384_v21  ;;  %3307 = vmatprep.subr.bf16.mxu1 %v4067_v0 }
 0x1a8   :  { %v395_v25 = vsub.f32 %v393_v23, %v394_v24 }
 0x1a9   :  { %3308 = vmatpush3.bf16.msra.mxu1 %v3435_v15 }
 0x1aa   :  { %v396_v26 = vmax.f32 %v395_v25, 0.0  ;;  %3325 = vmatprep.subr.bf16.mxu1 %v4067_v0 }
 0x1ac   :  { %v398_v27 = vadd.f32 1e-05, %v396_v26 }
 0x1ae   :  { %3628 = vrsqrt.f32 %v398_v27 }
 0x1bb   :  { %v3629_v29 = vpop.eup %3628 }
 0x1bc   :  { %v400_v31 = vmul.f32 %v3629_v29, %v397_v28 }
 0x1be   :  { %v401_v33 = vmul.f32 %v400_v31, %v373_v30 }
 0x1c0   :  { %v402_v34 = vadd.f32 %v401_v33, %v374_v32 }
 0x1c2   :  { %vm403_vm4 = vcmp.gt.f32.partialorder %v402_v34, 0.0  ;;  %v404_v35 = vmul.f32 0.01, %v402_v34 }
 0x1c4   :  { %v405_v36 = vsel %vm403_vm4, %v402_v34, %v404_v35 }
 0x1c5   :  { %v410_v37 = vpack.c.bf16 %v405_v36, %v405_v36 }
 0x1c7   :  { %3290 = vmatmul.mubr.msk.bf16.vlgmr.msra.gmra.mxu0 %vm375_vm3, %v410_v37 }
 0x1c8   :  { %3297 = vmatprep.mubr.msk.bf16.mxu0 %vm4068_vm0, %v4067_v0  ;;  %3294 = vmatpush3.bf16.msra.mxu0 %v3430_v38 }
 0x1c9   :  { %3295 = vmatprep.subr.bf16.mxu0 %v4067_v0 }
 0x1cc   :  { %3296 = vmatpush3.bf16.msra.mxu0 %v3431_v39 }
 0x1cd   :  { %3313 = vmatprep.subr.bf16.mxu0 %v4067_v0 }
 0x287   :  { %v460_v40 = vpop.f32.mrf.mxu0 }
 0x288   :  { %v468_v41 = vsel %vm375_vm3, %v460_v40, 0.0  ;;  %v476_v42 = vmul.f32 %v460_v40, %v460_v40 }
 0x289   :  { %v469_v43 = vrot.slane %v468_v41, 4  ;;  %v3291_v44 = vpop.f32.mrf.mxu0 }
 0x28a   :  { %v477_v45 = vsel %vm375_vm3, %v476_v42, 0.0 }
 0x28b   :  { %v470_v46 = vadd.f32 %v469_v43, %v468_v41  ;;  %v478_v47 = vrot.slane %v477_v45, 4  ;;  %v463_v48 = vpop.f32.mrf.mxu0  ;;  %v557_v43 = vld [vmem:[#allocation28 + $0x4] ss:$0 sm:$0xff] }
 0x28d   :  { %v471_v49 = vrot.slane %v470_v46, 2  ;;  %v479_v50 = vadd.f32 %v478_v47, %v477_v45  ;;  %v3292_v51 = vpop.f32.mrf.mxu0  ;;  %v558_v45 = vld [vmem:[#allocation28 + $0x5] ss:$0 sm:$0xff] }
 0x28e   :  { %v3436_v51 = vld [vmem:[#allocation10 + $0x18] sm:$0xff]  }
 0x28f   :  { %v472_v52 = vadd.f32 %v471_v49, %v470_v46  ;;  %v480_v53 = vrot.slane %v479_v50, 2 }
 0x291   :  { %v473_v54 = vrot.slane %v472_v52, 1  ;;  %v481_v55 = vadd.f32 %v480_v53, %v479_v50  ;;  %v3438_v53 = vld [vmem:[#allocation10 + $0x8] sm:$0xff]  }
 0x293   :  { %v474_v56 = vadd.f32 %v473_v54, %v472_v52  ;;  %v482_v57 = vrot.slane %v481_v55, 1  ;;  %v3437_v52 = vld [vmem:[#allocation10 + $0x10] sm:$0xff]   ;;  %v3439_v54 = vld [vmem:[#allocation10] sm:$0xff]  }
 0x295   :  { %v475_v58 = vmul.f32 0.125, %v474_v56  ;;  %v483_v59 = vadd.f32 %v482_v57, %v481_v55 }
 0x297   :  { %v484_v60 = vmul.f32 0.125, %v483_v59  ;;  %v485_v61 = vmul.f32 %v475_v58, %v475_v58  ;;  %v488_v2 = vsub.f32 %v460_v40, %v475_v58 }
 0x299   :  { %v486_v62 = vsub.f32 %v484_v60, %v485_v61 }
 0x29b   :  { %v487_v63 = vmax.f32 %v486_v62, 0.0 }
 0x29d   :  { %v489_v1 = vadd.f32 1e-05, %v487_v63 }
 0x29f   :  { %3630 = vrsqrt.f32 %v489_v1 }
 0x2ac   :  { %v3631_v3 = vpop.eup %3630 }
 0x2ad   :  { %v491_v5 = vmul.f32 %v3631_v3, %v488_v2 }
 0x2af   :  { %v492_v7 = vmul.f32 %v491_v5, %v466_v4 }
 0x2b1   :  { %v493_v8 = vadd.f32 %v492_v7, %v467_v6 }
 0x2b3   :  { %vm494_vm5 = vcmp.gt.f32.partialorder %v493_v8, 0.0  ;;  %v495_v9 = vmul.f32 0.01, %v493_v8 }
 0x2b5   :  { %v496_v10 = vsel %vm494_vm5, %v493_v8, %v495_v9 }
 0x2b6   :  { %v501_v11 = vpack.c.bf16 %v496_v10, %v496_v10 }
 0x2b8   :  { %3298 = vmatmul.mubr.msk.bf16.vlgmr.msra.gmra.mxu0 %vm375_vm3, %v501_v11 }
 0x2b9   :  { %3321 = vmatprep.mubr.msk.bf16.mxu0 %vm4068_vm0, %v4067_v0  ;;  %3314 = vmatpush3.bf16.msra.mxu0 %v3436_v51 }
 0x2ba   :  { %3315 = vmatprep.subr.bf16.mxu0 %v4067_v0 }
 0x2bd   :  { %3316 = vmatpush3.bf16.msra.mxu0 %v3437_v52 }
 0x2be   :  { %3317 = vmatprep.subr.bf16.mxu0 %v4067_v0 }
 0x2c1   :  { %3318 = vmatpush3.bf16.msra.mxu0 %v3438_v53 }
 0x2c2   :  { %3319 = vmatprep.subr.bf16.mxu0 %v4067_v0 }
 0x2c5   :  { %3320 = vmatpush3.bf16.msra.mxu0 %v3439_v54 }
 0x378   :  { %v551_v16 = vpop.f32.mrf.mxu0 }
 0x379   :  { %v560_v17 = vsel %vm559_vm6, %v551_v16, 0.0  ;;  %v568_v18 = vmul.f32 %v551_v16, %v551_v16 }
 0x37a   :  { %v561_v19 = vrot.slane %v560_v17, 4  ;;  %v3299_v20 = vpop.f32.mrf.mxu0 }
 0x37b   :  { %v569_v21 = vsel %vm559_vm6, %v568_v18, 0.0 }
 0x37c   :  { %v562_v22 = vadd.f32 %v561_v19, %v560_v17  ;;  %v570_v23 = vrot.slane %v569_v21, 4  ;;  %v554_v24 = vpop.f32.mrf.mxu0  ;;  %v665_v19 = vld [vmem:[#allocation28 + $0x6] ss:$0 sm:$0xff] }
 0x37e   :  { %v563_v25 = vrot.slane %v562_v22, 2  ;;  %v571_v26 = vadd.f32 %v570_v23, %v569_v21  ;;  %v3300_v27 = vpop.f32.mrf.mxu0  ;;  %v666_v21 = vld [vmem:[#allocation28 + $0x7] ss:$0 sm:$0xff] }
 0x37f   :  { %v3440_v27 = vld [vmem:[%s4453_s6 + $0x38] sm:$0xff]  }
 0x380   :  { %v564_v28 = vadd.f32 %v563_v25, %v562_v22  ;;  %v572_v29 = vrot.slane %v571_v26, 2 }
 0x382   :  { %v565_v30 = vrot.slane %v564_v28, 1  ;;  %v573_v31 = vadd.f32 %v572_v29, %v571_v26  ;;  %v3442_v29 = vld [vmem:[%s4453_s6 + $0x28] sm:$0xff]  }
 0x384   :  { %v566_v32 = vadd.f32 %v565_v30, %v564_v28  ;;  %v574_v33 = vrot.slane %v573_v31, 1  ;;  %v3441_v28 = vld [vmem:[%s4453_s6 + $0x30] sm:$0xff]   ;;  %v3443_v30 = vld [vmem:[%s4453_s6 + $0x20] sm:$0xff]  }
 0x386   :  { %v567_v34 = vmul.f32 0.125, %v566_v32  ;;  %v575_v35 = vadd.f32 %v574_v33, %v573_v31  ;;  %v3444_v31 = vld [vmem:[%s4453_s6 + $0x18] sm:$0xff]   ;;  %v3445_v32 = vld [vmem:[%s4453_s6 + $0x10] sm:$0xff]   ;;  %v3446_v33 = vld [vmem:[%s4453_s6 + $0x8] sm:$0xff]  }
 0x388   :  { %v576_v36 = vmul.f32 0.125, %v575_v35  ;;  %v577_v37 = vmul.f32 %v567_v34, %v567_v34  ;;  %v580_v41 = vsub.f32 %v551_v16, %v567_v34  ;;  %v3447_v34 = vld [vmem:[%s4453_s6] sm:$0xff]   ;;  %v3448_v35 = vld [vmem:[#allocation11 + $0x70] ss:$8 sps:$4 sm:$0xff]  }
 0x38a   :  { %v578_v38 = vsub.f32 %v576_v36, %v577_v37  ;;  %v3450_v36 = vld [vmem:[#allocation11 + $0x74] ss:$8 sps:$4 sm:$0xff]   ;;  %v3453_v37 = vld [vmem:[#allocation11 + $0x64] ss:$8 sps:$4 sm:$0xff]  }
 0x38b   :  { %1004 = vmatprep.subr.bf16.mxu0 %v3450_v36  ;;  %v3479_v36 = vld [vmem:[#allocation13 + $0x20] sm:$0xff]  }
 0x38c   :  { %v579_v39 = vmax.f32 %v578_v38, 0.0  ;;  %v3451_v38 = vld [vmem:[#allocation11 + $0x60] ss:$8 sps:$4 sm:$0xff]  }
 0x38e   :  { %v581_v40 = vadd.f32 1e-05, %v579_v39  ;;  %v3456_v39 = vld [vmem:[#allocation11 + $0x54] ss:$8 sps:$4 sm:$0xff]  }
 0x390   :  { %3632 = vrsqrt.f32 %v581_v40  ;;  %v3454_v40 = vld [vmem:[#allocation11 + $0x50] ss:$8 sps:$4 sm:$0xff]  }
 0x39d   :  { %v3633_v42 = vpop.eup %3632 }
 0x39e   :  { %v583_v44 = vmul.f32 %v3633_v42, %v580_v41  ;;  %v3459_v41 = vld [vmem:[#allocation11 + $0x44] ss:$8 sps:$4 sm:$0xff]   ;;  %v3457_v42 = vld [vmem:[#allocation11 + $0x40] ss:$8 sps:$4 sm:$0xff]  }
 0x3a0   :  { %v584_v46 = vmul.f32 %v583_v44, %v557_v43  ;;  %v3462_v43 = vld [vmem:[#allocation11 + $0x34] ss:$8 sps:$4 sm:$0xff]   ;;  %v3460_v44 = vld [vmem:[#allocation11 + $0x30] ss:$8 sps:$4 sm:$0xff]  }
 0x3a2   :  { %v585_v47 = vadd.f32 %v584_v46, %v558_v45  ;;  %v3465_v45 = vld [vmem:[#allocation11 + $0x24] ss:$8 sps:$4 sm:$0xff]   ;;  %v3463_v46 = vld [vmem:[#allocation11 + $0x20] ss:$8 sps:$4 sm:$0xff]  }
 0x3a4   :  { %vm586_vm7 = vcmp.gt.f32.partialorder %v585_v47, 0.0  ;;  %v587_v48 = vmul.f32 0.01, %v585_v47 }
 0x3a6   :  { %v588_v49 = vsel %vm586_vm7, %v585_v47, %v587_v48  ;;  %v3468_v47 = vld [vmem:[#allocation11 + $0x14] ss:$8 sps:$4 sm:$0xff]   ;;  %v3466_v48 = vld [vmem:[#allocation11 + $0x10] ss:$8 sps:$4 sm:$0xff]  }
 0x3a7   :  { %v597_v50 = vpack.c.bf16 %v588_v49, %v588_v49 }
 0x3a9   :  { %3310 = vmatmul.mubr.msk.bf16.vlgmr.msra.gmra.mxu1 %vm559_vm6, %v597_v50 }
 0x3aa   :  { %3341 = vmatprep.mubr.msk.bf16.mxu1 %vm4068_vm0, %v4067_v0  ;;  %3326 = vmatpush3.bf16.msra.mxu1 %v3440_v27 }
 0x3ab   :  { %3327 = vmatprep.subr.bf16.mxu1 %v4067_v0 }
 0x3ae   :  { %3328 = vmatpush3.bf16.msra.mxu1 %v3441_v28 }
 0x3af   :  { %3329 = vmatprep.subr.bf16.mxu1 %v4067_v0 }
 0x3b2   :  { %3330 = vmatpush3.bf16.msra.mxu1 %v3442_v29  ;;  %v3472_v29 = vld [vmem:[#allocation13 + $0x78] sm:$0xff]  }
 0x3b3   :  { %3331 = vmatprep.subr.bf16.mxu1 %v4067_v0 }
 0x3b6   :  { %3332 = vmatpush3.bf16.msra.mxu1 %v3443_v30  ;;  %v3473_v30 = vld [vmem:[#allocation13 + $0x38] sm:$0xff]  }
 0x3b7   :  { %3333 = vmatprep.subr.bf16.mxu1 %v4067_v0 }
 0x3ba   :  { %3334 = vmatpush3.bf16.msra.mxu1 %v3444_v31  ;;  %v3474_v31 = vld [vmem:[#allocation13 + $0x70] sm:$0xff]  }
 0x3bb   :  { %3335 = vmatprep.subr.bf16.mxu1 %v4067_v0 }
 0x3be   :  { %3336 = vmatpush3.bf16.msra.mxu1 %v3445_v32  ;;  %v3475_v32 = vld [vmem:[#allocation13 + $0x30] sm:$0xff]  }
 0x3bf   :  { %3337 = vmatprep.subr.bf16.mxu1 %v4067_v0 }
 0x3c2   :  { %3338 = vmatpush3.bf16.msra.mxu1 %v3446_v33  ;;  %v3476_v33 = vld [vmem:[#allocation13 + $0x68] sm:$0xff]  }
 0x3c3   :  { %3339 = vmatprep.subr.bf16.mxu1 %v4067_v0 }
 0x3c6   :  { %3340 = vmatpush3.bf16.msra.mxu1 %v3447_v34  ;;  %v3477_v34 = vld [vmem:[#allocation13 + $0x28] sm:$0xff]  }
 0x3c7   :  { %3168 = vmatprep.subr.bf16.mxu1 %v3472_v29  ;;  %v1046_v29 = vld [vmem:[#allocation28 + $0x13] ss:$8 sm:$0x3] }
 0x469   :  { %v659_v55 = vpop.f32.mrf.mxu1 }
 0x46a   :  { %v667_v56 = vsel %vm559_vm6, %v659_v55, 0.0  ;;  %v675_v57 = vmul.f32 %v659_v55, %v659_v55 }
 0x46b   :  { %v668_v58 = vrot.slane %v667_v56, 4  ;;  %v3311_v59 = vpop.f32.mrf.mxu1 }
 0x46c   :  { %v676_v60 = vsel %vm559_vm6, %v675_v57, 0.0 }
 0x46d   :  { %v669_v61 = vadd.f32 %v668_v58, %v667_v56  ;;  %v677_v62 = vrot.slane %v676_v60, 4  ;;  %v662_v63 = vpop.f32.mrf.mxu1 }
 0x46f   :  { %v670_v1 = vrot.slane %v669_v61, 2  ;;  %v678_v2 = vadd.f32 %v677_v62, %v676_v60  ;;  %v3312_v3 = vpop.f32.mrf.mxu1 }
 0x471   :  { %v671_v4 = vadd.f32 %v670_v1, %v669_v61  ;;  %v679_v5 = vrot.slane %v678_v2, 2 }
 0x473   :  { %v672_v6 = vrot.slane %v671_v4, 1  ;;  %v680_v7 = vadd.f32 %v679_v5, %v678_v2 }
 0x475   :  { %v673_v8 = vadd.f32 %v672_v6, %v671_v4  ;;  %v681_v9 = vrot.slane %v680_v7, 1 }
 0x477   :  { %v674_v10 = vmul.f32 0.125, %v673_v8  ;;  %v682_v11 = vadd.f32 %v681_v9, %v680_v7 }
 0x479   :  { %v683_v12 = vmul.f32 0.125, %v682_v11  ;;  %v684_v13 = vmul.f32 %v674_v10, %v674_v10  ;;  %v687_v17 = vsub.f32 %v659_v55, %v674_v10  ;;  %v772_v11 = vld [vmem:[#allocation28 + $0x10] ss:$0 sm:$0xff] }
 0x47b   :  { %v685_v14 = vsub.f32 %v683_v12, %v684_v13  ;;  %v773_v13 = vld [vmem:[#allocation28 + $0x11] ss:$0 sm:$0xff] }
 0x47d   :  { %v686_v15 = vmax.f32 %v685_v14, 0.0 }
 0x47f   :  { %v688_v16 = vadd.f32 1e-05, %v686_v15 }
 0x481   :  { %3634 = vrsqrt.f32 %v688_v16 }
 0x48e   :  { %v3635_v18 = vpop.eup %3634 }
 0x48f   :  { %v690_v20 = vmul.f32 %v3635_v18, %v687_v17 }
 0x491   :  { %v691_v22 = vmul.f32 %v690_v20, %v665_v19  ;;  %v3471_v19 = vld [vmem:[#allocation11 + $0x4] ss:$8 sps:$4 sm:$0xff]   ;;  %v3469_v20 = vld [vmem:[#allocation11] ss:$8 sps:$4 sm:$0xff]  }
 0x493   :  { %v692_v23 = vadd.f32 %v691_v22, %v666_v21  ;;  %v4069_v21 = vmov 0   ;;  %v817_v22 = vld [vmem:[#allocation28 + $0x12] ss:$0 sm:$0xff] }
 0x495   :  { %vm693_vm8 = vcmp.gt.f32.partialorder %v692_v23, 0.0  ;;  %v694_v24 = vmul.f32 0.01, %v692_v23 }
 0x497   :  { %v695_v25 = vsel %vm693_vm8, %v692_v23, %v694_v24 }
 0x498   :  { %v704_v26 = vpack.c.bf16 %v695_v25, %v695_v25 }
 0x49a   :  { %3322 = vmatmul.mubr.msk.bf16.vlgmr.msra.gmra.mxu0 %vm559_vm6, %v704_v26 }
 0x49b   :  { %1005 = vmatpush1.bf16.msra.mxu0 %v3448_v35  ;;  %1036 = vmatprep.mubr.bf16.mxu0 %v4069_v21  ;;  %v3478_v35 = vld [vmem:[#allocation13 + $0x60] sm:$0xff]  }
 0x49c   :  { %1006 = vmatprep.subr.bf16.mxu0 %v3453_v37  ;;  %v3480_v37 = vld [vmem:[#allocation13 + $0x58] sm:$0xff]  }
 0x49f   :  { %1007 = vmatpush1.bf16.msra.mxu0 %v3451_v38  ;;  %v3481_v38 = vld [vmem:[#allocation13 + $0x18] sm:$0xff]  }
 0x4a0   :  { %1008 = vmatprep.subr.bf16.mxu0 %v3456_v39  ;;  %v3482_v39 = vld [vmem:[#allocation13 + $0x50] sm:$0xff]  }
 0x4a3   :  { %1009 = vmatpush1.bf16.msra.mxu0 %v3454_v40  ;;  %v3483_v40 = vld [vmem:[#allocation13 + $0x10] sm:$0xff]  }
 0x4a4   :  { %1010 = vmatprep.subr.bf16.mxu0 %v3459_v41  ;;  %v3484_v41 = vld [vmem:[#allocation13 + $0x48] sm:$0xff]  }
 0x4a7   :  { %1011 = vmatpush1.bf16.msra.mxu0 %v3457_v42  ;;  %v3485_v42 = vld [vmem:[#allocation13 + $0x8] sm:$0xff]  }
 0x4a8   :  { %1012 = vmatprep.subr.bf16.mxu0 %v3462_v43  ;;  %v3486_v43 = vld [vmem:[#allocation13 + $0x40] sm:$0xff]  }
 0x4ab   :  { %1013 = vmatpush1.bf16.msra.mxu0 %v3460_v44  ;;  %v3487_v44 = vld [vmem:[#allocation13] sm:$0xff]  }
 0x4ac   :  { %1014 = vmatprep.subr.bf16.mxu0 %v3465_v45 }
 0x4af   :  { %1015 = vmatpush1.bf16.msra.mxu0 %v3463_v46 }
 0x4b0   :  { %1016 = vmatprep.subr.bf16.mxu0 %v3468_v47 }
 0x4b3   :  { %1017 = vmatpush1.bf16.msra.mxu0 %v3466_v48 }
 0x4b4   :  { %1018 = vmatprep.subr.bf16.mxu0 %v3471_v19 }
 0x4b7   :  { %1019 = vmatpush1.bf16.msra.mxu0 %v3469_v20 }
 0x55a   :  { %v766_v49 = vpop.f32.mrf.mxu0 }
 0x55b   :  { %v774_v50 = vrot.slane %v766_v49, 4  ;;  %v781_v51 = vmul.f32 %v766_v49, %v766_v49 }
 0x55c   :  { %v3323_v52 = vpop.f32.mrf.mxu0 }
 0x55d   :  { %v775_v53 = vadd.f32 %v774_v50, %v766_v49  ;;  %v782_v54 = vrot.slane %v781_v51, 4 }
 0x55e   :  { %v769_v55 = vpop.f32.mrf.mxu0 }
 0x55f   :  { %v776_v56 = vrot.slane %v775_v53, 2  ;;  %v783_v57 = vadd.f32 %v782_v54, %v781_v51 }
 0x560   :  { %v3324_v58 = vpop.f32.mrf.mxu0 }
 0x561   :  { %v777_v59 = vadd.f32 %v776_v56, %v775_v53  ;;  %v784_v60 = vrot.slane %v783_v57, 2 }
 0x563   :  { %v778_v61 = vrot.slane %v777_v59, 1  ;;  %v785_v62 = vadd.f32 %v784_v60, %v783_v57 }
 0x565   :  { %v779_v63 = vadd.f32 %v778_v61, %v777_v59  ;;  %v786_v1 = vrot.slane %v785_v62, 1 }
 0x567   :  { %v780_v2 = vmul.f32 0.125, %v779_v63  ;;  %v787_v3 = vadd.f32 %v786_v1, %v785_v62 }
 0x569   :  { %v788_v4 = vmul.f32 0.125, %v787_v3  ;;  %v789_v5 = vmul.f32 %v780_v2, %v780_v2  ;;  %v792_v9 = vsub.f32 %v766_v49, %v780_v2 }
 0x56b   :  { %v790_v6 = vsub.f32 %v788_v4, %v789_v5 }
 0x56d   :  { %v791_v7 = vmax.f32 %v790_v6, 0.0 }
 0x56f   :  { %v793_v8 = vadd.f32 1e-05, %v791_v7 }
 0x571   :  { %3636 = vrsqrt.f32 %v793_v8 }
 0x57e   :  { %v3637_v10 = vpop.eup %3636 }
 0x57f   :  { %v795_v12 = vmul.f32 %v3637_v10, %v792_v9 }
 0x581   :  { %v796_v14 = vmul.f32 %v795_v12, %v772_v11 }
 0x583   :  { %v797_v15 = vadd.f32 %v796_v14, %v773_v13 }
 0x585   :  { %vm798_vm9 = vcmp.gt.f32.partialorder %v797_v15, 0.0  ;;  %v799_v16 = vmul.f32 0.01, %v797_v15 }
 0x587   :  { %v800_v17 = vsel %vm798_vm9, %v797_v15, %v799_v16 }
 0x588   :  { %v818_v18 = vpack.c.bf16 %v800_v17, %v800_v17 }
 0x58a   :  { %3342 = vmatmul.mubr.bf16.vlgmr.msra.gmra.mxu1 %v818_v18 }
 0x58b   :  { %3169 = vmatpush3.bf16.msra.mxu1 %v3473_v30  ;;  %v1048_v30 = vld [vmem:[#allocation28 + $0x14] ss:$8 sm:$0x3] }
 0x58c   :  { %3170 = vmatprep.subr.bf16.mxu1 %v3474_v31 }
 0x58f   :  { %3171 = vmatpush3.bf16.msra.mxu1 %v3475_v32 }
 0x590   :  { %3172 = vmatprep.subr.bf16.mxu1 %v3476_v33 }
 0x593   :  { %3173 = vmatpush3.bf16.msra.mxu1 %v3477_v34 }
 0x594   :  { %3174 = vmatprep.subr.bf16.mxu1 %v3478_v35 }
 0x597   :  { %3175 = vmatpush3.bf16.msra.mxu1 %v3479_v36 }
 0x598   :  { %3176 = vmatprep.subr.bf16.mxu1 %v3480_v37 }
 0x59b   :  { %3177 = vmatpush3.bf16.msra.mxu1 %v3481_v38 }
 0x59c   :  { %3178 = vmatprep.subr.bf16.mxu1 %v3482_v39 }
 0x59f   :  { %3179 = vmatpush3.bf16.msra.mxu1 %v3483_v40 }
 0x5a0   :  { %3180 = vmatprep.subr.bf16.mxu1 %v3484_v41 }
 0x5a3   :  { %3181 = vmatpush3.bf16.msra.mxu1 %v3485_v42 }
 0x5a4   :  { %3182 = vmatprep.subr.bf16.mxu1 %v3486_v43 }
 0x5a7   :  { %3183 = vmatpush3.bf16.msra.mxu1 %v3487_v44 }
 0x64a   :  { %v901_v23 = vpop.f32.mrf.mxu1 }
 0x64b   :  { %v902_v24 = vadd.f32 %v901_v23, %v817_v22 }
 0x64c   :  { %v3343_v25 = vpop.f32.mrf.mxu1 }
 0x64d   :  { %v4345_v26 = vpack.c.bf16 %v902_v24, %v902_v24  ;;  %v1094_v24 = vlaneseq }
 0x64e   :  { %v904_v27 = vpop.f32.mrf.mxu1 }
 0x64f   :  { %1037 = vmatmul.mubr.bf16.vlgmr.msra.gmra.mxu0 %v4345_v26  ;;  %v1095_v27 = vshrl.u32 %v1094_v24, 7 }
 0x650   :  { %v3344_v28 = vpop.f32.mrf.mxu1  ;;  %1453 = vmatprep.mubr.bf16.mxu0 %v4069_v21 }
 0x651   :  { %v4349_v28 = vsub.s32 0, %v1095_v27  ;;  %v4351_v31 = vsub.s32 1, %v1095_v27 }
 0x653   :  { %v1097_v33 = vrot.slane %v1046_v29, %v4349_v28  ;;  %v1110_v36 = vrot.slane %v1048_v30, %v4349_v28  ;;  %v1101_v38 = vrot.slane %v1046_v29, %v4351_v31  ;;  %v1114_v42 = vrot.slane %v1048_v30, %v4351_v31 }
 0x70f   :  { %v1038_v45 = vpop.f32.mrf.mxu0 }
 0x710   :  { %v1049_v46 = vrot.slane %v1038_v45, 4  ;;  %v1063_v47 = vmul.f32 %v1038_v45, %v1038_v45 }
 0x711   :  { %v1040_v48 = vpop.f32.mrf.mxu0 }
 0x712   :  { %v1050_v49 = vadd.f32 %v1049_v46, %v1038_v45  ;;  %v1065_v50 = vrot.slane %v1063_v47, 4  ;;  %v1055_v51 = vrot.slane %v1040_v48, 4  ;;  %v1064_v52 = vmul.f32 %v1040_v48, %v1040_v48 }
 0x713   :  { %v1042_v53 = vpop.f32.mrf.mxu0 }
 0x714   :  { %v1051_v54 = vrot.slane %v1050_v49, 2  ;;  %v1066_v55 = vadd.f32 %v1065_v50, %v1063_v47  ;;  %v1056_v56 = vadd.f32 %v1055_v51, %v1040_v48  ;;  %v1071_v57 = vrot.slane %v1064_v52, 4  ;;  %v3488_v53 = vld [vmem:[#allocation14 + $0x70] ss:$8 sps:$4 sm:$0xff]  }
 0x715   :  { %v1043_v58 = vpop.f32.mrf.mxu0 }
 0x716   :  { %v1052_v59 = vadd.f32 %v1051_v54, %v1050_v49  ;;  %v1067_v60 = vrot.slane %v1066_v55, 2  ;;  %v1057_v61 = vrot.slane %v1056_v56, 2  ;;  %v1072_v62 = vadd.f32 %v1071_v57, %v1064_v52  ;;  %v3493_v54 = vld [vmem:[#allocation14 + $0x64] ss:$8 sps:$4 sm:$0xff]   ;;  %v3494_v57 = vld [vmem:[#allocation14 + $0x50] ss:$8 sps:$4 sm:$0xff]  }
 0x717   :  { %v3499_v58 = vld [vmem:[#allocation14 + $0x44] ss:$8 sps:$4 sm:$0xff]  }
 0x718   :  { %v1053_v63 = vrot.slane %v1052_v59, 1  ;;  %v1068_v1 = vadd.f32 %v1067_v60, %v1066_v55  ;;  %v1058_v2 = vadd.f32 %v1057_v61, %v1056_v56  ;;  %v1073_v3 = vrot.slane %v1072_v62, 2  ;;  %v3491_v55 = vld [vmem:[#allocation14 + $0x60] ss:$8 sps:$4 sm:$0xff]   ;;  %v3496_v56 = vld [vmem:[#allocation14 + $0x54] ss:$8 sps:$4 sm:$0xff]  }
 0x719   :  { %v3502_v60 = vld [vmem:[#allocation14 + $0x34] ss:$8 sps:$4 sm:$0xff]   ;;  %v3500_v61 = vld [vmem:[#allocation14 + $0x30] ss:$8 sps:$4 sm:$0xff]  }
 0x71a   :  { %v1054_v4 = vadd.f32 %v1053_v63, %v1052_v59  ;;  %v1069_v5 = vrot.slane %v1068_v1, 1  ;;  %v1059_v6 = vrot.slane %v1058_v2, 1  ;;  %v1074_v7 = vadd.f32 %v1073_v3, %v1072_v62  ;;  %v3497_v59 = vld [vmem:[#allocation14 + $0x40] ss:$8 sps:$4 sm:$0xff]   ;;  %v3505_v62 = vld [vmem:[#allocation14 + $0x24] ss:$8 sps:$4 sm:$0xff]  }
 0x71b   :  { %v3503_v63 = vld [vmem:[#allocation14 + $0x20] ss:$8 sps:$4 sm:$0xff]   ;;  %v3511_v3 = vld [vmem:[#allocation14 + $0x4] ss:$8 sps:$4 sm:$0xff]  }
 0x71c   :  { %v1061_v8 = vmul.f32 0.125, %v1054_v4  ;;  %v1070_v9 = vadd.f32 %v1069_v5, %v1068_v1  ;;  %v1060_v10 = vadd.f32 %v1059_v6, %v1058_v2  ;;  %v1075_v11 = vrot.slane %v1074_v7, 1  ;;  %v3508_v1 = vld [vmem:[#allocation14 + $0x14] ss:$8 sps:$4 sm:$0xff]   ;;  %v3506_v2 = vld [vmem:[#allocation14 + $0x10] ss:$8 sps:$4 sm:$0xff]  }
 0x71d   :  { %v3509_v4 = vld [vmem:[#allocation14] ss:$8 sps:$4 sm:$0xff]  }
 0x71e   :  { %v1077_v12 = vmul.f32 0.125, %v1070_v9  ;;  %v1079_v13 = vmul.f32 %v1061_v8, %v1061_v8  ;;  %v1062_v14 = vmul.f32 0.125, %v1060_v10  ;;  %v1076_v15 = vadd.f32 %v1075_v11, %v1074_v7 }
 0x71f   :  { %v1085_v32 = vsub.f32 %v1038_v45, %v1061_v8 }
 0x720   :  { %v1081_v16 = vsub.f32 %v1077_v12, %v1079_v13  ;;  %v1080_v17 = vmul.f32 %v1062_v14, %v1062_v14  ;;  %v1078_v18 = vmul.f32 0.125, %v1076_v15  ;;  %v1086_v37 = vsub.f32 %v1040_v48, %v1062_v14  ;;  %v3490_v48 = vld [vmem:[#allocation14 + $0x74] ss:$8 sps:$4 sm:$0xff]  }
 0x721   :  { %1421 = vmatprep.subr.bf16.mxu0 %v3490_v48  ;;  %v3521_v48 = vld [vmem:[#allocation16 + $0x38] sm:$0xff]  }
 0x722   :  { %v1083_v19 = vmax.f32 %v1081_v16, 0.0  ;;  %v1082_v20 = vsub.f32 %v1078_v18, %v1080_v17  ;;  %1422 = vmatpush1.bf16.msra.mxu0 %v3488_v53  ;;  %v3522_v53 = vld [vmem:[#allocation16 + $0x70] sm:$0xff]  }
 0x723   :  { %1423 = vmatprep.subr.bf16.mxu0 %v3493_v54  ;;  %v3523_v54 = vld [vmem:[#allocation16 + $0x30] sm:$0xff]  }
 0x724   :  { %v1087_v22 = vadd.f32 1e-05, %v1083_v19  ;;  %v1084_v23 = vmax.f32 %v1082_v20, 0.0 }
 0x726   :  { %3638 = vrsqrt.f32 %v1087_v22  ;;  %v1088_v25 = vadd.f32 1e-05, %v1084_v23  ;;  %1424 = vmatpush1.bf16.msra.mxu0 %v3491_v55  ;;  %v3524_v55 = vld [vmem:[#allocation16 + $0x68] sm:$0xff]  }
 0x727   :  { %1425 = vmatprep.subr.bf16.mxu0 %v3496_v56  ;;  %v3525_v56 = vld [vmem:[#allocation16 + $0x28] sm:$0xff]  }
 0x728   :  { %3640 = vrsqrt.f32 %v1088_v25 }
 0x72a   :  { %1426 = vmatpush1.bf16.msra.mxu0 %v3494_v57  ;;  %v3526_v57 = vld [vmem:[#allocation16 + $0x60] sm:$0xff]  }
 0x72b   :  { %1427 = vmatprep.subr.bf16.mxu0 %v3499_v58  ;;  %v3527_v58 = vld [vmem:[#allocation16 + $0x20] sm:$0xff]  }
 0x72e   :  { %1428 = vmatpush1.bf16.msra.mxu0 %v3497_v59  ;;  %v3529_v59 = vld [vmem:[#allocation16 + $0x18] sm:$0xff]  }
 0x72f   :  { %1429 = vmatprep.subr.bf16.mxu0 %v3502_v60  ;;  %v3530_v60 = vld [vmem:[#allocation16 + $0x50] sm:$0xff]  }
 0x732   :  { %1430 = vmatpush1.bf16.msra.mxu0 %v3500_v61  ;;  %v3531_v61 = vld [vmem:[#allocation16 + $0x10] sm:$0xff]  }
 0x733   :  { %v3639_v34 = vpop.eup %3638  ;;  %1431 = vmatprep.subr.bf16.mxu0 %v3505_v62  ;;  %v3532_v62 = vld [vmem:[#allocation16 + $0x48] sm:$0xff]  }
 0x734   :  { %v1091_v35 = vmul.f32 %v3639_v34, %v1085_v32 }
 0x735   :  { %v3641_v39 = vpop.eup %3640 }
 0x736   :  { %v1104_v40 = vmul.f32 %v1097_v33, %v1091_v35  ;;  %v1092_v41 = vmul.f32 %v3641_v39, %v1086_v37  ;;  %1432 = vmatpush1.bf16.msra.mxu0 %v3503_v63  ;;  %v1295_v35 = vld [vmem:[#allocation28 + $0x15] ss:$0 sm:$0xff]  ;;  %v1296_v37 = vld [vmem:[#allocation28 + $0x16] ss:$0 sm:$0xff]  ;;  %v3533_v63 = vld [vmem:[#allocation16 + $0x8] sm:$0xff]  }
 0x737   :  { %1433 = vmatprep.subr.bf16.mxu0 %v3508_v1  ;;  %v3534_v1 = vld [vmem:[#allocation16 + $0x40] sm:$0xff]  }
 0x738   :  { %v1117_v43 = vadd.f32 %v1110_v36, %v1104_v40  ;;  %v1105_v44 = vmul.f32 %v1101_v38, %v1092_v41 }
 0x73a   :  { %v1121_v46 = vmul.f32 0.01, %v1117_v43  ;;  %v1118_v47 = vadd.f32 %v1114_v42, %v1105_v44  ;;  %vm1119_vm10 = vcmp.gt.f32.partialorder %v1117_v43, 0.0  ;;  %1434 = vmatpush1.bf16.msra.mxu0 %v3506_v2  ;;  %v3512_v42 = vld [vmem:[#allocation17 + $0x38] sm:$0xff]   ;;  %v3513_v44 = vld [vmem:[#allocation17 + $0x30] sm:$0xff]   ;;  %v3535_v2 = vld [vmem:[#allocation16] sm:$0xff]  }
 0x73b   :  { %1435 = vmatprep.subr.bf16.mxu0 %v3511_v3 }
 0x73c   :  { %vm1120_vm11 = vcmp.gt.f32.partialorder %v1118_v47, 0.0  ;;  %v1122_v45 = vmul.f32 0.01, %v1118_v47  ;;  %v1123_v49 = vsel %vm1119_vm10, %v1117_v43, %v1121_v46  ;;  %v3514_v46 = vld [vmem:[#allocation17 + $0x28] sm:$0xff]  }
 0x73d   :  { %v1157_v52 = vpack.c.bf16 %v1123_v49, %v1123_v49  ;;  %v3517_v49 = vld [vmem:[#allocation17 + $0x10] sm:$0xff]  }
 0x73e   :  { %v1124_v50 = vsel %vm1120_vm11, %v1118_v47, %v1122_v45  ;;  %1436 = vmatpush1.bf16.msra.mxu0 %v3509_v4  ;;  %v3515_v47 = vld [vmem:[#allocation17 + $0x20] sm:$0xff]   ;;  %v3516_v45 = vld [vmem:[#allocation17 + $0x18] sm:$0xff]  }
 0x73f   :  { %v1158_v51 = vpack.c.bf16 %v1124_v50, %v1124_v50  ;;  %3345 = vmatprep.subr.bf16.mxu0 %v4067_v0  ;;  %v3518_v50 = vld [vmem:[#allocation17 + $0x8] sm:$0xff]  }
 0x741   :  { %1287 = vmatprep.mubr.bf16.mxu1 %v1158_v51  ;;  %v3519_v51 = vld [vmem:[#allocation17] sm:$0xff]  }
 0x742   :  { %1288 = vmatmul.mubr.bf16.vlgmr.msra.gmra.mxu1 %v1157_v52  ;;  %v3520_v52 = vld [vmem:[#allocation16 + $0x78] sm:$0xff]  }
 0x743   :  { %3190 = vmatprep.subr.bf16.mxu1 %v3520_v52 }
 0x744   :  { %3191 = vmatpush3.bf16.msra.mxu1 %v3521_v48 }
 0x745   :  { %3192 = vmatprep.subr.bf16.mxu1 %v3522_v53  ;;  %v1465_v53 = vld [vmem:[#allocation28 + $0x20] ss:$8 sm:$0x3] }
 0x748   :  { %3193 = vmatpush3.bf16.msra.mxu1 %v3523_v54 }
 0x749   :  { %3194 = vmatprep.subr.bf16.mxu1 %v3524_v55 }
 0x74c   :  { %3195 = vmatpush3.bf16.msra.mxu1 %v3525_v56 }
 0x74d   :  { %3196 = vmatprep.subr.bf16.mxu1 %v3526_v57 }
 0x750   :  { %3197 = vmatpush3.bf16.msra.mxu1 %v3527_v58 }
 0x802   :  { %v3184_v5 = vpop.f32.mrf.mxu1 }
 0x804   :  { %v3185_v6 = vpop.f32.mrf.mxu1 }
 0x805   :  { %v3186_v7 = vadd.f32 %v3185_v6, %v3184_v5 }
 0x806   :  { %v3187_v8 = vpop.f32.mrf.mxu1 }
 0x807   :  { %v1297_v9 = vrot.slane %v3186_v7, 4  ;;  %v1304_v10 = vmul.f32 %v3186_v7, %v3186_v7 }
 0x808   :  { %v3188_v11 = vpop.f32.mrf.mxu1 }
 0x809   :  { %v1298_v12 = vadd.f32 %v3186_v7, %v1297_v9  ;;  %v1305_v13 = vrot.slane %v1304_v10, 4 }
 0x80b   :  { %v1299_v14 = vrot.slane %v1298_v12, 2  ;;  %v1306_v15 = vadd.f32 %v1305_v13, %v1304_v10 }
 0x80d   :  { %v1300_v16 = vadd.f32 %v1299_v14, %v1298_v12  ;;  %v1307_v17 = vrot.slane %v1306_v15, 2 }
 0x80f   :  { %v1301_v18 = vrot.slane %v1300_v16, 1  ;;  %v1308_v19 = vadd.f32 %v1307_v17, %v1306_v15 }
 0x811   :  { %v1302_v20 = vadd.f32 %v1301_v18, %v1300_v16  ;;  %v1309_v22 = vrot.slane %v1308_v19, 1 }
 0x813   :  { %v1303_v23 = vmul.f32 0.125, %v1302_v20  ;;  %v1310_v24 = vadd.f32 %v1309_v22, %v1308_v19 }
 0x815   :  { %v1311_v25 = vmul.f32 0.125, %v1310_v24  ;;  %v1312_v27 = vmul.f32 %v1303_v23, %v1303_v23  ;;  %v1315_v33 = vsub.f32 %v3186_v7, %v1303_v23 }
 0x817   :  { %v1313_v29 = vsub.f32 %v1311_v25, %v1312_v27 }
 0x819   :  { %v1314_v30 = vmax.f32 %v1313_v29, 0.0 }
 0x81b   :  { %v1316_v32 = vadd.f32 1e-05, %v1314_v30 }
 0x81d   :  { %3642 = vrsqrt.f32 %v1316_v32 }
 0x82a   :  { %v3643_v34 = vpop.eup %3642 }
 0x82b   :  { %v1318_v36 = vmul.f32 %v3643_v34, %v1315_v33 }
 0x82d   :  { %v1319_v38 = vmul.f32 %v1318_v36, %v1295_v35 }
 0x82f   :  { %v1320_v39 = vadd.f32 %v1319_v38, %v1296_v37 }
 0x831   :  { %vm1321_vm12 = vcmp.gt.f32.partialorder %v1320_v39, 0.0  ;;  %v1322_v40 = vmul.f32 0.01, %v1320_v39 }
 0x833   :  { %v1323_v41 = vsel %vm1321_vm12, %v1320_v39, %v1322_v40 }
 0x834   :  { %v1340_v43 = vpack.c.bf16 %v1323_v41, %v1323_v41 }
 0x836   :  { %1454 = vmatmul.mubr.bf16.vlgmr.msra.gmra.mxu0 %v1340_v43 }
 0x837   :  { %3346 = vmatpush3.bf16.msra.mxu0 %v3512_v42  ;;  %3361 = vmatprep.mubr.msk.bf16.mxu0 %vm4068_vm0, %v4067_v0 }
 0x838   :  { %3347 = vmatprep.subr.bf16.mxu0 %v4067_v0 }
 0x83b   :  { %3348 = vmatpush3.bf16.msra.mxu0 %v3513_v44 }
 0x83c   :  { %3349 = vmatprep.subr.bf16.mxu0 %v4067_v0 }
 0x83f   :  { %3350 = vmatpush3.bf16.msra.mxu0 %v3514_v46 }
 0x840   :  { %3351 = vmatprep.subr.bf16.mxu0 %v4067_v0 }
 0x843   :  { %3352 = vmatpush3.bf16.msra.mxu0 %v3515_v47 }
 0x844   :  { %3353 = vmatprep.subr.bf16.mxu0 %v4067_v0 }
 0x847   :  { %3354 = vmatpush3.bf16.msra.mxu0 %v3516_v45 }
 0x848   :  { %3355 = vmatprep.subr.bf16.mxu0 %v4067_v0 }
 0x84b   :  { %3356 = vmatpush3.bf16.msra.mxu0 %v3517_v49 }
 0x84c   :  { %3357 = vmatprep.subr.bf16.mxu0 %v4067_v0 }
 0x84f   :  { %3358 = vmatpush3.bf16.msra.mxu0 %v3518_v50  ;;  %v1463_v50 = vld [vmem:[#allocation28 + $0x17] ss:$8 sm:$0x3] }
 0x850   :  { %3359 = vmatprep.subr.bf16.mxu0 %v4067_v0  ;;  %v1514_v56 = vrot.slane %v1463_v50, %v4349_v28 }
 0x853   :  { %3360 = vmatpush3.bf16.msra.mxu0 %v3519_v51 }
 0x854   :  { %3385 = vmatprep.subr.bf16.mxu0 %v4067_v0 }
 0x856   :  { %3362 = vmatmul.mubr.bf16.vlgmr.msra.gmra.mxu0 %v4345_v26  ;;  %v3528_v26 = vld [vmem:[#allocation16 + $0x58] sm:$0xff]  }
 0x857   :  { %3389 = vmatprep.mubr.msk.bf16.mxu0 %vm4068_vm0, %v4067_v0  ;;  %3198 = vmatprep.subr.bf16.mxu1 %v3528_v26 }
 0x858   :  { %3199 = vmatpush3.bf16.msra.mxu1 %v3529_v59 }
 0x859   :  { %3200 = vmatprep.subr.bf16.mxu1 %v3530_v60 }
 0x85c   :  { %3201 = vmatpush3.bf16.msra.mxu1 %v3531_v61  ;;  %v1527_v61 = vrot.slane %v1465_v53, %v4349_v28 }
 0x85d   :  { %3202 = vmatprep.subr.bf16.mxu1 %v3532_v62 }
 0x860   :  { %3203 = vmatpush3.bf16.msra.mxu1 %v3533_v63 }
 0x861   :  { %3204 = vmatprep.subr.bf16.mxu1 %v3534_v1 }
 0x864   :  { %3205 = vmatpush3.bf16.msra.mxu1 %v3535_v2  ;;  %v1518_v2 = vrot.slane %v1463_v50, %v4351_v31  ;;  %v3543_v50 = vld [vmem:[%s4459_s12] sm:$0xff]  }
 0x865   :  { %3365 = vmatprep.subr.bf16.mxu1 %v4067_v0 }
 0x8f6   :  { %v1455_v3 = vpop.f32.mrf.mxu0 }
 0x8f7   :  { %v1466_v4 = vrot.slane %v1455_v3, 4  ;;  %v1480_v5 = vmul.f32 %v1455_v3, %v1455_v3 }
 0x8f8   :  { %v4372_v6 = vpop.f32.mrf.mxu0 }
 0x8f9   :  { %v1467_v7 = vadd.f32 %v1466_v4, %v1455_v3  ;;  %v1482_v8 = vrot.slane %v1480_v5, 4  ;;  %v1472_v9 = vrot.slane %v4372_v6, 4  ;;  %v1481_v10 = vmul.f32 %v4372_v6, %v4372_v6 }
 0x8fa   :  { %v1459_v11 = vpop.f32.mrf.mxu0 }
 0x8fb   :  { %v1468_v12 = vrot.slane %v1467_v7, 2  ;;  %v1483_v13 = vadd.f32 %v1482_v8, %v1480_v5  ;;  %v1473_v14 = vadd.f32 %v1472_v9, %v4372_v6  ;;  %v1488_v15 = vrot.slane %v1481_v10, 4 }
 0x8fc   :  { %v1460_v16 = vpop.f32.mrf.mxu0 }
 0x8fd   :  { %v1469_v17 = vadd.f32 %v1468_v12, %v1467_v7  ;;  %v1484_v18 = vrot.slane %v1483_v13, 2  ;;  %v1474_v19 = vrot.slane %v1473_v14, 2  ;;  %v1489_v20 = vadd.f32 %v1488_v15, %v1481_v10 }
 0x8fe   :  { %v1531_v10 = vrot.slane %v1465_v53, %v4351_v31  ;;  %v3545_v53 = vld [vmem:[#allocation19] sm:$0xff]  }
 0x8ff   :  { %v1470_v22 = vrot.slane %v1469_v17, 1  ;;  %v1485_v23 = vadd.f32 %v1484_v18, %v1483_v13  ;;  %v1475_v24 = vadd.f32 %v1474_v19, %v1473_v14  ;;  %v1490_v25 = vrot.slane %v1489_v20, 2 }
 0x901   :  { %v1471_v27 = vadd.f32 %v1470_v22, %v1469_v17  ;;  %v1486_v29 = vrot.slane %v1485_v23, 1  ;;  %v1476_v30 = vrot.slane %v1475_v24, 1  ;;  %v1491_v32 = vadd.f32 %v1490_v25, %v1489_v20 }
 0x903   :  { %v1478_v33 = vmul.f32 0.125, %v1471_v27  ;;  %v1487_v34 = vadd.f32 %v1486_v29, %v1485_v23  ;;  %v1477_v35 = vadd.f32 %v1476_v30, %v1475_v24  ;;  %v1492_v36 = vrot.slane %v1491_v32, 1  ;;  %v3536_v30 = vld [vmem:[%s4459_s12 + $0x38] sm:$0xff]  }
 0x905   :  { %v1494_v37 = vmul.f32 0.125, %v1487_v34  ;;  %v1496_v38 = vmul.f32 %v1478_v33, %v1478_v33  ;;  %v1479_v39 = vmul.f32 0.125, %v1477_v35  ;;  %v1493_v40 = vadd.f32 %v1492_v36, %v1491_v32  ;;  %v3537_v35 = vld [vmem:[%s4459_s12 + $0x30] sm:$0xff]   ;;  %v3538_v36 = vld [vmem:[%s4459_s12 + $0x28] sm:$0xff]  }
 0x906   :  { %v1502_v55 = vsub.f32 %v1455_v3, %v1478_v33 }
 0x907   :  { %v1498_v41 = vsub.f32 %v1494_v37, %v1496_v38  ;;  %v1497_v42 = vmul.f32 %v1479_v39, %v1479_v39  ;;  %v1495_v43 = vmul.f32 0.125, %v1493_v40  ;;  %v1503_v1 = vsub.f32 %v4372_v6, %v1479_v39  ;;  %v3539_v37 = vld [vmem:[%s4459_s12 + $0x20] sm:$0xff]   ;;  %v3540_v38 = vld [vmem:[%s4459_s12 + $0x18] sm:$0xff]  }
 0x909   :  { %v1500_v44 = vmax.f32 %v1498_v41, 0.0  ;;  %v1499_v46 = vsub.f32 %v1495_v43, %v1497_v42  ;;  %v1818_v41 = vld [vmem:[#allocation28 + $0x22] ss:$0 sm:$0xff]  ;;  %v3541_v43 = vld [vmem:[%s4459_s12 + $0x10] sm:$0xff]  }
 0x90b   :  { %v1504_v47 = vadd.f32 1e-05, %v1500_v44  ;;  %v1501_v45 = vmax.f32 %v1499_v46, 0.0  ;;  %v1819_v44 = vld [vmem:[#allocation28 + $0x23] ss:$0 sm:$0xff] }
 0x90d   :  { %3644 = vrsqrt.f32 %v1504_v47  ;;  %v1505_v49 = vadd.f32 1e-05, %v1501_v45  ;;  %v3542_v45 = vld [vmem:[%s4459_s12 + $0x8] sm:$0xff]   ;;  %s4070_s12 = smov [#allocation29]  }
 0x90e   :  { %s2948_s18 = sshll.u32 %s4070_s12, 4  ;;  %s2949_s18 = int_to_ptr.vmem [resolvable:$true] %s2948_s18 }
 0x90f   :  { %3646 = vrsqrt.f32 %v1505_v49  ;;  %s4004_s8 = scalar_lea.vmem %s2949_s18, 256  ;;  %p4009_p2 = scmp.lt.s32.totalorder %s2949_s18, %s2949_s18 }
 0x910   :  { %p4005_p1 = scmp.ne.s32.totalorder %s2949_s18, %s4004_s8  ;;  %p4010_p3 = scmp.lt.s32.totalorder %s4004_s8, %s4004_s8 }
 0x912   :  { %p4011_p4 = por %p4010_p3, %p4009_p2 }
 0x914   :  { %p4012_p5 = pnand %p4011_p4, %p4005_p1 }
 0x916   :  { %v4378_v51 = vpop.f32.mrf.mxu0 }
 0x917   :  { %v1820_v52 = vrot.slane %v4378_v51, 4  ;;  %v1827_v48 = vmul.f32 %v4378_v51, %v4378_v51 }
 0x918   :  { %v3363_v54 = vpop.f32.mrf.mxu0 }
 0x919   :  { %v1821_v57 = vadd.f32 %v1820_v52, %v4378_v51  ;;  %v1828_v58 = vrot.slane %v1827_v48, 4 }
 0x91a   :  { %v3645_v26 = vpop.eup %3644  ;;  %v1815_v59 = vpop.f32.mrf.mxu0 }
 0x91b   :  { %v1508_v60 = vmul.f32 %v3645_v26, %v1502_v55  ;;  %v1822_v62 = vrot.slane %v1821_v57, 2  ;;  %v1829_v63 = vadd.f32 %v1828_v58, %v1827_v48  ;;  %v3544_v48 = vld [vmem:[#allocation19 + $0x8] sm:$0xff]   ;;  %v1574_v55 = vld [vmem:[#allocation28 + $0x21] ss:$0 sm:$0xff] }
 0x91c   :  { %v3364_v4 = vpop.f32.mrf.mxu0  ;;  %v3647_v5 = vpop.eup %3646  ;;  %3386 = vmatpush3.bf16.msra.mxu0 %v3544_v48 }
 0x91d   :  { %v1521_v7 = vmul.f32 %v1514_v56, %v1508_v60  ;;  %v1823_v3 = vadd.f32 %v1822_v62, %v1821_v57  ;;  %v1830_v8 = vrot.slane %v1829_v63, 2  ;;  %v1509_v9 = vmul.f32 %v3647_v5, %v1503_v1  ;;  %3387 = vmatprep.subr.bf16.mxu0 %v4067_v0 }
 0x91f   :  { %v1534_v11 = vadd.f32 %v1527_v61, %v1521_v7  ;;  %v1824_v12 = vrot.slane %v1823_v3, 1  ;;  %v1831_v13 = vadd.f32 %v1830_v8, %v1829_v63  ;;  %v1522_v14 = vmul.f32 %v1518_v2, %v1509_v9 }
 0x920   :  { %3388 = vmatpush3.bf16.msra.mxu0 %v3545_v53 }
 0x921   :  { %v1825_v15 = vadd.f32 %v1824_v12, %v1823_v3  ;;  %v1832_v16 = vrot.slane %v1831_v13, 1  ;;  %v1538_v17 = vmul.f32 0.01, %v1534_v11  ;;  %v1535_v18 = vadd.f32 %v1531_v10, %v1522_v14  ;;  %3393 = vmatprep.subr.bf16.mxu0 %v4067_v0 }
 0x922   :  { %vm1536_vm13 = vcmp.gt.f32.partialorder %v1534_v11, 0.0 }
 0x923   :  { %v1826_v6 = vmul.f32 0.125, %v1825_v15  ;;  %v1833_v19 = vadd.f32 %v1832_v16, %v1831_v13  ;;  %vm1537_vm14 = vcmp.gt.f32.partialorder %v1535_v18, 0.0  ;;  %v1539_v20 = vmul.f32 0.01, %v1535_v18 }
 0x924   :  { %v1540_v24 = vsel %vm1536_vm13, %v1534_v11, %v1538_v17 }
 0x925   :  { %v1834_v22 = vmul.f32 0.125, %v1833_v19  ;;  %v1835_v23 = vmul.f32 %v1826_v6, %v1826_v6  ;;  %v1541_v25 = vsel %vm1537_vm14, %v1535_v18, %v1539_v20  ;;  %v1575_v32 = vpack.c.bf16 %v1540_v24, %v1540_v24 }
 0x926   :  { %v1576_v29 = vpack.c.bf16 %v1541_v25, %v1541_v25  ;;  %v1838_v39 = vsub.f32 %v4378_v51, %v1826_v6  ;;  %v1952_v25 = vld [vmem:[#allocation28 + $0x24] ss:$0 sm:$0xff] }
 0x927   :  { %v1836_v27 = vsub.f32 %v1834_v22, %v1835_v23 }
 0x928   :  { %1705 = vmatprep.mubr.bf16.mxu1 %v1576_v29  ;;  %v1953_v29 = vld [vmem:[#allocation28 + $0x25] ss:$0 sm:$0xff] }
 0x929   :  { %v1837_v33 = vmax.f32 %v1836_v27, 0.0  ;;  %1706 = vmatmul.mubr.bf16.vlgmr.msra.gmra.mxu1 %v1575_v32 }
 0x92a   :  { %3366 = vmatpush3.bf16.msra.mxu1 %v3536_v30  ;;  %3381 = vmatprep.mubr.msk.bf16.mxu1 %vm4068_vm0, %v4067_v0 }
 0x92b   :  { %v1839_v34 = vadd.f32 1e-05, %v1837_v33  ;;  %3367 = vmatprep.subr.bf16.mxu1 %v4067_v0 }
 0x92d   :  { %3648 = vrsqrt.f32 %v1839_v34 }
 0x92e   :  { %3368 = vmatpush3.bf16.msra.mxu1 %v3537_v35 }
 0x92f   :  { %3369 = vmatprep.subr.bf16.mxu1 %v4067_v0 }
 0x932   :  { %3370 = vmatpush3.bf16.msra.mxu1 %v3538_v36  ;;  %v3546_v36 = vld [vmem:[#allocation20 + $0x8] sm:$0xff]  }
 0x933   :  { %3371 = vmatprep.subr.bf16.mxu1 %v4067_v0 }
 0x936   :  { %3372 = vmatpush3.bf16.msra.mxu1 %v3539_v37  ;;  %v3547_v37 = vld [vmem:[#allocation20] sm:$0xff]  }
 0x937   :  { %3373 = vmatprep.subr.bf16.mxu1 %v4067_v0 }
 0x93a   :  { %v3649_v40 = vpop.eup %3648  ;;  %3374 = vmatpush3.bf16.msra.mxu1 %v3540_v38  ;;  %v3550_v38 = vld [vmem:[#allocation22 + $0x74] ss:$8 sps:$4 sm:$0xff]  }
 0x93b   :  { %v1841_v42 = vmul.f32 %v3649_v40, %v1838_v39  ;;  %3375 = vmatprep.subr.bf16.mxu1 %v4067_v0 }
 0x93d   :  { %v1842_v46 = vmul.f32 %v1841_v42, %v1818_v41 }
 0x93e   :  { %3376 = vmatpush3.bf16.msra.mxu1 %v3541_v43 }
 0x93f   :  { %v1843_v47 = vadd.f32 %v1842_v46, %v1819_v44  ;;  %3377 = vmatprep.subr.bf16.mxu1 %v4067_v0 }
 0x941   :  { %v1845_v49 = vmul.f32 0.01, %v1843_v47  ;;  %vm1844_vm15 = vcmp.gt.f32.partialorder %v1843_v47, 0.0 }
 0x942   :  { %3378 = vmatpush3.bf16.msra.mxu1 %v3542_v45 }
 0x943   :  { %3379 = vmatprep.subr.bf16.mxu1 %v4067_v0  ;;  %v1846_v51 = vsel %vm1844_vm15, %v1843_v47, %v1845_v49 }
 0x944   :  { %v1863_v52 = vpack.c.bf16 %v1846_v51, %v1846_v51 }
 0x946   :  { %3380 = vmatpush3.bf16.msra.mxu1 %v3543_v50 }
 0x949   :  { %3382 = vmatmul.mubr.bf16.vlgmr.msra.gmra.mxu1 %v1863_v52 }
 0x9e9   :  { %v3206_v54 = vpop.f32.mrf.mxu1 }
 0x9eb   :  { %v3207_v56 = vpop.f32.mrf.mxu1 }
 0x9ec   :  { %v3208_v57 = vadd.f32 %v3207_v56, %v3206_v54 }
 0x9ed   :  { %v3209_v58 = vpop.f32.mrf.mxu1 }
 0x9ee   :  { %v1708_v26 = vadd.f32 %v3208_v57, %v1574_v55 }
 0x9ef   :  { %v3210_v59 = vpop.f32.mrf.mxu1 }
 0x9f0   :  { %1713 = vst [vmem:[#allocation29] sm:$0xff] %v1708_v26 }
 0xa09   :  { %v1946_v60 = vpop.f32.mrf.mxu1 }
 0xa0a   :  { %v1954_v61 = vsel %vm375_vm3, %v1946_v60, 0.0  ;;  %v1962_v62 = vmul.f32 %v1946_v60, %v1946_v60 }
 0xa0b   :  { %v1955_v63 = vrot.slane %v1954_v61, 4  ;;  %v3383_v1 = vpop.f32.mrf.mxu1 }
 0xa0c   :  { %v1963_v2 = vsel %vm375_vm3, %v1962_v62, 0.0  ;;  %v2043_v1 = vld [vmem:[#allocation28 + $0x26] ss:$0 sm:$0xff] }
 0xa0d   :  { %v1956_v4 = vadd.f32 %v1955_v63, %v1954_v61  ;;  %v1964_v5 = vrot.slane %v1963_v2, 4  ;;  %v1949_v7 = vpop.f32.mrf.mxu1 }
 0xa0f   :  { %v1957_v3 = vrot.slane %v1956_v4, 2  ;;  %v1965_v8 = vadd.f32 %v1964_v5, %v1963_v2  ;;  %v3384_v9 = vpop.f32.mrf.mxu1 }
 0xa10   :  { %v3548_v9 = vld [vmem:[#allocation22 + $0x70] ss:$8 sps:$4 sm:$0xff]  }
 0xa11   :  { %v1958_v10 = vadd.f32 %v1957_v3, %v1956_v4  ;;  %v1966_v11 = vrot.slane %v1965_v8, 2  ;;  %v2044_v4 = vld [vmem:[#allocation28 + $0x27] ss:$0 sm:$0xff] }
 0xa13   :  { %v1959_v12 = vrot.slane %v1958_v10, 1  ;;  %v1967_v13 = vadd.f32 %v1966_v11, %v1965_v8  ;;  %v3553_v11 = vld [vmem:[#allocation22 + $0x64] ss:$8 sps:$4 sm:$0xff]  }
 0xa15   :  { %v1960_v14 = vadd.f32 %v1959_v12, %v1958_v10  ;;  %v1968_v15 = vrot.slane %v1967_v13, 1  ;;  %v3551_v12 = vld [vmem:[#allocation22 + $0x60] ss:$8 sps:$4 sm:$0xff]  }
 0xa17   :  { %v1961_v16 = vmul.f32 0.125, %v1960_v14  ;;  %v1969_v17 = vadd.f32 %v1968_v15, %v1967_v13  ;;  %v3556_v13 = vld [vmem:[#allocation22 + $0x54] ss:$8 sps:$4 sm:$0xff]   ;;  %v3554_v14 = vld [vmem:[#allocation22 + $0x50] ss:$8 sps:$4 sm:$0xff]  }
 0xa18   :  { %v3559_v15 = vld [vmem:[#allocation22 + $0x44] ss:$8 sps:$4 sm:$0xff]  }
 0xa19   :  { %v1970_v18 = vmul.f32 0.125, %v1969_v17  ;;  %v1971_v6 = vmul.f32 %v1961_v16, %v1961_v16  ;;  %v1974_v23 = vsub.f32 %v1946_v60, %v1961_v16  ;;  %v3557_v16 = vld [vmem:[#allocation22 + $0x40] ss:$8 sps:$4 sm:$0xff]   ;;  %v3562_v17 = vld [vmem:[#allocation22 + $0x34] ss:$8 sps:$4 sm:$0xff]  }
 0xa1b   :  { %v1972_v19 = vsub.f32 %v1970_v18, %v1971_v6  ;;  %v3560_v18 = vld [vmem:[#allocation22 + $0x30] ss:$8 sps:$4 sm:$0xff]   ;;  %v3565_v6 = vld [vmem:[#allocation22 + $0x24] ss:$8 sps:$4 sm:$0xff]  }
 0xa1d   :  { %v1973_v20 = vmax.f32 %v1972_v19, 0.0  ;;  %v3563_v19 = vld [vmem:[#allocation22 + $0x20] ss:$8 sps:$4 sm:$0xff]  }
 0xa1f   :  { %v1975_v22 = vadd.f32 1e-05, %v1973_v20  ;;  %v3568_v20 = vld [vmem:[#allocation22 + $0x14] ss:$8 sps:$4 sm:$0xff]  }
 0xa21   :  { %3650 = vrsqrt.f32 %v1975_v22  ;;  %v3566_v22 = vld [vmem:[#allocation22 + $0x10] ss:$8 sps:$4 sm:$0xff]  }
 0xa2e   :  { %v3651_v24 = vpop.eup %3650 }
 0xa2f   :  { %v1977_v27 = vmul.f32 %v3651_v24, %v1974_v23  ;;  %v3571_v23 = vld [vmem:[#allocation22 + $0x4] ss:$8 sps:$4 sm:$0xff]   ;;  %v3569_v24 = vld [vmem:[#allocation22] ss:$8 sps:$4 sm:$0xff]  }
 0xa31   :  { %v1978_v30 = vmul.f32 %v1977_v27, %v1952_v25  ;;  %v2078_v25 = vld [vmem:[#allocation28 + $0x30] ss:$0 sm:$0xff] }
 0xa33   :  { %v1979_v32 = vadd.f32 %v1978_v30, %v1953_v29 }
 0xa35   :  { %vm1980_vm1 = vcmp.gt.f32.partialorder %v1979_v32, 0.0  ;;  %v1981_v33 = vmul.f32 0.01, %v1979_v32 }
 0xa37   :  { %v1982_v34 = vsel %vm1980_vm1, %v1979_v32, %v1981_v33 }
 0xa38   :  { %v1987_v35 = vpack.c.bf16 %v1982_v34, %v1982_v34 }
 0xa3a   :  { %3390 = vmatmul.mubr.msk.bf16.vlgmr.msra.gmra.mxu0 %vm375_vm3, %v1987_v35  ;;  %v3572_v35 = vld [vmem:[#allocation23 + $0x78] sm:$0xff]  }
 0xa3b   :  { %3397 = vmatprep.mubr.msk.bf16.mxu0 %vm4068_vm0, %v4067_v0  ;;  %3394 = vmatpush3.bf16.msra.mxu0 %v3546_v36  ;;  %v3573_v36 = vld [vmem:[#allocation23 + $0x38] sm:$0xff]  }
 0xa3c   :  { %3395 = vmatprep.subr.bf16.mxu0 %v4067_v0  ;;  %3236 = vmatprep.subr.bf16.mxu1 %v3572_v35 }
 0xa3d   :  { %3237 = vmatpush3.bf16.msra.mxu1 %v3573_v36 }
 0xa3f   :  { %3396 = vmatpush3.bf16.msra.mxu0 %v3547_v37  ;;  %v3574_v37 = vld [vmem:[#allocation23 + $0x70] sm:$0xff]  }
 0xa40   :  { %2232 = vmatprep.subr.bf16.mxu0 %v3550_v38  ;;  %v3575_v38 = vld [vmem:[#allocation23 + $0x30] sm:$0xff]   ;;  %3238 = vmatprep.subr.bf16.mxu1 %v3574_v37 }
 0xa41   :  { %3239 = vmatpush3.bf16.msra.mxu1 %v3575_v38 }
 0xafa   :  { %v2037_v39 = vpop.f32.mrf.mxu0 }
 0xafb   :  { %v2045_v40 = vsel %vm375_vm3, %v2037_v39, 0.0  ;;  %v2053_v41 = vmul.f32 %v2037_v39, %v2037_v39 }
 0xafc   :  { %v2046_v42 = vrot.slane %v2045_v40, 4  ;;  %v3391_v43 = vpop.f32.mrf.mxu0 }
 0xafd   :  { %v2054_v44 = vsel %vm375_vm3, %v2053_v41, 0.0  ;;  %v3578_v41 = vld [vmem:[#allocation23 + $0x60] sm:$0xff]   ;;  %v3580_v43 = vld [vmem:[#allocation23 + $0x58] sm:$0xff]  }
 0xafe   :  { %v2047_v46 = vadd.f32 %v2046_v42, %v2045_v40  ;;  %v2055_v47 = vrot.slane %v2054_v44, 4  ;;  %v2040_v45 = vpop.f32.mrf.mxu0  ;;  %v3577_v40 = vld [vmem:[#allocation23 + $0x28] sm:$0xff]   ;;  %v3579_v42 = vld [vmem:[#allocation23 + $0x20] sm:$0xff]  }
 0xaff   :  { %v3585_v45 = vld [vmem:[#allocation23 + $0x8] sm:$0xff]  }
 0xb00   :  { %v2048_v49 = vrot.slane %v2047_v46, 2  ;;  %v2056_v50 = vadd.f32 %v2055_v47, %v2054_v44  ;;  %v3392_v51 = vpop.f32.mrf.mxu0  ;;  %v3581_v44 = vld [vmem:[#allocation23 + $0x18] sm:$0xff]   ;;  %v3584_v47 = vld [vmem:[#allocation23 + $0x48] sm:$0xff]  }
 0xb02   :  { %v2049_v52 = vadd.f32 %v2048_v49, %v2047_v46  ;;  %v2057_v0 = vrot.slane %v2056_v50, 2  ;;  %v3583_v46 = vld [vmem:[#allocation23 + $0x10] sm:$0xff]   ;;  %v3586_v49 = vld [vmem:[#allocation23 + $0x40] sm:$0xff]  }
 0xb04   :  { %v2050_v48 = vrot.slane %v2049_v52, 1  ;;  %v2058_v53 = vadd.f32 %v2057_v0, %v2056_v50  ;;  %v3587_v50 = vld [vmem:[#allocation23] sm:$0xff]  }
 0xb06   :  { %v2051_v54 = vadd.f32 %v2050_v48, %v2049_v52  ;;  %v2059_v55 = vrot.slane %v2058_v53, 1 }
 0xb08   :  { %v2052_v56 = vmul.f32 0.125, %v2051_v54  ;;  %v2060_v57 = vadd.f32 %v2059_v55, %v2058_v53 }
 0xb0a   :  { %v2061_v58 = vmul.f32 0.125, %v2060_v57  ;;  %v2062_v26 = vmul.f32 %v2052_v56, %v2052_v56  ;;  %v2065_v62 = vsub.f32 %v2037_v39, %v2052_v56  ;;  %v3576_v39 = vld [vmem:[#allocation23 + $0x68] sm:$0xff]  }
 0xb0b   :  { %3240 = vmatprep.subr.bf16.mxu1 %v3576_v39 }
 0xb0c   :  { %v2063_v59 = vsub.f32 %v2061_v58, %v2062_v26  ;;  %3241 = vmatpush3.bf16.msra.mxu1 %v3577_v40 }
 0xb0d   :  { %3242 = vmatprep.subr.bf16.mxu1 %v3578_v41 }
 0xb0e   :  { %v2064_v60 = vmax.f32 %v2063_v59, 0.0 }
 0xb10   :  { %v2066_v61 = vadd.f32 1e-05, %v2064_v60  ;;  %3243 = vmatpush3.bf16.msra.mxu1 %v3579_v42 }
 0xb11   :  { %3244 = vmatprep.subr.bf16.mxu1 %v3580_v43 }
 0xb12   :  { %3652 = vrsqrt.f32 %v2066_v61 }
 0xb14   :  { %3245 = vmatpush3.bf16.msra.mxu1 %v3581_v44 }
 0xb1f   :  { %v3653_v63 = vpop.eup %3652 }
 0xb20   :  { %v2068_v2 = vmul.f32 %v3653_v63, %v2065_v62 }
 0xb22   :  { %v2069_v5 = vmul.f32 %v2068_v2, %v2043_v1 }
 0xb24   :  { %v2070_v7 = vadd.f32 %v2069_v5, %v2044_v4 }
 0xb26   :  { %vm2071_vm0 = vcmp.gt.f32.partialorder %v2070_v7, 0.0  ;;  %v2072_v3 = vmul.f32 0.01, %v2070_v7 }
 0xb28   :  { %v2073_v8 = vsel %vm2071_vm0, %v2070_v7, %v2072_v3 }
 0xb29   :  { %v2079_v10 = vpack.c.bf16 %v2073_v8, %v2073_v8 }
 0xb2b   :  { %3398 = vmatmul.mubr.msk.bf16.vlgmr.msra.gmra.mxu0 %vm375_vm3, %v2079_v10 }
 0xb2c   :  { %2233 = vmatpush1.bf16.msra.mxu0 %v3548_v9  ;;  %2264 = vmatprep.mubr.bf16.mxu0 %v4069_v21 }
 0xb2d   :  { %2234 = vmatprep.subr.bf16.mxu0 %v3553_v11 }
 0xb30   :  { %2235 = vmatpush1.bf16.msra.mxu0 %v3551_v12 }
 0xb31   :  { %2236 = vmatprep.subr.bf16.mxu0 %v3556_v13 }
 0xb34   :  { %2237 = vmatpush1.bf16.msra.mxu0 %v3554_v14 }
 0xb35   :  { %2238 = vmatprep.subr.bf16.mxu0 %v3559_v15 }
 0xb38   :  { %2239 = vmatpush1.bf16.msra.mxu0 %v3557_v16 }
 0xb39   :  { %2240 = vmatprep.subr.bf16.mxu0 %v3562_v17 }
 0xb3c   :  { %2241 = vmatpush1.bf16.msra.mxu0 %v3560_v18 }
 0xb3d   :  { %2242 = vmatprep.subr.bf16.mxu0 %v3565_v6 }
 0xb40   :  { %2243 = vmatpush1.bf16.msra.mxu0 %v3563_v19 }
 0xb41   :  { %2244 = vmatprep.subr.bf16.mxu0 %v3568_v20 }
 0xb44   :  { %2245 = vmatpush1.bf16.msra.mxu0 %v3566_v22 }
 0xb45   :  { %2246 = vmatprep.subr.bf16.mxu0 %v3571_v23 }
 0xb48   :  { %2247 = vmatpush1.bf16.msra.mxu0 %v3569_v24 }
 0xbeb   :  { %v2129_v27 = vpop.f32.mrf.mxu0 }
 0xbec   :  { %v2130_v29 = vadd.f32 %v2129_v27, %v2078_v25 }
 0xbed   :  { %v3399_v30 = vpop.f32.mrf.mxu0 }
 0xbee   :  { %v2151_v32 = vpack.c.bf16 %v2130_v29, %v2130_v29  ;;  %v2274_v30 = vld [vmem:[#allocation28 + $0x31] ss:$8 sm:$0x3] }
 0xbef   :  { %v2132_v33 = vpop.f32.mrf.mxu0  ;;  %v2329_v39 = vrot.slane %v2274_v30, %v4351_v31 }
 0xbf0   :  { %2265 = vmatmul.mubr.bf16.vlgmr.msra.gmra.mxu0 %v2151_v32  ;;  %v2276_v32 = vld [vmem:[#allocation28 + $0x32] ss:$8 sm:$0x3] }
 0xbf1   :  { %v3400_v34 = vpop.f32.mrf.mxu0  ;;  %2681 = vmatprep.mubr.bf16.mxu0 %v4069_v21  ;;  %v3582_v21 = vld [vmem:[#allocation23 + $0x50] sm:$0xff]   ;;  %v2338_v37 = vrot.slane %v2276_v32, %v4349_v28  ;;  %v2342_v43 = vrot.slane %v2276_v32, %v4351_v31 }
 0xbf2   :  { %3246 = vmatprep.subr.bf16.mxu1 %v3582_v21  ;;  %v2325_v34 = vrot.slane %v2274_v30, %v4349_v28 }
 0xbf3   :  { %3247 = vmatpush3.bf16.msra.mxu1 %v3583_v46 }
 0xbf4   :  { %3248 = vmatprep.subr.bf16.mxu1 %v3584_v47 }
 0xbf7   :  { %3249 = vmatpush3.bf16.msra.mxu1 %v3585_v45 }
 0xbf8   :  { %3250 = vmatprep.subr.bf16.mxu1 %v3586_v49 }
 0xbfb   :  { %3251 = vmatpush3.bf16.msra.mxu1 %v3587_v50 }
 0xcb0   :  { %v2266_v51 = vpop.f32.mrf.mxu0 }
 0xcb1   :  { %v2277_v52 = vrot.slane %v2266_v51, 4  ;;  %v2291_v0 = vmul.f32 %v2266_v51, %v2266_v51 }
 0xcb2   :  { %v2268_v48 = vpop.f32.mrf.mxu0 }
 0xcb3   :  { %v2278_v53 = vadd.f32 %v2277_v52, %v2266_v51  ;;  %v2293_v54 = vrot.slane %v2291_v0, 4  ;;  %v2283_v55 = vrot.slane %v2268_v48, 4  ;;  %v2292_v56 = vmul.f32 %v2268_v48, %v2268_v48 }
 0xcb4   :  { %v2270_v57 = vpop.f32.mrf.mxu0 }
 0xcb5   :  { %v2279_v58 = vrot.slane %v2278_v53, 2  ;;  %v2294_v26 = vadd.f32 %v2293_v54, %v2291_v0  ;;  %v2284_v59 = vadd.f32 %v2283_v55, %v2268_v48  ;;  %v2299_v60 = vrot.slane %v2292_v56, 4  ;;  %v3590_v0 = vld [vmem:[#allocation25 + $0x74] ss:$8 sps:$4 sm:$0xff]   ;;  %v3591_v54 = vld [vmem:[#allocation25 + $0x60] ss:$8 sps:$4 sm:$0xff]  }
 0xcb6   :  { %v2271_v61 = vpop.f32.mrf.mxu0  ;;  %2649 = vmatprep.subr.bf16.mxu0 %v3590_v0  ;;  %v3596_v55 = vld [vmem:[#allocation25 + $0x54] ss:$8 sps:$4 sm:$0xff]   ;;  %v3599_v57 = vld [vmem:[#allocation25 + $0x44] ss:$8 sps:$4 sm:$0xff]  }
 0xcb7   :  { %v2280_v62 = vadd.f32 %v2279_v58, %v2278_v53  ;;  %v2295_v63 = vrot.slane %v2294_v26, 2  ;;  %v2285_v1 = vrot.slane %v2284_v59, 2  ;;  %v2300_v2 = vadd.f32 %v2299_v60, %v2292_v56  ;;  %v3593_v53 = vld [vmem:[#allocation25 + $0x64] ss:$8 sps:$4 sm:$0xff]   ;;  %v3594_v56 = vld [vmem:[#allocation25 + $0x50] ss:$8 sps:$4 sm:$0xff]  }
 0xcb8   :  { %v3597_v58 = vld [vmem:[#allocation25 + $0x40] ss:$8 sps:$4 sm:$0xff]   ;;  %v3605_v60 = vld [vmem:[#allocation25 + $0x24] ss:$8 sps:$4 sm:$0xff]  }
 0xcb9   :  { %v2281_v4 = vrot.slane %v2280_v62, 1  ;;  %v2296_v5 = vadd.f32 %v2295_v63, %v2294_v26  ;;  %v2286_v7 = vadd.f32 %v2285_v1, %v2284_v59  ;;  %v2301_v3 = vrot.slane %v2300_v2, 2  ;;  %v3602_v26 = vld [vmem:[#allocation25 + $0x34] ss:$8 sps:$4 sm:$0xff]   ;;  %v3600_v59 = vld [vmem:[#allocation25 + $0x30] ss:$8 sps:$4 sm:$0xff]  }
 0xcba   :  { %v3603_v61 = vld [vmem:[#allocation25 + $0x20] ss:$8 sps:$4 sm:$0xff]   ;;  %v3606_v63 = vld [vmem:[#allocation25 + $0x10] ss:$8 sps:$4 sm:$0xff]   ;;  %v3611_v1 = vld [vmem:[#allocation25 + $0x4] ss:$8 sps:$4 sm:$0xff]  }
 0xcbb   :  { %v2282_v8 = vadd.f32 %v2281_v4, %v2280_v62  ;;  %v2297_v9 = vrot.slane %v2296_v5, 1  ;;  %v2287_v10 = vrot.slane %v2286_v7, 1  ;;  %v2302_v11 = vadd.f32 %v2301_v3, %v2300_v2  ;;  %v3608_v62 = vld [vmem:[#allocation25 + $0x14] ss:$8 sps:$4 sm:$0xff]   ;;  %v3609_v2 = vld [vmem:[#allocation25] ss:$8 sps:$4 sm:$0xff]  }
 0xcbc   :  { %v3624_v0 = vld [vmem:[#allocation26 + $0x48] sm:$0xff]  }
 0xcbd   :  { %v2289_v12 = vmul.f32 0.125, %v2282_v8  ;;  %v2298_v13 = vadd.f32 %v2297_v9, %v2296_v5  ;;  %v2288_v14 = vadd.f32 %v2287_v10, %v2286_v7  ;;  %v2303_v15 = vrot.slane %v2302_v11, 1 }
 0xcbf   :  { %v2305_v16 = vmul.f32 0.125, %v2298_v13  ;;  %v2307_v17 = vmul.f32 %v2289_v12, %v2289_v12  ;;  %v2290_v18 = vmul.f32 0.125, %v2288_v14  ;;  %v2304_v6 = vadd.f32 %v2303_v15, %v2302_v11 }
 0xcc0   :  { %v2313_v33 = vsub.f32 %v2266_v51, %v2289_v12 }
 0xcc1   :  { %v2309_v19 = vsub.f32 %v2305_v16, %v2307_v17  ;;  %v2308_v20 = vmul.f32 %v2290_v18, %v2290_v18  ;;  %v2306_v22 = vmul.f32 0.125, %v2304_v6  ;;  %v2314_v38 = vsub.f32 %v2268_v48, %v2290_v18  ;;  %v3588_v48 = vld [vmem:[#allocation25 + $0x70] ss:$8 sps:$4 sm:$0xff]  }
 0xcc2   :  { %2650 = vmatpush1.bf16.msra.mxu0 %v3588_v48  ;;  %v3625_v48 = vld [vmem:[#allocation26 + $0x8] sm:$0xff]  }
 0xcc3   :  { %v2311_v23 = vmax.f32 %v2309_v19, 0.0  ;;  %v2310_v24 = vsub.f32 %v2306_v22, %v2308_v20  ;;  %2651 = vmatprep.subr.bf16.mxu0 %v3593_v53  ;;  %v3626_v53 = vld [vmem:[#allocation26 + $0x40] sm:$0xff]  }
 0xcc5   :  { %v2315_v25 = vadd.f32 1e-05, %v2311_v23  ;;  %v2312_v27 = vmax.f32 %v2310_v24, 0.0 }
 0xcc6   :  { %2652 = vmatpush1.bf16.msra.mxu0 %v3591_v54  ;;  %v3627_v54 = vld [vmem:[#allocation26] sm:$0xff]  }
 0xcc7   :  { %3654 = vrsqrt.f32 %v2315_v25  ;;  %v2316_v29 = vadd.f32 1e-05, %v2312_v27  ;;  %2653 = vmatprep.subr.bf16.mxu0 %v3596_v55 }
 0xcc9   :  { %3656 = vrsqrt.f32 %v2316_v29 }
 0xcca   :  { %2654 = vmatpush1.bf16.msra.mxu0 %v3594_v56 }
 0xccb   :  { %2655 = vmatprep.subr.bf16.mxu0 %v3599_v57 }
 0xcce   :  { %2656 = vmatpush1.bf16.msra.mxu0 %v3597_v58 }
 0xccf   :  { %2657 = vmatprep.subr.bf16.mxu0 %v3602_v26 }
 0xcd2   :  { %2658 = vmatpush1.bf16.msra.mxu0 %v3600_v59 }
 0xcd3   :  { %2659 = vmatprep.subr.bf16.mxu0 %v3605_v60 }
 0xcd4   :  { %v3655_v35 = vpop.eup %3654 }
 0xcd5   :  { %v2319_v36 = vmul.f32 %v3655_v35, %v2313_v33  ;;  %v2523_v33 = vld [vmem:[#allocation28 + $0x33] ss:$0 sm:$0xff]  ;;  %v2524_v35 = vld [vmem:[#allocation28 + $0x34] ss:$0 sm:$0xff] }
 0xcd6   :  { %v3657_v40 = vpop.eup %3656  ;;  %2660 = vmatpush1.bf16.msra.mxu0 %v3603_v61 }
 0xcd7   :  { %v2332_v41 = vmul.f32 %v2325_v34, %v2319_v36  ;;  %v2320_v42 = vmul.f32 %v3657_v40, %v2314_v38  ;;  %2661 = vmatprep.subr.bf16.mxu0 %v3608_v62 }
 0xcd9   :  { %v2345_v44 = vadd.f32 %v2338_v37, %v2332_v41  ;;  %v2333_v21 = vmul.f32 %v2329_v39, %v2320_v42  ;;  %v3612_v41 = vld [vmem:[#allocation26 + $0x78] sm:$0xff]  }
 0xcda   :  { %2662 = vmatpush1.bf16.msra.mxu0 %v3606_v63  ;;  %v3613_v42 = vld [vmem:[#allocation26 + $0x38] sm:$0xff]   ;;  %3258 = vmatprep.subr.bf16.mxu1 %v3612_v41 }
 0xcdb   :  { %v2349_v46 = vmul.f32 0.01, %v2345_v44  ;;  %v2346_v47 = vadd.f32 %v2342_v43, %v2333_v21  ;;  %vm2347_vm2 = vcmp.gt.f32.partialorder %v2345_v44, 0.0  ;;  %2663 = vmatprep.subr.bf16.mxu0 %v3611_v1  ;;  %v3614_v43 = vld [vmem:[#allocation26 + $0x70] sm:$0xff]   ;;  %v3616_v21 = vld [vmem:[#allocation26 + $0x68] sm:$0xff]  }
 0xcdd   :  { %vm2348_vm3 = vcmp.gt.f32.partialorder %v2346_v47, 0.0  ;;  %v2350_v45 = vmul.f32 0.01, %v2346_v47  ;;  %v2351_v49 = vsel %vm2347_vm2, %v2345_v44, %v2349_v46  ;;  %v3615_v44 = vld [vmem:[#allocation26 + $0x30] sm:$0xff]   ;;  %v3617_v46 = vld [vmem:[#allocation26 + $0x28] sm:$0xff]  }
 0xcde   :  { %v2385_v52 = vpack.c.bf16 %v2351_v49, %v2351_v49  ;;  %2664 = vmatpush1.bf16.msra.mxu0 %v3609_v2  ;;  %v3620_v49 = vld [vmem:[#allocation26 + $0x58] sm:$0xff]  }
 0xcdf   :  { %v2352_v50 = vsel %vm2348_vm3, %v2346_v47, %v2350_v45  ;;  %v3618_v47 = vld [vmem:[#allocation26 + $0x60] sm:$0xff]  }
 0xce0   :  { %v2386_v51 = vpack.c.bf16 %v2352_v50, %v2352_v50  ;;  %v3619_v45 = vld [vmem:[#allocation26 + $0x20] sm:$0xff]   ;;  %v3621_v50 = vld [vmem:[#allocation26 + $0x18] sm:$0xff]  }
 0xce2   :  { %2515 = vmatprep.mubr.bf16.mxu1 %v2386_v51  ;;  %v3622_v51 = vld [vmem:[#allocation26 + $0x50] sm:$0xff]  }
 0xce3   :  { %2516 = vmatmul.mubr.bf16.vlgmr.msra.gmra.mxu1 %v2385_v52  ;;  %v3623_v52 = vld [vmem:[#allocation26 + $0x10] sm:$0xff]  }
 0xce4   :  { %3259 = vmatpush3.bf16.msra.mxu1 %v3613_v42 }
 0xce5   :  { %3260 = vmatprep.subr.bf16.mxu1 %v3614_v43 }
 0xce8   :  { %3261 = vmatpush3.bf16.msra.mxu1 %v3615_v44 }
 0xce9   :  { %3262 = vmatprep.subr.bf16.mxu1 %v3616_v21 }
 0xcec   :  { %3263 = vmatpush3.bf16.msra.mxu1 %v3617_v46 }
 0xced   :  { %3264 = vmatprep.subr.bf16.mxu1 %v3618_v47 }
 0xcf0   :  { %3265 = vmatpush3.bf16.msra.mxu1 %v3619_v45 }
 0xcf1   :  { %3266 = vmatprep.subr.bf16.mxu1 %v3620_v49 }
 0xcf4   :  { %3267 = vmatpush3.bf16.msra.mxu1 %v3621_v50 }
 0xcf5   :  { %3268 = vmatprep.subr.bf16.mxu1 %v3622_v51 }
 0xcf8   :  { %3269 = vmatpush3.bf16.msra.mxu1 %v3623_v52 }
 0xcf9   :  { %3270 = vmatprep.subr.bf16.mxu1 %v3624_v0 }
 0xcfc   :  { %3271 = vmatpush3.bf16.msra.mxu1 %v3625_v48 }
 0xcfd   :  { %3272 = vmatprep.subr.bf16.mxu1 %v3626_v53 }
 0xd00   :  { %3273 = vmatpush3.bf16.msra.mxu1 %v3627_v54 }
 0xda3   :  { %v3252_v4 = vpop.f32.mrf.mxu1 }
 0xda5   :  { %v3253_v5 = vpop.f32.mrf.mxu1 }
 0xda6   :  { %v3254_v7 = vadd.f32 %v3253_v5, %v3252_v4 }
 0xda7   :  { %v3255_v3 = vpop.f32.mrf.mxu1 }
 0xda8   :  { %v2525_v8 = vrot.slane %v3254_v7, 4  ;;  %v2532_v9 = vmul.f32 %v3254_v7, %v3254_v7 }
 0xda9   :  { %v3256_v10 = vpop.f32.mrf.mxu1 }
 0xdaa   :  { %v2526_v11 = vadd.f32 %v3254_v7, %v2525_v8  ;;  %v2533_v12 = vrot.slane %v2532_v9, 4 }
 0xdac   :  { %v2527_v13 = vrot.slane %v2526_v11, 2  ;;  %v2534_v14 = vadd.f32 %v2533_v12, %v2532_v9 }
 0xdae   :  { %v2528_v15 = vadd.f32 %v2527_v13, %v2526_v11  ;;  %v2535_v16 = vrot.slane %v2534_v14, 2 }
 0xdb0   :  { %v2529_v17 = vrot.slane %v2528_v15, 1  ;;  %v2536_v18 = vadd.f32 %v2535_v16, %v2534_v14 }
 0xdb2   :  { %v2530_v6 = vadd.f32 %v2529_v17, %v2528_v15  ;;  %v2537_v19 = vrot.slane %v2536_v18, 1 }
 0xdb4   :  { %v2531_v20 = vmul.f32 0.125, %v2530_v6  ;;  %v2538_v22 = vadd.f32 %v2537_v19, %v2536_v18 }
 0xdb6   :  { %v2539_v23 = vmul.f32 0.125, %v2538_v22  ;;  %v2540_v24 = vmul.f32 %v2531_v20, %v2531_v20  ;;  %v2543_v30 = vsub.f32 %v3254_v7, %v2531_v20 }
 0xdb8   :  { %v2541_v25 = vsub.f32 %v2539_v23, %v2540_v24 }
 0xdba   :  { %v2542_v27 = vmax.f32 %v2541_v25, 0.0 }
 0xdbc   :  { %v2544_v29 = vadd.f32 1e-05, %v2542_v27 }
 0xdbe   :  { %3658 = vrsqrt.f32 %v2544_v29 }
 0xdcb   :  { %v3659_v32 = vpop.eup %3658 }
 0xdcc   :  { %v2546_v34 = vmul.f32 %v3659_v32, %v2543_v30 }
 0xdce   :  { %v2547_v36 = vmul.f32 %v2546_v34, %v2523_v33 }
 0xdd0   :  { %v2548_v37 = vadd.f32 %v2547_v36, %v2524_v35 }
 0xdd2   :  { %vm2549_vm4 = vcmp.gt.f32.partialorder %v2548_v37, 0.0  ;;  %v2550_v38 = vmul.f32 0.01, %v2548_v37 }
 0xdd4   :  { %v2551_v39 = vsel %vm2549_vm4, %v2548_v37, %v2550_v38  ;;  %v2691_v37 = vld [vmem:[#allocation28 + $0x35] ss:$8 sm:$0x3]  ;;  %v2693_v38 = vld [vmem:[#allocation28 + $0x36] ss:$8 sm:$0x3] }
 0xdd5   :  { %v2568_v40 = vpack.c.bf16 %v2551_v39, %v2551_v39  ;;  %v2755_v43 = vrot.slane %v2693_v38, %v4349_v28  ;;  %v2746_v21 = vrot.slane %v2691_v37, %v4351_v31  ;;  %v2759_v49 = vrot.slane %v2693_v38, %v4351_v31 }
 0xdd7   :  { %2682 = vmatmul.mubr.bf16.vlgmr.msra.gmra.mxu0 %v2568_v40  ;;  %v2742_v40 = vrot.slane %v2691_v37, %v4349_v28 }
 0xe97   :  { %v2683_v55 = vpop.f32.mrf.mxu0 }
 0xe98   :  { %v2694_v56 = vrot.slane %v2683_v55, 4  ;;  %v2708_v57 = vmul.f32 %v2683_v55, %v2683_v55 }
 0xe99   :  { %v2685_v58 = vpop.f32.mrf.mxu0 }
 0xe9a   :  { %v2695_v26 = vadd.f32 %v2694_v56, %v2683_v55  ;;  %v2710_v59 = vrot.slane %v2708_v57, 4  ;;  %v2700_v60 = vrot.slane %v2685_v58, 4  ;;  %v2709_v61 = vmul.f32 %v2685_v58, %v2685_v58 }
 0xe9b   :  { %v2687_v62 = vpop.f32.mrf.mxu0 }
 0xe9c   :  { %v2696_v63 = vrot.slane %v2695_v26, 2  ;;  %v2711_v1 = vadd.f32 %v2710_v59, %v2708_v57  ;;  %v2701_v2 = vadd.f32 %v2700_v60, %v2685_v58  ;;  %v2716_v4 = vrot.slane %v2709_v61, 4  ;;  %v2802_v57 = vld [vmem:[#allocation28 + $0x37] ss:$0 sm:$0xff] }
 0xe9d   :  { %v2688_v5 = vpop.f32.mrf.mxu0 }
 0xe9e   :  { %v2697_v7 = vadd.f32 %v2696_v63, %v2695_v26  ;;  %v2712_v3 = vrot.slane %v2711_v1, 2  ;;  %v2702_v8 = vrot.slane %v2701_v2, 2  ;;  %v2717_v9 = vadd.f32 %v2716_v4, %v2709_v61 }
 0xea0   :  { %v2698_v10 = vrot.slane %v2697_v7, 1  ;;  %v2713_v11 = vadd.f32 %v2712_v3, %v2711_v1  ;;  %v2703_v12 = vadd.f32 %v2702_v8, %v2701_v2  ;;  %v2718_v13 = vrot.slane %v2717_v9, 2 }
 0xea2   :  { %v2699_v14 = vadd.f32 %v2698_v10, %v2697_v7  ;;  %v2714_v15 = vrot.slane %v2713_v11, 1  ;;  %v2704_v16 = vrot.slane %v2703_v12, 1  ;;  %v2719_v17 = vadd.f32 %v2718_v13, %v2717_v9 }
 0xea4   :  { %v2706_v18 = vmul.f32 0.125, %v2699_v14  ;;  %v2715_v6 = vadd.f32 %v2714_v15, %v2713_v11  ;;  %v2705_v19 = vadd.f32 %v2704_v16, %v2703_v12  ;;  %v2720_v20 = vrot.slane %v2719_v17, 1 }
 0xea6   :  { %v2722_v22 = vmul.f32 0.125, %v2715_v6  ;;  %v2724_v23 = vmul.f32 %v2706_v18, %v2706_v18  ;;  %v2707_v24 = vmul.f32 0.125, %v2705_v19  ;;  %v2721_v25 = vadd.f32 %v2720_v20, %v2719_v17 }
 0xea7   :  { %v2730_v39 = vsub.f32 %v2683_v55, %v2706_v18 }
 0xea8   :  { %v2726_v27 = vsub.f32 %v2722_v22, %v2724_v23  ;;  %v2725_v29 = vmul.f32 %v2707_v24, %v2707_v24  ;;  %v2723_v30 = vmul.f32 0.125, %v2721_v25  ;;  %v2731_v44 = vsub.f32 %v2685_v58, %v2707_v24 }
 0xeaa   :  { %v2728_v32 = vmax.f32 %v2726_v27, 0.0  ;;  %v2727_v33 = vsub.f32 %v2723_v30, %v2725_v29 }
 0xeac   :  { %v2732_v34 = vadd.f32 1e-05, %v2728_v32  ;;  %v2729_v35 = vmax.f32 %v2727_v33, 0.0 }
 0xeae   :  { %3660 = vrsqrt.f32 %v2732_v34  ;;  %v2733_v36 = vadd.f32 1e-05, %v2729_v35 }
 0xeb0   :  { %3662 = vrsqrt.f32 %v2733_v36 }
 0xebb   :  { %v3661_v41 = vpop.eup %3660 }
 0xebc   :  { %v2736_v42 = vmul.f32 %v3661_v41, %v2730_v39 }
 0xebd   :  { %v3663_v46 = vpop.eup %3662 }
 0xebe   :  { %v2749_v47 = vmul.f32 %v2742_v40, %v2736_v42  ;;  %v2737_v45 = vmul.f32 %v3663_v46, %v2731_v44 }
 0xec0   :  { %v2762_v50 = vadd.f32 %v2755_v43, %v2749_v47  ;;  %v2750_v51 = vmul.f32 %v2746_v21, %v2737_v45 }
 0xec2   :  { %v2766_v52 = vmul.f32 0.01, %v2762_v50  ;;  %v2763_v0 = vadd.f32 %v2759_v49, %v2750_v51  ;;  %vm2764_vm5 = vcmp.gt.f32.partialorder %v2762_v50, 0.0 }
 0xec4   :  { %vm2765_vm6 = vcmp.gt.f32.partialorder %v2763_v0, 0.0  ;;  %v2767_v48 = vmul.f32 0.01, %v2763_v0  ;;  %v2768_v53 = vsel %vm2764_vm5, %v2762_v50, %v2766_v52 }
 0xec5   :  { %v2803_v56 = vpack.c.bf16 %v2768_v53, %v2768_v53 }
 0xec6   :  { %v2769_v54 = vsel %vm2765_vm6, %v2763_v0, %v2767_v48 }
 0xec7   :  { %v2804_v55 = vpack.c.bf16 %v2769_v54, %v2769_v54 }
 0xec9   :  { %2933 = vmatprep.mubr.bf16.mxu1 %v2804_v55 }
 0xeca   :  { %2934 = vmatmul.mubr.bf16.vlgmr.msra.gmra.mxu1 %v2803_v56 }
 0xf8a   :  { %v3274_v28 = vpop.f32.mrf.mxu1 }
 0xf8c   :  { %v3275_v58 = vpop.f32.mrf.mxu1 }
 0xf8d   :  { %v3276_v26 = vadd.f32 %v3275_v58, %v3274_v28 }
 0xf8e   :  { %v3277_v31 = vpop.f32.mrf.mxu1 }
 0xf8f   :  { %v2936_v59 = vadd.f32 %v3276_v26, %v2802_v57 }
 0xf90   :  { %v3278_v60 = vpop.f32.mrf.mxu1 }
 0xf91   :  { %2941 = vst [vmem:[#allocation29 + $0x8] sm:$0xff] %v2936_v59 }
 0xf92   :  { %4015 = shalt.err (!%p4012_p5)
}
 0xf93   :  { %2951 = dma.vmem_to_hbm [thread:$0]  %s2949_s18, 256, %s4467_s20, [#allocation4]  }
 0xf94   :  { %4042 = dma.done.wait [#allocation4], 256  }
 0xf95   :  { %4043 = vsyncadd [#allocation4], 4294967040 }
 0xf96   :  { %2955 = vsyncpa [#allocation3], 1 }
 0xf97   :  { %2956 = vsyncpa [#allocation6], 1 }
 0xf98   :  { %2957 = vsyncpa [#allocation9], 1 }
 0xf99   :  { %2958 = vsyncpa [#allocation12], 1 }
 0xf9a   :  { %2959 = vsyncpa [#allocation15], 1 }
 0xf9b   :  { %2960 = vsyncpa [#allocation18], 1 }
 0xf9c   :  { %2961 = vsyncpa [#allocation21], 1 }
 0xf9d   :  { %2962 = vsyncpa [#allocation24], 1 }
 0xf9e   :  { %2963 = vsyncpa [#allocation27], 1 }
 0xf9f   :  { %2964 = vsyncpa [#allocation4], 1 }

</bundles_post_ra>
